<compile_context>
chip_gen: v7x
topology: tpu7x:2x2x1
jax: 0.10.0
libtpu: 0.0.40
codegen_flags: <defaults>
</compile_context>

<pallas_src>
import functools

import jax
import jax.numpy as jnp
from jax.experimental import pallas as pl
from jax.experimental.pallas import tpu as pltpu

N_CHANNELS = 16
FIRE_RATE = 0.5
LIVING_THRESHOLD = 0.1
LEAKY_SLOPE = 0.01

# Sobel-like kernels (cross-correlation layout, K[kh][kw] hits x[h+kh-1, w+kw-1])
KX = [[-1.0 / 8, 0.0, 1.0 / 8],
      [-2.0 / 8, 0.0, 2.0 / 8],
      [-1.0 / 8, 0.0, 1.0 / 8]]
KY = [[-1.0 / 8, -2.0 / 8, -1.0 / 8],
      [0.0, 0.0, 0.0],
      [1.0 / 8, 2.0 / 8, 1.0 / 8]]


def ca_kernel(x_ref, mask_ref, edge_ref, w1_ref, w2_ref, b2_ref,
              o_ref, xaug_ref, *, h, w, c):
    hw = h * w
    k_pad = xaug_ref.shape[0]

    xb = x_ref[0]              # (C, HW)
    fire = mask_ref[0]         # (1, HW)

    # Boundary-validity masks (precomputed in the wrapper, one tiny constant
    # input).  Row 0: left neighbor valid, 1: right, 2: up, 3: down.
    ok_l = edge_ref[0:1, :] > 0.5
    ok_r = edge_ref[1:2, :] > 0.5
    ok_u = edge_ref[2:3, :] > 0.5
    ok_d = edge_ref[3:4, :] > 0.5

    def shift(a, d, fill, ok):
        # b[q] = a[q + d] where valid, else `fill`.  Wrap-around values from
        # the roll are always masked out by `ok`.
        rolled = pltpu.roll(a, shift=(-d) % hw, axis=1)
        return jnp.where(ok, rolled, fill)

    def maxpool3(a):
        # separable 3x3 max pool, stride 1, -inf padding (== F.max_pool2d(a,3,1,1))
        m = jnp.maximum(a, jnp.maximum(shift(a, -w, -jnp.inf, ok_u),
                                       shift(a, w, -jnp.inf, ok_d)))
        return jnp.maximum(m, jnp.maximum(shift(m, -1, -jnp.inf, ok_l),
                                          shift(m, 1, -jnp.inf, ok_r)))

    # pre-update liveness from the alpha channel (channel 3)
    alpha = xb[3:4, :]
    pre = maxpool3(alpha) > LIVING_THRESHOLD

    # dx/dy perception: identical 3x3 weight for every (out,in) channel pair
    # => separable Sobel stencil ([1,2,1] smooth x [-1,0,1] diff) on sum_c(x).
    s = jnp.sum(xb, axis=0, keepdims=True)            # (1, HW)
    sm_v = shift(s, -w, 0.0, ok_u) + 2.0 * s + shift(s, w, 0.0, ok_d)
    sm_h = shift(s, -1, 0.0, ok_l) + 2.0 * s + shift(s, 1, 0.0, ok_r)
    dxs = (shift(sm_v, 1, 0.0, ok_r) - shift(sm_v, -1, 0.0, ok_l)) * 0.125
    dys = (shift(sm_h, w, 0.0, ok_d) - shift(sm_h, -w, 0.0, ok_u)) * 0.125

    # augmented operand rows in VMEM scratch:
    # [x (C rows); dxs; dys; ones (carries conv1 bias); zero pad]
    xaug_ref[0:c, :] = xb
    xaug_ref[c:c + 1, :] = dxs
    xaug_ref[c + 1:c + 2, :] = dys
    xaug_ref[c + 2:c + 3, :] = jnp.ones((1, hw), jnp.float32)
    if k_pad > c + 3:
        xaug_ref[c + 3:k_pad, :] = jnp.zeros((k_pad - c - 3, hw), jnp.float32)

    # 1x1 conv #1 (48 -> 128): perception terms + bias folded into one matmul
    y1 = jnp.dot(w1_ref[...], xaug_ref[...], preferred_element_type=jnp.float32)
    y1 = jnp.where(y1 > 0, y1, LEAKY_SLOPE * y1)       # leaky_relu

    # 1x1 conv #2 (128 -> C)
    y2 = jnp.dot(w2_ref[...], y1, preferred_element_type=jnp.float32) + b2_ref[...]

    # stochastic update (fire mask broadcasts over channels)
    x_new = xb + y2 * fire

    # post-update liveness and final masking
    post = maxpool3(x_new[3:4, :]) > LIVING_THRESHOLD
    alive = jnp.logical_and(pre, post).astype(jnp.float32)
    o_ref[0] = x_new * alive


def ca_forward(x, w1, b1, w2, b2, mask):
    """x:    (B, C, H, W) float32 (NCHW, as in the PyTorch module)
       w1:   (3C, 128) = conv1.weight[:, :, 0, 0].T ; b1: (128,)
       w2:   (128, C)  = conv2.weight[:, :, 0, 0].T ; b2: (C,)
       mask: (B, H, W) float 0/1 fire-rate mask (replaces torch.rand<=fire_rate)."""
    B, C, H, W = x.shape
    HW = H * W
    n_hid = w1.shape[1]

    # Hoisted weight folding: columns [0:C] act on x, column C on dx(sum_c x),
    # column C+1 on dy(sum_c x), column C+2 carries the conv1 bias (paired with
    # a ones row); remaining columns are zero (paired with zero rows).
    k_pad = ((C + 3 + 7) // 8) * 8                     # 24 for C=16
    w_aug = jnp.zeros((n_hid, k_pad), jnp.float32)
    w_aug = w_aug.at[:, :C].set(w1[:C, :].T)
    w_aug = w_aug.at[:, C].set(jnp.sum(w1[C:2 * C, :], axis=0))
    w_aug = w_aug.at[:, C + 1].set(jnp.sum(w1[2 * C:3 * C, :], axis=0))
    w_aug = w_aug.at[:, C + 2].set(b1)

    w2_cm = w2.T                                       # (C, 128)
    b2_col = b2.reshape(C, 1)

    x_flat = x.reshape(B, C, HW)                       # lane-dense per-batch slabs
    mask_flat = mask.reshape(B, 1, HW)

    # Boundary-validity masks (avoids integer div/mod inside the kernel).
    q = jnp.arange(HW, dtype=jnp.int32)
    cols = q % W
    rows = q // W
    edge = jnp.stack([cols >= 1,            # left neighbor exists
                      cols <= W - 2,        # right neighbor exists
                      rows >= 1,            # up neighbor exists
                      rows <= H - 2],       # down neighbor exists
                     axis=0).astype(jnp.float32)       # (4, HW)

    out = pl.pallas_call(
        functools.partial(ca_kernel, h=H, w=W, c=C),
        out_shape=jax.ShapeDtypeStruct((B, C, HW), jnp.float32),
        grid_spec=pltpu.PrefetchScalarGridSpec(
            num_scalar_prefetch=0,
            grid=(B,),
            in_specs=[
                pl.BlockSpec((1, C, HW), lambda b: (b, 0, 0)),
                pl.BlockSpec((1, 1, HW), lambda b: (b, 0, 0)),
                pl.BlockSpec((4, HW), lambda b: (0, 0)),
                pl.BlockSpec((n_hid, k_pad), lambda b: (0, 0)),
                pl.BlockSpec((C, n_hid), lambda b: (0, 0)),
                pl.BlockSpec((C, 1), lambda b: (0, 0)),
            ],
            out_specs=pl.BlockSpec((1, C, HW), lambda b: (b, 0, 0)),
            scratch_shapes=[pltpu.VMEM((k_pad, HW), jnp.float32)],
        ),
        compiler_params=pltpu.CompilerParams(
            dimension_semantics=("parallel",)),        # batch axis across TCs
    )(x_flat, mask_flat, edge, w_aug, w2_cm, b2_col)
    return out.reshape(B, C, H, W)


# ---------------- pure-JAX reference (NCHW, mirrors the PyTorch module) ----------------
def _ref_maxpool3(a):  # a: (B, H, W), -inf padding
    B, H, W = a.shape
    ap = jnp.pad(a, ((0, 0), (1, 1), (1, 1)), constant_values=-jnp.inf)
    wins = [ap[:, i:i + H, j:j + W] for i in range(3) for j in range(3)]
    return jnp.max(jnp.stack(wins, 0), 0)


def _ref_conv3(a, k):  # a: (B, H, W), zero padding, cross-correlation
    B, H, W = a.shape
    ap = jnp.pad(a, ((0, 0), (1, 1), (1, 1)))
    out = jnp.zeros_like(a)
    for i in range(3):
        for j in range(3):
            out = out + k[i][j] * ap[:, i:i + H, j:j + W]
    return out


def ref_forward(x, w1, b1, w2, b2, mask):
    B, C, H, W = x.shape
    pre = _ref_maxpool3(x[:, 3]) > LIVING_THRESHOLD
    s = x.sum(1)
    dxs = _ref_conv3(s, KX)
    dys = _ref_conv3(s, KY)
    feat = jnp.concatenate(
        [x,
         jnp.repeat(dxs[:, None], C, axis=1),
         jnp.repeat(dys[:, None], C, axis=1)], axis=1)           # (B, 3C, H, W)
    f2 = feat.transpose(0, 2, 3, 1).reshape(-1, 3 * C)           # (BHW, 3C)
    y1 = f2 @ w1 + b1
    y1 = jnp.where(y1 > 0, y1, LEAKY_SLOPE * y1)
    y2 = (y1 @ w2 + b2).reshape(B, H, W, C).transpose(0, 3, 1, 2)
    xn = x + y2 * mask[:, None]
    post = _ref_maxpool3(xn[:, 3]) > LIVING_THRESHOLD
    alive = (pre & post).astype(x.dtype)
    return xn * alive[:, None]


if __name__ == "__main__":
    B, C = 2, N_CHANNELS
    H, W = 32, 32  # ca_size

    key = jax.random.PRNGKey(0)
    k = jax.random.split(key, 6)
    x = jax.random.normal(k[0], (B, C, H, W), jnp.float32)
    # NOTE: the PyTorch module zero-fills conv2; small deterministic random
    # weights are used here so the whole update path is actually exercised.
    w1 = 0.05 * jax.random.normal(k[1], (3 * C, 128), jnp.float32)   # conv1 weight.T
    b1 = 0.05 * jax.random.normal(k[2], (128,), jnp.float32)
    w2 = 0.05 * jax.random.normal(k[3], (128, C), jnp.float32)       # conv2 weight.T
    b2 = 0.05 * jax.random.normal(k[4], (C,), jnp.float32)
    # TODO(synk): fire-rate Bernoulli mask is generated host-side (the module's
    # torch.rand has no in-kernel RNG-state equivalent we need here).
    mask = (jax.random.uniform(k[5], (B, H, W)) <= FIRE_RATE).astype(jnp.float32)

    out = jax.block_until_ready(ca_forward(x, w1, b1, w2, b2, mask))
    ref = ref_forward(x, w1, b1, w2, b2, mask)
    err = float(jnp.max(jnp.abs(out - ref)))
    assert out.shape == (B, C, H, W)
    assert err < 2e-3, f"mismatch vs reference, max abs err={err}"
    print("KERNEL_OK")
</pallas_src>

<mosaic_0001>
module attributes {stable_mosaic.version = 11 : i64} {
  func.func @ca_kernel(%arg0: i32, %arg1: memref<1x16x1024xf32, #tpu.memory_space<vmem>>, %arg2: memref<1x1x1024xf32, #tpu.memory_space<vmem>>, %arg3: memref<4x1024xf32, #tpu.memory_space<vmem>>, %arg4: memref<128x24xf32, #tpu.memory_space<vmem>>, %arg5: memref<16x128xf32, #tpu.memory_space<vmem>>, %arg6: memref<16x1xf32, #tpu.memory_space<vmem>>, %arg7: memref<1x16x1024xf32, #tpu.memory_space<vmem>>, %arg8: memref<24x1024xf32, #tpu.memory_space<vmem>>) attributes {dimension_semantics = [#tpu.dimension_semantics<parallel>], iteration_bounds = array<i64: 2>, scalar_prefetch = 0 : i64, scratch_operands = 1 : i64, tpu.core_type = #tpu.core_type<tc>, window_params = [{transform_indices = @transform_0, window_bounds = array<i64: 1, 16, 1024>}, {transform_indices = @transform_1, window_bounds = array<i64: 1, 1, 1024>}, {pipeline_mode = #tpu.pipeline_mode<synchronous>, transform_indices = @transform_2, window_bounds = array<i64: 4, 1024>}, {pipeline_mode = #tpu.pipeline_mode<synchronous>, transform_indices = @transform_3, window_bounds = array<i64: 128, 24>}, {pipeline_mode = #tpu.pipeline_mode<synchronous>, transform_indices = @transform_4, window_bounds = array<i64: 16, 128>}, {pipeline_mode = #tpu.pipeline_mode<synchronous>, transform_indices = @transform_5, window_bounds = array<i64: 16, 1>}, {transform_indices = @transform_6, window_bounds = array<i64: 1, 16, 1024>}]} {
    %c0 = arith.constant 0 : index
    %c0_0 = arith.constant 0 : index
    %c0_1 = arith.constant 0 : index
    %0 = vector.load %arg1[%c0, %c0_0, %c0_1] : memref<1x16x1024xf32, #tpu.memory_space<vmem>>, vector<1x16x1024xf32>
    %1 = vector.shape_cast %0 : vector<1x16x1024xf32> to vector<16x1024xf32>
    %c0_2 = arith.constant 0 : index
    %c0_3 = arith.constant 0 : index
    %c0_4 = arith.constant 0 : index
    %2 = vector.load %arg2[%c0_2, %c0_3, %c0_4] : memref<1x1x1024xf32, #tpu.memory_space<vmem>>, vector<1x1x1024xf32>
    %3 = vector.shape_cast %2 : vector<1x1x1024xf32> to vector<1x1024xf32>
    %c0_5 = arith.constant 0 : index
    %c0_6 = arith.constant 0 : index
    %4 = vector.load %arg3[%c0_5, %c0_6] : memref<4x1024xf32, #tpu.memory_space<vmem>>, vector<1x1024xf32>
    %cst = arith.constant 5.000000e-01 : f32
    %5 = vector.broadcast %cst : f32 to vector<1x1024xf32>
    %6 = arith.cmpf ogt, %4, %5 : vector<1x1024xf32>
    %c1 = arith.constant 1 : index
    %c0_7 = arith.constant 0 : index
    %7 = vector.load %arg3[%c1, %c0_7] : memref<4x1024xf32, #tpu.memory_space<vmem>>, vector<1x1024xf32>
    %cst_8 = arith.constant 5.000000e-01 : f32
    %8 = vector.broadcast %cst_8 : f32 to vector<1x1024xf32>
    %9 = arith.cmpf ogt, %7, %8 : vector<1x1024xf32>
    %c2 = arith.constant 2 : index
    %c0_9 = arith.constant 0 : index
    %10 = vector.load %arg3[%c2, %c0_9] : memref<4x1024xf32, #tpu.memory_space<vmem>>, vector<1x1024xf32>
    %cst_10 = arith.constant 5.000000e-01 : f32
    %11 = vector.broadcast %cst_10 : f32 to vector<1x1024xf32>
    %12 = arith.cmpf ogt, %10, %11 : vector<1x1024xf32>
    %c3 = arith.constant 3 : index
    %c0_11 = arith.constant 0 : index
    %13 = vector.load %arg3[%c3, %c0_11] : memref<4x1024xf32, #tpu.memory_space<vmem>>, vector<1x1024xf32>
    %cst_12 = arith.constant 5.000000e-01 : f32
    %14 = vector.broadcast %cst_12 : f32 to vector<1x1024xf32>
    %15 = arith.cmpf ogt, %13, %14 : vector<1x1024xf32>
    %16 = vector.extract_strided_slice %1 {offsets = [3, 0], sizes = [1, 1024], strides = [1, 1]} : vector<16x1024xf32> to vector<1x1024xf32>
    %c32_i32 = arith.constant 32 : i32
    %17 = tpu.dynamic_rotate %16 by %c32_i32 dim 1 : vector<1x1024xf32>, i32 -> vector<1x1024xf32>
    %cst_13 = arith.constant 0xFF800000 : f32
    %18 = vector.broadcast %cst_13 : f32 to vector<1x1024xf32>
    %19 = arith.select %12, %17, %18 : vector<1x1024xi1>, vector<1x1024xf32>
    %c992_i32 = arith.constant 992 : i32
    %20 = tpu.dynamic_rotate %16 by %c992_i32 dim 1 : vector<1x1024xf32>, i32 -> vector<1x1024xf32>
    %cst_14 = arith.constant 0xFF800000 : f32
    %21 = vector.broadcast %cst_14 : f32 to vector<1x1024xf32>
    %22 = arith.select %15, %20, %21 : vector<1x1024xi1>, vector<1x1024xf32>
    %23 = arith.maximumf %19, %22 : vector<1x1024xf32>
    %24 = arith.maximumf %16, %23 : vector<1x1024xf32>
    %c1_i32 = arith.constant 1 : i32
    %25 = tpu.dynamic_rotate %24 by %c1_i32 dim 1 : vector<1x1024xf32>, i32 -> vector<1x1024xf32>
    %cst_15 = arith.constant 0xFF800000 : f32
    %26 = vector.broadcast %cst_15 : f32 to vector<1x1024xf32>
    %27 = arith.select %6, %25, %26 : vector<1x1024xi1>, vector<1x1024xf32>
    %c1023_i32 = arith.constant 1023 : i32
    %28 = tpu.dynamic_rotate %24 by %c1023_i32 dim 1 : vector<1x1024xf32>, i32 -> vector<1x1024xf32>
    %cst_16 = arith.constant 0xFF800000 : f32
    %29 = vector.broadcast %cst_16 : f32 to vector<1x1024xf32>
    %30 = arith.select %9, %28, %29 : vector<1x1024xi1>, vector<1x1024xf32>
    %31 = arith.maximumf %27, %30 : vector<1x1024xf32>
    %32 = arith.maximumf %24, %31 : vector<1x1024xf32>
    %cst_17 = arith.constant 1.000000e-01 : f32
    %33 = vector.broadcast %cst_17 : f32 to vector<1x1024xf32>
    %34 = arith.cmpf ogt, %32, %33 : vector<1x1024xf32>
    %cst_18 = arith.constant dense<0.000000e+00> : vector<1024xf32>
    %35 = vector.multi_reduction <add>, %1, %cst_18 [0] : vector<16x1024xf32> to vector<1024xf32>
    %36 = vector.shape_cast %35 : vector<1024xf32> to vector<1x1024xf32>
    %c32_i32_19 = arith.constant 32 : i32
    %37 = tpu.dynamic_rotate %36 by %c32_i32_19 dim 1 : vector<1x1024xf32>, i32 -> vector<1x1024xf32>
    %cst_20 = arith.constant 0.000000e+00 : f32
    %38 = vector.broadcast %cst_20 : f32 to vector<1x1024xf32>
    %39 = arith.select %12, %37, %38 : vector<1x1024xi1>, vector<1x1024xf32>
    %cst_21 = arith.constant 2.000000e+00 : f32
    %40 = vector.broadcast %cst_21 : f32 to vector<1x1024xf32>
    %41 = arith.mulf %40, %36 : vector<1x1024xf32>
    %42 = arith.addf %39, %41 : vector<1x1024xf32>
    %c992_i32_22 = arith.constant 992 : i32
    %43 = tpu.dynamic_rotate %36 by %c992_i32_22 dim 1 : vector<1x1024xf32>, i32 -> vector<1x1024xf32>
    %cst_23 = arith.constant 0.000000e+00 : f32
    %44 = vector.broadcast %cst_23 : f32 to vector<1x1024xf32>
    %45 = arith.select %15, %43, %44 : vector<1x1024xi1>, vector<1x1024xf32>
    %46 = arith.addf %42, %45 : vector<1x1024xf32>
    %c1_i32_24 = arith.constant 1 : i32
    %47 = tpu.dynamic_rotate %36 by %c1_i32_24 dim 1 : vector<1x1024xf32>, i32 -> vector<1x1024xf32>
    %cst_25 = arith.constant 0.000000e+00 : f32
    %48 = vector.broadcast %cst_25 : f32 to vector<1x1024xf32>
    %49 = arith.select %6, %47, %48 : vector<1x1024xi1>, vector<1x1024xf32>
    %cst_26 = arith.constant 2.000000e+00 : f32
    %50 = vector.broadcast %cst_26 : f32 to vector<1x1024xf32>
    %51 = arith.mulf %50, %36 : vector<1x1024xf32>
    %52 = arith.addf %49, %51 : vector<1x1024xf32>
    %c1023_i32_27 = arith.constant 1023 : i32
    %53 = tpu.dynamic_rotate %36 by %c1023_i32_27 dim 1 : vector<1x1024xf32>, i32 -> vector<1x1024xf32>
    %cst_28 = arith.constant 0.000000e+00 : f32
    %54 = vector.broadcast %cst_28 : f32 to vector<1x1024xf32>
    %55 = arith.select %9, %53, %54 : vector<1x1024xi1>, vector<1x1024xf32>
    %56 = arith.addf %52, %55 : vector<1x1024xf32>
    %c1023_i32_29 = arith.constant 1023 : i32
    %57 = tpu.dynamic_rotate %46 by %c1023_i32_29 dim 1 : vector<1x1024xf32>, i32 -> vector<1x1024xf32>
    %cst_30 = arith.constant 0.000000e+00 : f32
    %58 = vector.broadcast %cst_30 : f32 to vector<1x1024xf32>
    %59 = arith.select %9, %57, %58 : vector<1x1024xi1>, vector<1x1024xf32>
    %c1_i32_31 = arith.constant 1 : i32
    %60 = tpu.dynamic_rotate %46 by %c1_i32_31 dim 1 : vector<1x1024xf32>, i32 -> vector<1x1024xf32>
    %cst_32 = arith.constant 0.000000e+00 : f32
    %61 = vector.broadcast %cst_32 : f32 to vector<1x1024xf32>
    %62 = arith.select %6, %60, %61 : vector<1x1024xi1>, vector<1x1024xf32>
    %63 = arith.subf %59, %62 : vector<1x1024xf32>
    %cst_33 = arith.constant 1.250000e-01 : f32
    %64 = vector.broadcast %cst_33 : f32 to vector<1x1024xf32>
    %65 = arith.mulf %63, %64 : vector<1x1024xf32>
    %c992_i32_34 = arith.constant 992 : i32
    %66 = tpu.dynamic_rotate %56 by %c992_i32_34 dim 1 : vector<1x1024xf32>, i32 -> vector<1x1024xf32>
    %cst_35 = arith.constant 0.000000e+00 : f32
    %67 = vector.broadcast %cst_35 : f32 to vector<1x1024xf32>
    %68 = arith.select %15, %66, %67 : vector<1x1024xi1>, vector<1x1024xf32>
    %c32_i32_36 = arith.constant 32 : i32
    %69 = tpu.dynamic_rotate %56 by %c32_i32_36 dim 1 : vector<1x1024xf32>, i32 -> vector<1x1024xf32>
    %cst_37 = arith.constant 0.000000e+00 : f32
    %70 = vector.broadcast %cst_37 : f32 to vector<1x1024xf32>
    %71 = arith.select %12, %69, %70 : vector<1x1024xi1>, vector<1x1024xf32>
    %72 = arith.subf %68, %71 : vector<1x1024xf32>
    %cst_38 = arith.constant 1.250000e-01 : f32
    %73 = vector.broadcast %cst_38 : f32 to vector<1x1024xf32>
    %74 = arith.mulf %72, %73 : vector<1x1024xf32>
    %c0_39 = arith.constant 0 : index
    %c0_40 = arith.constant 0 : index
    %75 = vector.load %arg8[%c0_39, %c0_40] : memref<24x1024xf32, #tpu.memory_space<vmem>>, vector<16x1024xf32>
    tpu.vector_store %arg8[%c0_39, %c0_40], %1 {strides = array<i32>} : memref<24x1024xf32, #tpu.memory_space<vmem>>, vector<16x1024xf32>,
    %c16 = arith.constant 16 : index
    %c0_41 = arith.constant 0 : index
    %76 = vector.load %arg8[%c16, %c0_41] : memref<24x1024xf32, #tpu.memory_space<vmem>>, vector<1x1024xf32>
    tpu.vector_store %arg8[%c16, %c0_41], %65 {strides = array<i32>} : memref<24x1024xf32, #tpu.memory_space<vmem>>, vector<1x1024xf32>,
    %c17 = arith.constant 17 : index
    %c0_42 = arith.constant 0 : index
    %77 = vector.load %arg8[%c17, %c0_42] : memref<24x1024xf32, #tpu.memory_space<vmem>>, vector<1x1024xf32>
    tpu.vector_store %arg8[%c17, %c0_42], %74 {strides = array<i32>} : memref<24x1024xf32, #tpu.memory_space<vmem>>, vector<1x1024xf32>,
    %cst_43 = arith.constant 1.000000e+00 : f32
    %78 = vector.broadcast %cst_43 : f32 to vector<1x1024xf32>
    %c18 = arith.constant 18 : index
    %c0_44 = arith.constant 0 : index
    %79 = vector.load %arg8[%c18, %c0_44] : memref<24x1024xf32, #tpu.memory_space<vmem>>, vector<1x1024xf32>
    tpu.vector_store %arg8[%c18, %c0_44], %78 {strides = array<i32>} : memref<24x1024xf32, #tpu.memory_space<vmem>>, vector<1x1024xf32>,
    %cst_45 = arith.constant 0.000000e+00 : f32
    %80 = vector.broadcast %cst_45 : f32 to vector<5x1024xf32>
    %c19 = arith.constant 19 : index
    %c0_46 = arith.constant 0 : index
    %81 = vector.load %arg8[%c19, %c0_46] : memref<24x1024xf32, #tpu.memory_space<vmem>>, vector<5x1024xf32>
    tpu.vector_store %arg8[%c19, %c0_46], %80 {strides = array<i32>} : memref<24x1024xf32, #tpu.memory_space<vmem>>, vector<5x1024xf32>,
    %c0_47 = arith.constant 0 : index
    %c0_48 = arith.constant 0 : index
    %82 = vector.load %arg4[%c0_47, %c0_48] : memref<128x24xf32, #tpu.memory_space<vmem>>, vector<128x24xf32>
    %c0_49 = arith.constant 0 : index
    %c0_50 = arith.constant 0 : index
    %83 = vector.load %arg8[%c0_49, %c0_50] : memref<24x1024xf32, #tpu.memory_space<vmem>>, vector<24x1024xf32>
    %cst_51 = arith.constant dense<0.000000e+00> : vector<128x1024xf32>
    %84 = tpu.matmul %82, %83, %cst_51 {dimension_numbers = #tpu.dot_dimension_numbers<[1], [0], [0], [1], [0, 0, 1, 1], [], []>} : vector<128x24xf32>, vector<24x1024xf32>, vector<128x1024xf32> -> vector<128x1024xf32>
    %cst_52 = arith.constant 0.000000e+00 : f32
    %85 = vector.broadcast %cst_52 : f32 to vector<128x1024xf32>
    %86 = arith.cmpf ogt, %84, %85 : vector<128x1024xf32>
    %cst_53 = arith.constant 0.00999999977 : f32
    %87 = vector.broadcast %cst_53 : f32 to vector<128x1024xf32>
    %88 = arith.mulf %87, %84 : vector<128x1024xf32>
    %89 = arith.select %86, %84, %88 : vector<128x1024xi1>, vector<128x1024xf32>
    %c0_54 = arith.constant 0 : index
    %c0_55 = arith.constant 0 : index
    %90 = vector.load %arg5[%c0_54, %c0_55] : memref<16x128xf32, #tpu.memory_space<vmem>>, vector<16x128xf32>
    %cst_56 = arith.constant dense<0.000000e+00> : vector<16x1024xf32>
    %91 = tpu.matmul %90, %89, %cst_56 {dimension_numbers = #tpu.dot_dimension_numbers<[1], [0], [0], [1], [0, 0, 1, 1], [], []>} : vector<16x128xf32>, vector<128x1024xf32>, vector<16x1024xf32> -> vector<16x1024xf32>
    %c0_57 = arith.constant 0 : index
    %c0_58 = arith.constant 0 : index
    %92 = vector.load %arg6[%c0_57, %c0_58] : memref<16x1xf32, #tpu.memory_space<vmem>>, vector<16x1xf32>
    %93 = vector.broadcast %92 : vector<16x1xf32> to vector<16x1024xf32>
    %94 = arith.addf %91, %93 : vector<16x1024xf32>
    %95 = vector.broadcast %3 : vector<1x1024xf32> to vector<16x1024xf32>
    %96 = arith.mulf %94, %95 : vector<16x1024xf32>
    %97 = arith.addf %1, %96 : vector<16x1024xf32>
    %98 = vector.extract_strided_slice %97 {offsets = [3, 0], sizes = [1, 1024], strides = [1, 1]} : vector<16x1024xf32> to vector<1x1024xf32>
    %c32_i32_59 = arith.constant 32 : i32
    %99 = tpu.dynamic_rotate %98 by %c32_i32_59 dim 1 : vector<1x1024xf32>, i32 -> vector<1x1024xf32>
    %cst_60 = arith.constant 0xFF800000 : f32
    %100 = vector.broadcast %cst_60 : f32 to vector<1x1024xf32>
    %101 = arith.select %12, %99, %100 : vector<1x1024xi1>, vector<1x1024xf32>
    %c992_i32_61 = arith.constant 992 : i32
    %102 = tpu.dynamic_rotate %98 by %c992_i32_61 dim 1 : vector<1x1024xf32>, i32 -> vector<1x1024xf32>
    %cst_62 = arith.constant 0xFF800000 : f32
    %103 = vector.broadcast %cst_62 : f32 to vector<1x1024xf32>
    %104 = arith.select %15, %102, %103 : vector<1x1024xi1>, vector<1x1024xf32>
    %105 = arith.maximumf %101, %104 : vector<1x1024xf32>
    %106 = arith.maximumf %98, %105 : vector<1x1024xf32>
    %c1_i32_63 = arith.constant 1 : i32
    %107 = tpu.dynamic_rotate %106 by %c1_i32_63 dim 1 : vector<1x1024xf32>, i32 -> vector<1x1024xf32>
    %cst_64 = arith.constant 0xFF800000 : f32
    %108 = vector.broadcast %cst_64 : f32 to vector<1x1024xf32>
    %109 = arith.select %6, %107, %108 : vector<1x1024xi1>, vector<1x1024xf32>
    %c1023_i32_65 = arith.constant 1023 : i32
    %110 = tpu.dynamic_rotate %106 by %c1023_i32_65 dim 1 : vector<1x1024xf32>, i32 -> vector<1x1024xf32>
    %cst_66 = arith.constant 0xFF800000 : f32
    %111 = vector.broadcast %cst_66 : f32 to vector<1x1024xf32>
    %112 = arith.select %9, %110, %111 : vector<1x1024xi1>, vector<1x1024xf32>
    %113 = arith.maximumf %109, %112 : vector<1x1024xf32>
    %114 = arith.maximumf %106, %113 : vector<1x1024xf32>
    %cst_67 = arith.constant 1.000000e-01 : f32
    %115 = vector.broadcast %cst_67 : f32 to vector<1x1024xf32>
    %116 = arith.cmpf ogt, %114, %115 : vector<1x1024xf32>
    %117 = arith.andi %34, %116 : vector<1x1024xi1>
    %118 = arith.extui %117 : vector<1x1024xi1> to vector<1x1024xi32>
    %119 = arith.sitofp %118 : vector<1x1024xi32> to vector<1x1024xf32>
    %120 = vector.broadcast %119 : vector<1x1024xf32> to vector<16x1024xf32>
    %121 = arith.mulf %97, %120 : vector<16x1024xf32>
    %c0_68 = arith.constant 0 : index
    %c0_69 = arith.constant 0 : index
    %c0_70 = arith.constant 0 : index
    %122 = vector.load %arg7[%c0_68, %c0_69, %c0_70] : memref<1x16x1024xf32, #tpu.memory_space<vmem>>, vector<1x16x1024xf32>
    %123 = vector.shape_cast %122 : vector<1x16x1024xf32> to vector<16x1024xf32>
    %124 = vector.shape_cast %121 : vector<16x1024xf32> to vector<1x16x1024xf32>
    tpu.vector_store %arg7[%c0_68, %c0_69, %c0_70], %124 {strides = array<i32>} : memref<1x16x1024xf32, #tpu.memory_space<vmem>>, vector<1x16x1024xf32>,
    return
  }
  func.func @transform_0(%arg0: i32) -> (i32, i32, i32) {
    %c0_i32 = arith.constant 0 : i32
    %c0_i32_0 = arith.constant 0 : i32
    %c0_i32_1 = arith.constant 0 : i32
    return %arg0, %c0_i32, %c0_i32_0 : i32, i32, i32
  }
  func.func @transform_1(%arg0: i32) -> (i32, i32, i32) {
    %c0_i32 = arith.constant 0 : i32
    %c0_i32_0 = arith.constant 0 : i32
    %c0_i32_1 = arith.constant 0 : i32
    return %arg0, %c0_i32, %c0_i32_0 : i32, i32, i32
  }
  func.func @transform_2(%arg0: i32) -> (i32, i32) {
    %c0_i32 = arith.constant 0 : i32
    %c0_i32_0 = arith.constant 0 : i32
    %c0_i32_1 = arith.constant 0 : i32
    return %c0_i32, %c0_i32_0 : i32, i32
  }
  func.func @transform_3(%arg0: i32) -> (i32, i32) {
    %c0_i32 = arith.constant 0 : i32
    %c0_i32_0 = arith.constant 0 : i32
    %c0_i32_1 = arith.constant 0 : i32
    return %c0_i32, %c0_i32_0 : i32, i32
  }
  func.func @transform_4(%arg0: i32) -> (i32, i32) {
    %c0_i32 = arith.constant 0 : i32
    %c0_i32_0 = arith.constant 0 : i32
    %c0_i32_1 = arith.constant 0 : i32
    return %c0_i32, %c0_i32_0 : i32, i32
  }
  func.func @transform_5(%arg0: i32) -> (i32, i32) {
    %c0_i32 = arith.constant 0 : i32
    %c0_i32_0 = arith.constant 0 : i32
    %c0_i32_1 = arith.constant 0 : i32
    return %c0_i32, %c0_i32_0 : i32, i32
  }
  func.func @transform_6(%arg0: i32) -> (i32, i32, i32) {
    %c0_i32 = arith.constant 0 : i32
    %c0_i32_0 = arith.constant 0 : i32
    %c0_i32_1 = arith.constant 0 : i32
    return %arg0, %c0_i32, %c0_i32_0 : i32, i32, i32
  }
}

</mosaic_0001>

<bundles_post_ra>
// kernel: tpu_custom_call.1
= control target key start
LH: loop header
LB: loop body
LE: loop exit
PB: predicated region body
PF: predicated region fallthrough
CT: control target
= control target key end

     0   :  { %11 = vsyncpa [#allocation4], 0  ;;  %s6049_s0 = inlined_call_operand.hbm [shape: f32[2,16,1024], index: 0, kind: input, shape index: {}]   ;;  %s6050_s1 = inlined_call_operand.vmem [shape: f32[2,1,1024], index: 1, kind: input, shape index: {}]   ;;  %s6051_s2 = inlined_call_operand.vmem [shape: f32[4,1024], index: 2, kind: input, shape index: {}]   ;;  %s6052_s3 = inlined_call_operand.vmem [shape: f32[128,24], index: 3, kind: input, shape index: {}]   ;;  %s6053_s4 = inlined_call_operand.vmem [shape: f32[16,128], index: 4, kind: input, shape index: {}]   ;;  %s6054_s5 = inlined_call_operand.vmem [shape: f32[16,1], index: 5, kind: input, shape index: {}]   ;;  %s6055_s6 = inlined_call_operand.hbm [shape: f32[2,16,1024], index: 6, kind: output, shape index: {}]  }
   0x1   :  { %13 = vsyncpa [#allocation4 + $0x1], 0 }
   0x2   :  { %14 = vsyncpa [#allocation5], 0 }
   0x3   :  { %16 = vsyncpa [#allocation5 + $0x1], 0  ;;  %s4371_s21 = smov 0   ;;  %s4373_s22 = smov 0  }
   0x4   :  { %s4375_s23 = smov 0   ;;  %s4377_s24 = smov 0  }
   0x5 LB: > { %s4392_s25 = sadd.s32 4294967295, %s4320_s24   ;;  %s3905_s26 = sadd.s32 4294967294, %s4320_s24   ;;  %s4320_s24 = sphi %s4377_s24, %s6150_s24   ;;  %s4316_s23 = sphi %s4375_s23, %s6149_s23   ;;  %s4312_s22 = sphi %s4373_s22, %s6148_s22   ;;  %s4308_s21 = sphi %s4371_s21, %s6147_s21  }
   0x6   : > { %s4396_s27 = sadd.s32 1, %s4320_s24   ;;  %s29_s28 = sadd.s32 1, %s4316_s23 }
   0x7   : > { %s26_s29 = ssub.s32 %s4320_s24, %s4396_s27  ;;  %p36_p0 = scmp.ne.s32.totalorder %s4316_s23, %s4312_s22 }
   0x8   : > { %p27_p1 = scmp.eq.s32.totalorder %s26_s29, 0  ;;  %p37_p2 = scmp.eq.s32.totalorder %s4320_s24, 0 }
   0x9   : > { %p42_p3 = scmp.ne.s32.totalorder %s4312_s22, %s4308_s21  ;;  %p43_p4 = scmp.eq.s32.totalorder %s4392_s25, 0 }
   0xa   : > { %s4408_s30 = scalar_select %p27_p1, %s4316_s23, %s29_s28  }
   0xb   : > { %p4410_p5 = por %p37_p2, %p36_p0  ;;  %p4414_p6 = por %p43_p4, %p42_p3 }
   0xc   : > { %p176_p7 = scmp.eq.s32.totalorder %s4392_s25, 1  ;;  %p182_p8 = scmp.eq.s32.totalorder %s3905_s26, 1 }
   0xd   : > { %p4153_p10 = scmp.lt.s32.totalorder %s4320_s24, 2  ;;  %s214_s11 = sand.u32 1, %s4316_s23  }
   0xe   : > { %p4421_p11 = por %p176_p7, %p36_p0  ;;  %p4425_p12 = por %p182_p8, %p42_p3 }
   0xf   : > { %s3995_s12 = sshll.u32 %s4320_s24, 11  ;;  %s3908_s13 = sshll.u32 %s214_s11, 7 }
  0x10   : > { %s6086_s9 = scalar_select %p4421_p11, 1, 0 }
  0x11   : > { %s6087_s10 = scalar_select %p4425_p12, 1, 0 }
  0x12   : > { %s4434_s16 = scalar_lea.hbm %s6049_s0, %s3995_s12  ;;  %s218_s17 = scalar_lea.vmem [#allocation3], %s3908_s13 }
  0x13   : > { %s225_s18 = sshll.u32 %s218_s17, 4  ;;  %p4438_p13 = pnand %p4153_p10, %p4410_p5  ;;  %s4442_s18 = int_to_ptr.vmem [resolvable:$true] %s225_s18 }
  0x14   : > { %s4444_s20 = scalar_lea.sflag [#allocation4], %s214_s11  ;;  %s4224_s26 = scalar_lea.hbm %s4434_s16, 2048 }
  0x15   : > { %p4225_p0 = scmp.ne.s32.totalorder %s4434_s16, %s4224_s26  ;;  %p4226_p1 = pneg %p4438_p13 }
  0x16   : > { %s4229_s7 = scalar_lea.hbm %s6049_s0, 4096  ;;  %p4230_p4 = scmp.lt.u32.totalorder %s4434_s16, %s6049_s0 }
  0x17   : > { %p4227_p2 = pnand %p4226_p1, %p4225_p0  ;;  %p4231_p5 = scmp.lt.u32.totalorder %s4229_s7, %s4224_s26 }
  0x18   : > { %p4233_p8 = scmp.lt.u32.totalorder %s4224_s26, %s4434_s16 }
  0x19   : > { %p4228_p3 = pneg %p4227_p2  ;;  %p4232_p7 = por %p4231_p5, %p4230_p4 }
  0x1b   : > { %p4234_p10 = por %p4233_p8, %p4232_p7 }
  0x1d   : > { %p4235_p9 = pnand %p4234_p10, %p4228_p3 }
  0x1f   : > { %4238 = shalt.err (!%p4235_p9)
}
  0x20   : > { %s4239_s11 = scalar_lea.vmem %s4442_s18, 2048  ;;  %s4322_s14 = smov [#allocation3]  }
  0x21   : > { %p4240_p0 = scmp.ne.s32.totalorder %s4442_s18, %s4239_s11  ;;  %s4244_s15 = sshll.u32 %s4322_s14, 4  ;;  %s4245_s15 = int_to_ptr.vmem [resolvable:$false] %s4244_s15 }
  0x22   : > { %s4246_s17 = scalar_lea.vmem %s4245_s15, 4096  ;;  %p4247_p11 = scmp.lt.s32.totalorder %s4442_s18, %s4245_s15 }
  0x23   : > { %p4242_p2 = pnand %p4240_p0, %p4226_p1  ;;  %p4248_p4 = scmp.lt.s32.totalorder %s4246_s17, %s4239_s11 }
  0x25   : > { %p4243_p12 = pneg %p4242_p2  ;;  %p4249_p5 = por %p4248_p4, %p4247_p11 }
  0x27   : > { %p4250_p7 = pnand %p4249_p5, %p4243_p12 }
  0x29   : > { %4253 = shalt.err (!%p4250_p7)
}
  0x2a   : > { %s4323_s26 = smov 1024   ;;  %s4324_s28 = smov 64  }
  0x2b   : > { %4148 = dma.hbm_to_vmem [thread:$0]  (!%p4438_p13), %s4434_s16, 2048, %s4442_s18, %s4444_s20, %s4323_s26, %s4323_s26, %s4324_s28  }
  0x2c   : > { %p3911_p9 = scmp.ge.s32.totalorder %s4320_s24, 1  ;;  %p240_p1 = scmp.lt.s32.totalorder %s4320_s24, 3 }
  0x2e   : > { %p241_p3 = pnand %p3911_p9, %p240_p1 }
  0x30   : > { %244 = sbr.rel (%p241_p3) target bundleno = 1365 (0x555), region = 44 }
  0x37   : > { %s4475_s29 = sand.u32 1, %s4312_s22  }
  0x38   : > { %s3912_s7 = sshll.u32 %s4475_s29, 7  ;;  %s247_s12 = scalar_lea.sflag [#allocation4], %s4475_s29 }
  0x39   : > { %s4481_s13 = scalar_lea.vmem [#allocation3], %s3912_s7 }
  0x3a   : > { %4299 = dma.done.wait (%p4414_p6), %s247_s12, 2048  }
  0x3b   : > { %4301 = vsyncadd (%p4414_p6), %s247_s12, 4294965248  ;;  %v4488_v0 = vld [vmem:[%s4481_s13 + $0x10] sm:$0xff]  ;;  %v4494_v2 = vld [vmem:[%s4481_s13] sm:$0xff]  ;;  %v355_v17 = vlaneseq  ;;  %s4325_s8 = smov 32   ;;  %s4327_s16 = smov 1   ;;  %vm1758_vm8 = vcmask 195584  }
  0x3c   : > { %v4491_v1 = vld [vmem:[%s4481_s13 + $0x50] sm:$0xff]  ;;  %1687 = vst [vmem:[#allocation2 + $0x10] sm:$0xff] %v4488_v0  ;;  %v4501_v4 = vld [vmem:[%s4481_s13 + $0x40] sm:$0xff]  ;;  %1685 = vst [vmem:[#allocation2] sm:$0xff] %v4494_v2  ;;  %s4328_s18 = smov 96   ;;  %s4329_s19 = smov 127  }
  0x3d   : > { %v823_v3 = vadd.f32 %v4491_v1, %v4488_v0  ;;  %1695 = vst [vmem:[#allocation2 + $0x50] sm:$0xff] %v4491_v1  ;;  %v4505_v5 = vld [vmem:[%s4481_s13 + $0x18] sm:$0xff]  ;;  %v809_v7 = vadd.f32 %v4501_v4, %v4494_v2  ;;  %1693 = vst [vmem:[#allocation2 + $0x40] sm:$0xff] %v4501_v4  ;;  %v4518_v9 = vld [vmem:[%s4481_s13 + $0x8] sm:$0xff]  ;;  %p283_p6 = scmp.lt.s32.totalorder %s4392_s25, 1  ;;  %p6144_p12 = scmp.ne.s32.totalorder %s6086_s9, 0 }
  0x3e   : > { %v4508_v6 = vld [vmem:[%s4481_s13 + $0x58] sm:$0xff]  ;;  %1688 = vst [vmem:[#allocation2 + $0x18] sm:$0xff] %v4505_v5  ;;  %v4521_v10 = vld [vmem:[%s4481_s13 + $0x48] sm:$0xff]  ;;  %1686 = vst [vmem:[#allocation2 + $0x8] sm:$0xff] %v4518_v9 }
  0x3f   : > { %v830_v8 = vadd.f32 %v4508_v6, %v4505_v5  ;;  %1696 = vst [vmem:[#allocation2 + $0x58] sm:$0xff] %v4508_v6  ;;  %v4524_v11 = vld [vmem:[%s4481_s13 + $0x28] sm:$0xff]  ;;  %v824_v12 = vrot.slane %v823_v3, 4  ;;  %v816_v13 = vadd.f32 %v4521_v10, %v4518_v9  ;;  %1694 = vst [vmem:[#allocation2 + $0x48] sm:$0xff] %v4521_v10  ;;  %v4535_v15 = vld [vmem:[%s4481_s13 + $0x20] sm:$0xff]  ;;  %v810_v18 = vrot.slane %v809_v7, 4 }
  0x40   : > { %v4531_v14 = vld [vmem:[%s4481_s13 + $0x68] sm:$0xff]  ;;  %1690 = vst [vmem:[#allocation2 + $0x28] sm:$0xff] %v4524_v11  ;;  %v4538_v16 = vld [vmem:[%s4481_s13 + $0x60] sm:$0xff]  ;;  %1689 = vst [vmem:[#allocation2 + $0x20] sm:$0xff] %v4535_v15  ;;  %s284_s11 = scalar_select %p283_p6, %s4392_s25, 1 }
  0x41   : > { %v831_v19 = vrot.slane %v830_v8, 4  ;;  %v844_v20 = vadd.f32 %v4531_v14, %v4524_v11  ;;  %1698 = vst [vmem:[#allocation2 + $0x68] sm:$0xff] %v4531_v14  ;;  %v837_v21 = vadd.f32 %v4538_v16, %v4535_v15  ;;  %1697 = vst [vmem:[#allocation2 + $0x60] sm:$0xff] %v4538_v16  ;;  %v4548_v22 = vld [vmem:[%s4481_s13 + $0x38] sm:$0xff]  ;;  %v4554_v24 = vld [vmem:[%s4481_s13 + $0x30] sm:$0xff]  ;;  %v825_v25 = vadd.f32 %v824_v12, %v823_v3 }
  0x42   : > { %v4551_v23 = vld [vmem:[%s4481_s13 + $0x78] sm:$0xff]  ;;  %v817_v26 = vrot.slane %v816_v13, 4  ;;  %1692 = vst [vmem:[#allocation2 + $0x38] sm:$0xff] %v4548_v22  ;;  %v4561_v28 = vld [vmem:[%s4481_s13 + $0x70] sm:$0xff]  ;;  %1691 = vst [vmem:[#allocation2 + $0x30] sm:$0xff] %v4554_v24  ;;  %v811_v29 = vadd.f32 %v810_v18, %v809_v7  ;;  %s3914_s14 = sshll.u32 %s284_s11, 3 }
  0x43   : > { %v858_v27 = vadd.f32 %v4551_v23, %v4548_v22  ;;  %1700 = vst [vmem:[#allocation2 + $0x78] sm:$0xff] %v4551_v23  ;;  %v832_v30 = vadd.f32 %v831_v19, %v830_v8  ;;  %v845_v31 = vrot.slane %v844_v20, 4  ;;  %v838_v32 = vrot.slane %v837_v21, 4  ;;  %1699 = vst [vmem:[#allocation2 + $0x70] sm:$0xff] %v4561_v28  ;;  %s286_s26 = scalar_lea.vmem %s6050_s1, %s3914_s14  ;;  %s3807_s13 = scalar_lea.sflag [#allocation5], %s4475_s29 }
  0x44   : > { %v826_v33 = vrot.slane %v825_v25, 2  ;;  %v818_v34 = vadd.f32 %v817_v26, %v816_v13  ;;  %v851_v36 = vadd.f32 %v4561_v28, %v4554_v24  ;;  %v812_v37 = vrot.slane %v811_v29, 2  ;;  %s4333_s11 = smov [#allocation6]  }
  0x45   : > { %v859_v35 = vrot.slane %v858_v27, 4  ;;  %v833_v38 = vrot.slane %v832_v30, 2  ;;  %v846_v39 = vadd.f32 %v845_v31, %v844_v20  ;;  %v839_v40 = vadd.f32 %v838_v32, %v837_v21  ;;  %s4258_s14 = sshll.u32 %s4333_s11, 4  ;;  %s4259_s14 = int_to_ptr.vmem [resolvable:$false] %s4258_s14 }
  0x46   : > { %v827_v41 = vadd.f32 %v826_v33, %v825_v25  ;;  %v819_v42 = vrot.slane %v818_v34, 2  ;;  %v852_v44 = vrot.slane %v851_v36, 4  ;;  %v813_v45 = vadd.f32 %v812_v37, %v811_v29  ;;  %s4260_s15 = scalar_lea.vmem %s4259_s14, 4096 }
  0x47   : > { %v860_v43 = vadd.f32 %v859_v35, %v858_v27  ;;  %v834_v46 = vadd.f32 %v833_v38, %v832_v30  ;;  %v847_v47 = vrot.slane %v846_v39, 2  ;;  %v840_v48 = vrot.slane %v839_v40, 2 }
  0x48   : > { %v828_v49 = vrot.slane %v827_v41, 1  ;;  %v820_v50 = vadd.f32 %v819_v42, %v818_v34  ;;  %v853_v52 = vadd.f32 %v852_v44, %v851_v36  ;;  %v814_v53 = vrot.slane %v813_v45, 1 }
  0x49   : > { %v861_v51 = vrot.slane %v860_v43, 2  ;;  %v835_v54 = vrot.slane %v834_v46, 1  ;;  %v848_v55 = vadd.f32 %v847_v47, %v846_v39  ;;  %v841_v56 = vadd.f32 %v840_v48, %v839_v40 }
  0x4a   : > { %v4567_v57 = vadd.f32 %v828_v49, %v827_v41  ;;  %v821_v58 = vrot.slane %v820_v50, 1  ;;  %v854_v60 = vrot.slane %v853_v52, 2  ;;  %v4569_v61 = vadd.f32 %v814_v53, %v813_v45 }
  0x4b   : > { %v862_v59 = vadd.f32 %v861_v51, %v860_v43  ;;  %v4571_v62 = vadd.f32 %v835_v54, %v834_v46  ;;  %v849_v63 = vrot.slane %v848_v55, 1  ;;  %v842_v3 = vrot.slane %v841_v56, 1 }
  0x4c   : > { %869 = vrot.lane.b32.xlu1 %v4567_v57, %s4325_s8  ;;  %v950_v7 = vmul.f32 2.0, %v4567_v57  ;;  %v822_v8 = vadd.f32 %v821_v58, %v820_v50  ;;  %v855_v13 = vadd.f32 %v854_v60, %v853_v52  ;;  %865 = vrot.lane.b32.xlu0 %v4569_v61, %s4325_s8  ;;  %v948_v18 = vmul.f32 2.0, %v4569_v61 }
  0x4d   : > { %v863_v12 = vrot.slane %v862_v59, 1  ;;  %v951_v19 = vmul.f32 2.0, %v4571_v62  ;;  %v850_v20 = vadd.f32 %v849_v63, %v848_v55  ;;  %v843_v21 = vadd.f32 %v842_v3, %v841_v56 }
  0x4e   : > { %v949_v25 = vmul.f32 2.0, %v822_v8  ;;  %v856_v27 = vrot.slane %v855_v13, 1  ;;  %v4326_v31 = vmov 1966171168   ;;  %v4581_v33 = vshrl.u32 %v355_v17, 7 }
  0x4f   : > { %v864_v26 = vadd.f32 %v863_v12, %v862_v59  ;;  %v953_v29 = vmul.f32 2.0, %v850_v20  ;;  %v952_v30 = vmul.f32 2.0, %v843_v21  ;;  %v379_v32 = vunpack.c.l.s4 %v4326_v31 }
  0x50   : > { %871 = vrot.lane.b32.xlu1 %v4571_v62, %s4325_s8  ;;  %v857_v35 = vadd.f32 %v856_v27, %v855_v13  ;;  %v965_v36 = vcombine.low %v950_v7, %v951_v19  ;;  %v964_v37 = vcombine.low %v948_v18, %v949_v25  ;;  %867 = vrot.lane.b32.xlu0 %v822_v8, %s4325_s8  ;;  %v4643_v3 = vand.u32 127, %v355_v17 }
  0x51   : > { %v955_v34 = vmul.f32 2.0, %v864_v26  ;;  %v380_v38 = vunpack.c.0.s8 %v379_v32  ;;  %v966_v39 = vcombine.low %v952_v30, %v953_v29 }
  0x52   : > { %v954_v40 = vmul.f32 2.0, %v857_v35  ;;  %vm357_vm0 = vcmp.lt.s32.totalorder %v4643_v3, 32  ;;  %vm441_vm1 = vcmp.lt.s32.totalorder %v4643_v3, 96  ;;  %vm599_vm4 = vcmp.lt.s32.totalorder %v4643_v3, 1 }
  0x53   : > { %v4587_v41 = vsub.s32 %v380_v38, %v4581_v33  ;;  %vm683_vm5 = vcmp.lt.s32.totalorder %v4643_v3, 127 }
  0x54   : > { %875 = vrot.lane.b32.xlu1 %v850_v20, %s4325_s8  ;;  %v967_v42 = vcombine.low %v954_v40, %v955_v34  ;;  %873 = vrot.lane.b32.xlu0 %v843_v21, %s4325_s8 }
  0x55   : > { %v981_v43 = vrot.slane %v965_v36, %v4587_v41  ;;  %v988_v44 = vrot.slane %v966_v39, %v4587_v41  ;;  %v974_v45 = vrot.slane %v964_v37, %v4587_v41 }
  0x56   : > { %v995_v46 = vrot.slane %v967_v42, %v4587_v41 }
  0x57   : > { %v996_v47 = vcombine.low %v974_v45, %v981_v43 }
  0x58   : > { %879 = vrot.lane.b32.xlu1 %v864_v26, %s4325_s8  ;;  %v997_v48 = vcombine.low %v988_v44, %v995_v46  ;;  %877 = vrot.lane.b32.xlu0 %v857_v35, %s4325_s8 }
  0x59   : > { %v1004_v49 = vrot.slane %v996_v47, %v4587_v41 }
  0x5a   : > { %v1011_v50 = vrot.slane %v997_v48, %v4587_v41 }
  0x5c   : > { %1101 = vrot.lane.b32.xlu1 %v822_v8, %s4327_s16  ;;  %v4600_v51 = vcombine.low %v1004_v49, %v1011_v50  ;;  %1099 = vrot.lane.b32.xlu0 %v4569_v61, %s4327_s16 }
  0x60   : > { %1105 = vrot.lane.b32.xlu1 %v4571_v62, %s4327_s16  ;;  %1103 = vrot.lane.b32.xlu0 %v4567_v57, %s4327_s16 }
  0x64   : > { %1109 = vrot.lane.b32.xlu1 %v850_v20, %s4327_s16  ;;  %1107 = vrot.lane.b32.xlu0 %v843_v21, %s4327_s16 }
  0x68   : > { %1113 = vrot.lane.b32.xlu1 %v864_v26, %s4327_s16  ;;  %1111 = vrot.lane.b32.xlu0 %v857_v35, %s4327_s16 }
  0x6c   : > { %1017 = vrot.lane.b32.xlu1 %v822_v8, %s4328_s18  ;;  %1015 = vrot.lane.b32.xlu0 %v4569_v61, %s4328_s18 }
  0x70   : > { %1021 = vrot.lane.b32.xlu1 %v4571_v62, %s4328_s18  ;;  %1019 = vrot.lane.b32.xlu0 %v4567_v57, %s4328_s18 }
  0x74   : > { %1025 = vrot.lane.b32.xlu1 %v850_v20, %s4328_s18  ;;  %1023 = vrot.lane.b32.xlu0 %v843_v21, %s4328_s18 }
  0x78   : > { %1029 = vrot.lane.b32.xlu1 %v864_v26, %s4328_s18  ;;  %1027 = vrot.lane.b32.xlu0 %v857_v35, %s4328_s18 }
  0x7c   : > { %1185 = vrot.lane.b32.xlu1 %v822_v8, %s4329_s19  ;;  %1183 = vrot.lane.b32.xlu0 %v4569_v61, %s4329_s19 }
  0x80   : > { %1189 = vrot.lane.b32.xlu1 %v4571_v62, %s4329_s19  ;;  %1187 = vrot.lane.b32.xlu0 %v4567_v57, %s4329_s19 }
  0x84   : > { %1193 = vrot.lane.b32.xlu1 %v850_v20, %s4329_s19  ;;  %1191 = vrot.lane.b32.xlu0 %v843_v21, %s4329_s19 }
  0x88   : > { %1197 = vrot.lane.b32.xlu1 %v864_v26, %s4329_s19  ;;  %1195 = vrot.lane.b32.xlu0 %v857_v35, %s4329_s19 }
  0xbe   : > { %v870_v52 = vpop.permute.xlu1 %869  ;;  %v866_v53 = vpop.permute.xlu0 %865 }
  0xc2   : > { %v872_v54 = vpop.permute.xlu1 %871  ;;  %v868_v55 = vpop.permute.xlu0 %867 }
  0xc3   : > { %v885_v20 = vsel %vm357_vm0, %v870_v52, %v872_v54  ;;  %v886_v21 = vsel %vm357_vm0, %v868_v55, %v870_v52  ;;  %v887_v25 = vsel %vm357_vm0, %v866_v53, %v868_v55 }
  0xc4   : > { %v898_v34 = vcombine.low %v886_v21, %v885_v20  ;;  %v4697_v20 = vld [vmem:[%s6051_s2 + $0x2] ss:$4 sm:$0xff] }
  0xc5   : > { %vm311_vm2 = vcmp.gt.f32.partialorder %v4697_v20, 0.5 }
  0xc6   : > { %v876_v56 = vpop.permute.xlu1 %875  ;;  %v874_v58 = vpop.permute.xlu0 %873  ;;  %v914_v40 = vrot.slane %v898_v34, %v4587_v41 }
  0xc7   : > { %v883_v26 = vsel %vm357_vm0, %v874_v58, %v876_v56  ;;  %v884_v27 = vsel %vm357_vm0, %v872_v54, %v874_v58 }
  0xc8   : > { %v899_v35 = vcombine.low %v884_v27, %v883_v26 }
  0xca   : > { %v880_v59 = vpop.permute.xlu1 %879  ;;  %v878_v60 = vpop.permute.xlu0 %877  ;;  %v921_v42 = vrot.slane %v899_v35, %v4587_v41  ;;  %v4706_v35 = vld [vmem:[%s6051_s2 + $0x3] ss:$4 sm:$0xff] }
  0xcb   : > { %v888_v18 = vsel %vm357_vm0, %v880_v59, %v866_v53  ;;  %v881_v19 = vsel %vm357_vm0, %v878_v60, %v880_v59  ;;  %v882_v17 = vsel %vm357_vm0, %v876_v56, %v878_v60  ;;  %vm314_vm3 = vcmp.gt.f32.partialorder %v4706_v35, 0.5 }
  0xcc   : > { %v897_v30 = vcombine.low %v888_v18, %v887_v25  ;;  %v900_v31 = vcombine.low %v882_v17, %v881_v19 }
  0xce   : > { %v4634_v61 = vpop.permute.xlu1 %1101  ;;  %v4636_v62 = vpop.permute.xlu0 %1099  ;;  %v907_v37 = vrot.slane %v897_v30, %v4587_v41  ;;  %v928_v38 = vrot.slane %v900_v31, %v4587_v41 }
  0xd0   : > { %v929_v45 = vcombine.low %v907_v37, %v914_v40  ;;  %v930_v46 = vcombine.low %v921_v42, %v928_v38 }
  0xd2   : > { %v4638_v57 = vpop.permute.xlu1 %1105  ;;  %v4640_v63 = vpop.permute.xlu0 %1103  ;;  %v937_v55 = vrot.slane %v929_v45, %v4587_v41  ;;  %v944_v56 = vrot.slane %v930_v46, %v4587_v41  ;;  %v4716_v46 = vsub.s32 1, %v4581_v33 }
  0xd6   : > { %v4645_v7 = vpop.permute.xlu1 %1109  ;;  %v4647_v8 = vpop.permute.xlu0 %1107 }
  0xda   : > { %v4650_v12 = vpop.permute.xlu1 %1113  ;;  %v4652_v13 = vpop.permute.xlu0 %1111 }
  0xde   : > { %v1018_v29 = vpop.permute.xlu1 %1017  ;;  %v1016_v32 = vpop.permute.xlu0 %1015 }
  0xdf   : > { %v1037_v48 = vsel %vm441_vm1, %v1016_v32, %v1018_v29 }
  0xe2   : > { %v1022_v36 = vpop.permute.xlu1 %1021  ;;  %v1020_v39 = vpop.permute.xlu0 %1019 }
  0xe3   : > { %v1036_v43 = vsel %vm441_vm1, %v1018_v29, %v1020_v39  ;;  %v1035_v49 = vsel %vm441_vm1, %v1020_v39, %v1022_v36  ;;  %v945_v29 = vcombine.low %v937_v55, %v944_v56  ;;  %v1120_v55 = vsel %vm599_vm4, %v4634_v61, %v4640_v63 }
  0xe4   : > { %v1047_v52 = vcombine.low %v1037_v48, %v1036_v43 }
  0xe5   : > { %v947_v38 = vsel %vm311_vm2, %v945_v29, 0.0 }
  0xe6   : > { %v1026_v44 = vpop.permute.xlu1 %1025  ;;  %v1024_v47 = vpop.permute.xlu0 %1023  ;;  %v1057_v21 = vrot.slane %v1047_v52, %v4587_v41  ;;  %v4728_v52 = vsub.s32 2, %v4581_v33 }
  0xe7   : > { %v1034_v50 = vsel %vm441_vm1, %v1022_v36, %v1024_v47  ;;  %v1033_v18 = vsel %vm441_vm1, %v1024_v47, %v1026_v44  ;;  %v4719_v47 = vsub.s32 0, %v4581_v33 }
  0xe8   : > { %v1048_v53 = vcombine.low %v1035_v49, %v1034_v50  ;;  %v4725_v50 = vsub.s32 3, %v4581_v33 }
  0xea   : > { %v1030_v54 = vpop.permute.xlu1 %1029  ;;  %v1064_v58 = vrot.slane %v1048_v53, %v4587_v41  ;;  %v1028_v60 = vpop.permute.xlu0 %1027  ;;  %v1121_v53 = vsel %vm599_vm4, %v4636_v62, %v4634_v61  ;;  %v1115_v61 = vsel %vm599_vm4, %v4652_v13, %v4650_v12 }
  0xeb   : > { %v1038_v59 = vsel %vm441_vm1, %v1030_v54, %v1016_v32  ;;  %v1031_v19 = vsel %vm441_vm1, %v1028_v60, %v1030_v54  ;;  %v1032_v17 = vsel %vm441_vm1, %v1026_v44, %v1028_v60  ;;  %v1014_v44 = vadd.f32 %v4600_v51, %v947_v38 }
  0xec   : > { %v1049_v25 = vcombine.low %v1033_v18, %v1032_v17  ;;  %v1050_v26 = vcombine.low %v1031_v19, %v1038_v59  ;;  %v1079_v30 = vcombine.low %v1057_v21, %v1064_v58  ;;  %v1119_v54 = vsel %vm599_vm4, %v4640_v63, %v4638_v57 }
  0xed   : > { %v1117_v58 = vsel %vm599_vm4, %v4647_v8, %v4645_v7  ;;  %v1118_v59 = vsel %vm599_vm4, %v4638_v57, %v4647_v8  ;;  %v1122_v60 = vsel %vm599_vm4, %v4650_v12, %v4636_v62  ;;  %v1116_v63 = vsel %vm599_vm4, %v4645_v7, %v4652_v13 }
  0xee   : > { %v1186_v27 = vpop.permute.xlu1 %1185  ;;  %v1071_v31 = vrot.slane %v1049_v25, %v4587_v41  ;;  %v1078_v32 = vrot.slane %v1050_v26, %v4587_v41  ;;  %v1184_v34 = vpop.permute.xlu0 %1183  ;;  %v1087_v39 = vrot.slane %v1079_v30, %v4587_v41  ;;  %v1134_v29 = vcombine.low %v1116_v63, %v1115_v61 }
  0xef   : > { %v1205_v18 = vsel %vm683_vm5, %v1184_v34, %v1186_v27  ;;  %v4783_v30 = vsub.s32 5, %v4581_v33 }
  0xf0   : > { %v1080_v36 = vcombine.low %v1071_v31, %v1078_v32  ;;  %v4786_v31 = vsub.s32 4, %v4581_v33  ;;  %v1132_v32 = vcombine.low %v1120_v55, %v1119_v54 }
  0xf2   : > { %v1190_v37 = vpop.permute.xlu1 %1189  ;;  %v1094_v40 = vrot.slane %v1080_v36, %v4587_v41  ;;  %v1188_v42 = vpop.permute.xlu0 %1187 }
  0xf3   : > { %v1203_v62 = vsel %vm683_vm5, %v1188_v42, %v1190_v37  ;;  %v1204_v17 = vsel %vm683_vm5, %v1186_v27, %v1188_v42  ;;  %v1131_v27 = vcombine.low %v1122_v60, %v1121_v53 }
  0xf4   : > { %v1095_v43 = vcombine.low %v1087_v39, %v1094_v40  ;;  %v1215_v38 = vcombine.low %v1205_v18, %v1204_v17 }
  0xf6   : > { %v1194_v45 = vpop.permute.xlu1 %1193  ;;  %v1097_v48 = vsel %vm314_vm3, %v1095_v43, 0.0  ;;  %v1192_v49 = vpop.permute.xlu0 %1191  ;;  %v1141_v43 = vrot.slane %v1131_v27, %v4587_v41 }
  0xf7   : > { %v1098_v56 = vadd.f32 %v1097_v48, %v1014_v44  ;;  %v1201_v12 = vsel %vm683_vm5, %v1192_v49, %v1194_v45  ;;  %v1202_v7 = vsel %vm683_vm5, %v1190_v37, %v1192_v49  ;;  %v1162_v44 = vrot.slane %v1134_v29, %v4587_v41 }
  0xf8   : > { %v1216_v39 = vcombine.low %v1203_v62, %v1202_v7  ;;  %v4798_v48 = vsub.s32 6, %v4581_v33  ;;  %v1148_v49 = vrot.slane %v1132_v32, %v4587_v41 }
  0xf9   : > { %v1275_v57 = vrot.slane %v1098_v56, %v4716_v46  ;;  %v1271_v8 = vrot.slane %v1098_v56, %v4719_v47  ;;  %v1283_v36 = vrot.slane %v1098_v56, %v4725_v50  ;;  %v1279_v37 = vrot.slane %v1098_v56, %v4728_v52 }
  0xfa   : > { %v1198_v19 = vpop.permute.xlu1 %1197  ;;  %v1196_v13 = vpop.permute.xlu0 %1195  ;;  %v1291_v54 = vrot.slane %v1098_v56, %v4783_v30  ;;  %v1287_v55 = vrot.slane %v1098_v56, %v4786_v31 }
  0xfb   : > { %v1206_v21 = vsel %vm683_vm5, %v1198_v19, %v1184_v34  ;;  %v1199_v25 = vsel %vm683_vm5, %v1196_v13, %v1198_v19  ;;  %v1200_v26 = vsel %vm683_vm5, %v1194_v45, %v1196_v13  ;;  %1310 = vrot.lane.b32.xlu1 %v1275_v57, %s4329_s19  ;;  %1308 = vrot.lane.b32.xlu0 %v1271_v8, %s4329_s19  ;;  %v4795_v45 = vsub.s32 7, %v4581_v33  ;;  %v4819_v13 = vld [vmem:[%s6051_s2] ss:$4 sm:$0xff] }
  0xfc   : > { %v1133_v34 = vcombine.low %v1118_v59, %v1117_v58  ;;  %v1217_v40 = vcombine.low %v1201_v12, %v1200_v26  ;;  %v1218_v42 = vcombine.low %v1199_v25, %v1206_v21  ;;  %v1225_v58 = vrot.slane %v1215_v38, %v4587_v41  ;;  %v4828_v26 = vld [vmem:[%s6051_s2 + $0x1] ss:$4 sm:$0xff] }
  0xfd   : > { %v1232_v59 = vrot.slane %v1216_v39, %v4587_v41  ;;  %v1163_v33 = vcombine.low %v1141_v43, %v1148_v49  ;;  %v1299_v18 = vrot.slane %v1098_v56, %v4795_v45  ;;  %v1295_v19 = vrot.slane %v1098_v56, %v4798_v48 }
  0xfe   : > { %v1155_v53 = vrot.slane %v1133_v34, %v4587_v41  ;;  %v1239_v60 = vrot.slane %v1217_v40, %v4587_v41  ;;  %v1246_v61 = vrot.slane %v1218_v42, %v4587_v41  ;;  %vm305_vm6 = vcmp.gt.f32.partialorder %v4819_v13, 0.5 }
  0xff   : > { %1314 = vrot.lane.b32.xlu1 %v1283_v36, %s4329_s19  ;;  %1312 = vrot.lane.b32.xlu0 %v1279_v37, %s4329_s19  ;;  %v1247_v62 = vcombine.low %v1225_v58, %v1232_v59  ;;  %v1171_v12 = vrot.slane %v1163_v33, %v4587_v41  ;;  %vm6057_vm7 = vcmp.gt.f32.partialorder %v4828_v26, 0.5  ;;  %v3997_v43 = vpack.c.bf16 %v4521_v10, %v4518_v9 }
 0x100   : > { %v1164_v63 = vcombine.low %v1155_v53, %v1162_v44  ;;  %v1248_v17 = vcombine.low %v1239_v60, %v1246_v61  ;;  %v4001_v44 = vpack.c.bf16 %v4508_v6, %v4505_v5  ;;  %v3999_v49 = vpack.c.bf16 %v4501_v4, %v4494_v2 }
 0x101   : > { %v1255_v21 = vrot.slane %v1247_v62, %v4587_v41  ;;  %v4003_v53 = vpack.c.bf16 %v4491_v1, %v4488_v0  ;;  %3998 = vmatprep.subr.bf16.mxu0 %v3997_v43 }
 0x102   : > { %v1178_v7 = vrot.slane %v1164_v63, %v4587_v41  ;;  %v1262_v25 = vrot.slane %v1248_v17, %v4587_v41  ;;  %4002 = vmatprep.subr.bf16.mxu1 %v4001_v44  ;;  %4000 = vmatpush1.bf16.msra.mxu0 %v3999_v49 }
 0x103   : > { %1318 = vrot.lane.b32.xlu1 %v1291_v54, %s4329_s19  ;;  %1316 = vrot.lane.b32.xlu0 %v1287_v55, %s4329_s19 }
 0x104   : > { %v1179_v56 = vcombine.low %v1171_v12, %v1178_v7  ;;  %v1263_v27 = vcombine.low %v1255_v21, %v1262_v25  ;;  %4004 = vmatpush1.bf16.msra.mxu1 %v4003_v53 }
 0x107   : > { %1322 = vrot.lane.b32.xlu1 %v1299_v18, %s4329_s19  ;;  %1320 = vrot.lane.b32.xlu0 %v1295_v19, %s4329_s19 }
 0x10b   : > { %1393 = vrot.lane.b32.xlu1 %v1275_v57, %s4327_s16  ;;  %1391 = vrot.lane.b32.xlu0 %v1271_v8, %s4327_s16  ;;  %v1181_v57 = vsel %vm305_vm6, %v1179_v56, 0.0  ;;  %v1265_v8 = vsel %vm6057_vm7, %v1263_v27, 0.0 }
 0x10c   : > { %v1182_v29 = vadd.f32 %v1181_v57, %v4600_v51 }
 0x10e   : > { %v1266_v32 = vadd.f32 %v1265_v8, %v1182_v29 }
 0x10f   : > { %1397 = vrot.lane.b32.xlu1 %v1283_v36, %s4327_s16  ;;  %1395 = vrot.lane.b32.xlu0 %v1279_v37, %s4327_s16 }
 0x110   : > { %v1484_v34 = vrot.slane %v1266_v32, %v4716_v46  ;;  %v1480_v36 = vrot.slane %v1266_v32, %v4719_v47  ;;  %v1492_v37 = vrot.slane %v1266_v32, %v4725_v50  ;;  %v1488_v51 = vrot.slane %v1266_v32, %v4728_v52 }
 0x111   : > { %v1500_v38 = vrot.slane %v1266_v32, %v4783_v30  ;;  %v1496_v39 = vrot.slane %v1266_v32, %v4786_v31  ;;  %v1508_v40 = vrot.slane %v1266_v32, %v4795_v45  ;;  %v1504_v42 = vrot.slane %v1266_v32, %v4798_v48 }
 0x113   : > { %1401 = vrot.lane.b32.xlu1 %v1291_v54, %s4327_s16  ;;  %1399 = vrot.lane.b32.xlu0 %v1287_v55, %s4327_s16  ;;  %v4330_v54 = vmov 1.0   ;;  %v6058_v55 = vmov 0.0  }
 0x114   : > { %1708 = vst [vmem:[#allocation2 + $0x82] ss:$8 sm:$0xf] %v4330_v54  ;;  %1711 = vst [vmem:[#allocation2 + $0x88] sm:$0xf8] %v6058_v55  ;;  %1871 = vmatprep.mubr.f32.mxu0 %v6058_v55  ;;  %2032 = vmatprep.mubr.f32.mxu1 %v6058_v55 }
 0x115   : > { %1709 = vst [vmem:[#allocation2 + $0x82] ss:$8 sm:$0xf0] %v4330_v54  ;;  %1710 = vst [vmem:[#allocation2 + $0x80] sm:$0xf8] %v6058_v55 }
 0x116   : > { %1712 = vst [vmem:[#allocation2 + $0x90] sm:$0xf8] %v6058_v55  ;;  %1713 = vst [vmem:[#allocation2 + $0x98] sm:$0xf8] %v6058_v55 }
 0x117   : > { %1405 = vrot.lane.b32.xlu1 %v1299_v18, %s4327_s16  ;;  %1403 = vrot.lane.b32.xlu0 %v1295_v19, %s4327_s16  ;;  %1714 = vst [vmem:[#allocation2 + $0xa0] sm:$0xf8] %v6058_v55  ;;  %1715 = vst [vmem:[#allocation2 + $0xa8] sm:$0xf8] %v6058_v55 }
 0x118   : > { %1716 = vst [vmem:[#allocation2 + $0xb0] sm:$0xf8] %v6058_v55  ;;  %1717 = vst [vmem:[#allocation2 + $0xb8] sm:$0xf8] %v6058_v55 }
 0x11b   : > { %1519 = vrot.lane.b32.xlu1 %v1484_v34, %s4328_s18  ;;  %1517 = vrot.lane.b32.xlu0 %v1480_v36, %s4328_s18 }
 0x11f   : > { %1523 = vrot.lane.b32.xlu1 %v1492_v37, %s4328_s18  ;;  %1521 = vrot.lane.b32.xlu0 %v1488_v51, %s4328_s18 }
 0x123   : > { %1527 = vrot.lane.b32.xlu1 %v1500_v38, %s4328_s18  ;;  %1525 = vrot.lane.b32.xlu0 %v1496_v39, %s4328_s18 }
 0x127   : > { %1531 = vrot.lane.b32.xlu1 %v1508_v40, %s4328_s18  ;;  %1529 = vrot.lane.b32.xlu0 %v1504_v42, %s4328_s18 }
 0x12b   : > { %1602 = vrot.lane.b32.xlu1 %v1484_v34, %s4325_s8  ;;  %1600 = vrot.lane.b32.xlu0 %v1480_v36, %s4325_s8 }
 0x12f   : > { %1606 = vrot.lane.b32.xlu1 %v1492_v37, %s4325_s8  ;;  %1604 = vrot.lane.b32.xlu0 %v1488_v51, %s4325_s8 }
 0x133   : > { %1610 = vrot.lane.b32.xlu1 %v1500_v38, %s4325_s8  ;;  %1608 = vrot.lane.b32.xlu0 %v1496_v39, %s4325_s8 }
 0x137   : > { %1614 = vrot.lane.b32.xlu1 %v1508_v40, %s4325_s8  ;;  %1612 = vrot.lane.b32.xlu0 %v1504_v42, %s4325_s8 }
 0x16d   : > { %v1311_v0 = vpop.permute.xlu1 %1310  ;;  %v1309_v1 = vpop.permute.xlu0 %1308 }
 0x16e   : > { %v1330_v56 = vsel %vm683_vm5, %v1309_v1, %v1311_v0 }
 0x171   : > { %v1315_v2 = vpop.permute.xlu1 %1314  ;;  %v1313_v4 = vpop.permute.xlu0 %1312 }
 0x172   : > { %v1328_v7 = vsel %vm683_vm5, %v1313_v4, %v1315_v2  ;;  %v1329_v21 = vsel %vm683_vm5, %v1311_v0, %v1313_v4 }
 0x173   : > { %v1340_v8 = vcombine.low %v1330_v56, %v1329_v21 }
 0x175   : > { %v1319_v5 = vpop.permute.xlu1 %1318  ;;  %v1317_v6 = vpop.permute.xlu0 %1316  ;;  %v1350_v40 = vrot.slane %v1340_v8, %v4587_v41 }
 0x176   : > { %v1326_v63 = vsel %vm683_vm5, %v1317_v6, %v1319_v5  ;;  %v1327_v18 = vsel %vm683_vm5, %v1315_v2, %v1317_v6 }
 0x177   : > { %v1341_v25 = vcombine.low %v1328_v7, %v1327_v18 }
 0x179   : > { %v1323_v9 = vpop.permute.xlu1 %1322  ;;  %v1321_v10 = vpop.permute.xlu0 %1320  ;;  %v1357_v38 = vrot.slane %v1341_v25, %v4587_v41 }
 0x17a   : > { %v1331_v58 = vsel %vm683_vm5, %v1323_v9, %v1309_v1  ;;  %v1324_v59 = vsel %vm683_vm5, %v1321_v10, %v1323_v9  ;;  %v1325_v60 = vsel %vm683_vm5, %v1319_v5, %v1321_v10 }
 0x17b   : > { %v1342_v19 = vcombine.low %v1326_v63, %v1325_v60  ;;  %v1343_v62 = vcombine.low %v1324_v59, %v1331_v58  ;;  %v1372_v2 = vcombine.low %v1350_v40, %v1357_v38 }
 0x17d   : > { %v1394_v61 = vpop.permute.xlu1 %1393  ;;  %v1392_v33 = vpop.permute.xlu0 %1391  ;;  %v1364_v27 = vrot.slane %v1342_v19, %v4587_v41  ;;  %v1371_v57 = vrot.slane %v1343_v62, %v4587_v41 }
 0x17e   : > { %v1413_v53 = vsel %vm599_vm4, %v1392_v33, %v1394_v61 }
 0x17f   : > { %v1373_v39 = vcombine.low %v1364_v27, %v1371_v57 }
 0x181   : > { %v1398_v17 = vpop.permute.xlu1 %1397  ;;  %v1396_v12 = vpop.permute.xlu0 %1395  ;;  %v1387_v6 = vrot.slane %v1373_v39, %v4587_v41 }
 0x182   : > { %v1411_v34 = vsel %vm599_vm4, %v1396_v12, %v1398_v17  ;;  %v1412_v36 = vsel %vm599_vm4, %v1394_v61, %v1396_v12 }
 0x183   : > { %v1424_v42 = vcombine.low %v1412_v36, %v1411_v34 }
 0x185   : > { %v1402_v29 = vpop.permute.xlu1 %1401  ;;  %v1400_v32 = vpop.permute.xlu0 %1399  ;;  %v1440_v9 = vrot.slane %v1424_v42, %v4587_v41 }
 0x186   : > { %v1409_v37 = vsel %vm599_vm4, %v1400_v32, %v1402_v29  ;;  %v1410_v51 = vsel %vm599_vm4, %v1398_v17, %v1400_v32 }
 0x187   : > { %v1425_v43 = vcombine.low %v1410_v51, %v1409_v37 }
 0x189   : > { %v1406_v44 = vpop.permute.xlu1 %1405  ;;  %v1404_v49 = vpop.permute.xlu0 %1403  ;;  %v1447_v10 = vrot.slane %v1425_v43, %v4587_v41 }
 0x18a   : > { %v1414_v54 = vsel %vm599_vm4, %v1406_v44, %v1392_v33  ;;  %v1407_v0 = vsel %vm599_vm4, %v1404_v49, %v1406_v44  ;;  %v1408_v1 = vsel %vm599_vm4, %v1402_v29, %v1404_v49  ;;  %v1380_v33 = vrot.slane %v1372_v2, %v4587_v41 }
 0x18b   : > { %v1423_v4 = vcombine.low %v1414_v54, %v1413_v53  ;;  %v1426_v5 = vcombine.low %v1408_v1, %v1407_v0 }
 0x18c   : > { %v1388_v19 = vcombine.low %v1380_v33, %v1387_v6 }
 0x18d   : > { %v1433_v58 = vrot.slane %v1423_v4, %v4587_v41  ;;  %v1454_v59 = vrot.slane %v1426_v5, %v4587_v41  ;;  %v1520_v60 = vpop.permute.xlu1 %1519  ;;  %v1518_v61 = vpop.permute.xlu0 %1517 }
 0x18e   : > { %v1390_v25 = vsel %vm6057_vm7, %v1388_v19, 0.0  ;;  %v1539_v2 = vsel %vm441_vm1, %v1518_v61, %v1520_v60 }
 0x18f   : > { %v1455_v63 = vcombine.low %v1433_v58, %v1440_v9  ;;  %v1456_v18 = vcombine.low %v1447_v10, %v1454_v59 }
 0x191   : > { %v1463_v62 = vrot.slane %v1455_v63, %v4587_v41  ;;  %v1470_v17 = vrot.slane %v1456_v18, %v4587_v41  ;;  %v1524_v12 = vpop.permute.xlu1 %1523  ;;  %v1522_v7 = vpop.permute.xlu0 %1521 }
 0x192   : > { %v1537_v54 = vsel %vm441_vm1, %v1522_v7, %v1524_v12  ;;  %v1538_v0 = vsel %vm441_vm1, %v1520_v60, %v1522_v7 }
 0x193   : > { %v1471_v21 = vcombine.low %v1463_v62, %v1470_v17  ;;  %v1549_v6 = vcombine.low %v1539_v2, %v1538_v0 }
 0x195   : > { %v1473_v56 = vsel %vm305_vm6, %v1471_v21, 0.0  ;;  %v1528_v27 = vpop.permute.xlu1 %1527  ;;  %v1526_v57 = vpop.permute.xlu0 %1525  ;;  %v1559_v18 = vrot.slane %v1549_v6, %v4587_v41  ;;  %v4005_v6 = vpack.c.bf16 %v4531_v14, %v4524_v11 }
 0x196   : > { %v1474_v8 = vsub.f32 %v1390_v25, %v1473_v56  ;;  %v1535_v40 = vsel %vm441_vm1, %v1526_v57, %v1528_v27  ;;  %v1536_v42 = vsel %vm441_vm1, %v1524_v12, %v1526_v57 }
 0x197   : > { %v1550_v1 = vcombine.low %v1537_v54, %v1536_v42 }
 0x198   : > { %v1475_v29 = vmul.f32 0.125, %v1474_v8 }
 0x199   : > { %v1532_v32 = vpop.permute.xlu1 %1531  ;;  %v1530_v34 = vpop.permute.xlu0 %1529  ;;  %v1566_v60 = vrot.slane %v1550_v1, %v4587_v41  ;;  %v4984_v1 = vld [vmem:[%s6052_s3] sm:$0xff] }
 0x19a   : > { %1702 = vst [vmem:[#allocation2 + $0x80] ss:$8 sm:$0xf] %v1475_v29  ;;  %1703 = vst [vmem:[#allocation2 + $0x80] ss:$8 sm:$0xf0] %v1475_v29  ;;  %v1540_v36 = vsel %vm441_vm1, %v1532_v32, %v1518_v61  ;;  %v1533_v37 = vsel %vm441_vm1, %v1530_v34, %v1532_v32  ;;  %v1534_v51 = vsel %vm441_vm1, %v1528_v27, %v1530_v34 }
 0x19b   : > { %v1551_v43 = vcombine.low %v1535_v40, %v1534_v51  ;;  %v1552_v44 = vcombine.low %v1533_v37, %v1540_v36  ;;  %v1581_v27 = vcombine.low %v1559_v18, %v1566_v60  ;;  %v5069_v60 = vld [vmem:[%s6052_s3 + $0x38] sm:$0xff]  ;;  %v5091_v18 = vld [vmem:[%s6052_s3 + $0x48] sm:$0xff] }
 0x19d   : > { %v1603_v38 = vpop.permute.xlu1 %1602  ;;  %v1601_v39 = vpop.permute.xlu0 %1600  ;;  %v1573_v4 = vrot.slane %v1551_v43, %v4587_v41  ;;  %v1580_v5 = vrot.slane %v1552_v44, %v4587_v41  ;;  %v1589_v51 = vrot.slane %v1581_v27, %v4587_v41 }
 0x19e   : > { %v1622_v7 = vsel %vm357_vm0, %v1601_v39, %v1603_v38 }
 0x19f   : > { %v1582_v61 = vcombine.low %v1573_v4, %v1580_v5 }
 0x1a1   : > { %v1607_v49 = vpop.permute.xlu1 %1606  ;;  %v1605_v53 = vpop.permute.xlu0 %1604  ;;  %v1596_v29 = vrot.slane %v1582_v61, %v4587_v41  ;;  %v5080_v61 = vld [vmem:[%s6052_s3 + $0x40] sm:$0xff] }
 0x1a2   : > { %v1620_v58 = vsel %vm357_vm0, %v1605_v53, %v1607_v49  ;;  %v1621_v59 = vsel %vm357_vm0, %v1603_v38, %v1605_v53 }
 0x1a3   : > { %v1633_v19 = vcombine.low %v1621_v59, %v1620_v58  ;;  %v1597_v40 = vcombine.low %v1589_v51, %v1596_v29  ;;  %v4007_v58 = vpack.c.bf16 %v4538_v16, %v4535_v15  ;;  %v4011_v59 = vpack.c.bf16 %v4561_v28, %v4554_v24  ;;  %v5001_v15 = vld [vmem:[%s6052_s3 + $0x8] sm:$0xff]  ;;  %v5025_v24 = vld [vmem:[%s6052_s3 + $0x18] sm:$0xff]  ;;  %v5036_v28 = vld [vmem:[%s6052_s3 + $0x20] sm:$0xff] }
 0x1a5   : > { %v1611_v9 = vpop.permute.xlu1 %1610  ;;  %v1609_v10 = vpop.permute.xlu0 %1608  ;;  %v1649_v32 = vrot.slane %v1633_v19, %v4587_v41  ;;  %v5102_v19 = vld [vmem:[%s6052_s3 + $0x50] sm:$0xff] }
 0x1a6   : > { %v1618_v33 = vsel %vm357_vm0, %v1609_v10, %v1611_v9  ;;  %v1619_v63 = vsel %vm357_vm0, %v1607_v49, %v1609_v10  ;;  %v1599_v49 = vsel %vm314_vm3, %v1597_v40, 0.0 }
 0x1a7   : > { %v1634_v62 = vcombine.low %v1619_v63, %v1618_v33  ;;  %v5047_v33 = vld [vmem:[%s6052_s3 + $0x28] sm:$0xff]  ;;  %v5058_v63 = vld [vmem:[%s6052_s3 + $0x30] sm:$0xff] }
 0x1a9   : > { %v1615_v17 = vpop.permute.xlu1 %1614  ;;  %v1613_v12 = vpop.permute.xlu0 %1612  ;;  %v1656_v34 = vrot.slane %v1634_v62, %v4587_v41  ;;  %v5113_v62 = vld [vmem:[%s6052_s3 + $0x58] sm:$0xff] }
 0x1aa   : > { %v1623_v21 = vsel %vm357_vm0, %v1615_v17, %v1601_v39  ;;  %v1616_v25 = vsel %vm357_vm0, %v1613_v12, %v1615_v17  ;;  %v1617_v56 = vsel %vm357_vm0, %v1611_v9, %v1613_v12  ;;  %v4009_v9 = vpack.c.bf16 %v4551_v23, %v4548_v22  ;;  %v5012_v23 = vld [vmem:[%s6052_s3 + $0x10] sm:$0xff]  ;;  %v5124_v17 = vld [vmem:[%s6052_s3 + $0x60] sm:$0xff]  ;;  %v5135_v12 = vld [vmem:[%s6052_s3 + $0x68] sm:$0xff] }
 0x1ab   : > { %v1632_v57 = vcombine.low %v1623_v21, %v1622_v7  ;;  %v1635_v8 = vcombine.low %v1617_v56, %v1616_v25  ;;  %v5146_v7 = vld [vmem:[%s6052_s3 + $0x70] sm:$0xff]  ;;  %v5157_v21 = vld [vmem:[%s6052_s3 + $0x78] sm:$0xff] }
 0x1ad   : > { %v1642_v36 = vrot.slane %v1632_v57, %v4587_v41  ;;  %v1663_v37 = vrot.slane %v1635_v8, %v4587_v41 }
 0x1af   : > { %v1664_v38 = vcombine.low %v1642_v36, %v1649_v32  ;;  %v1665_v39 = vcombine.low %v1656_v34, %v1663_v37 }
 0x1b1   : > { %v1672_v42 = vrot.slane %v1664_v38, %v4587_v41  ;;  %v1679_v43 = vrot.slane %v1665_v39, %v4587_v41 }
 0x1b3   : > { %v1680_v44 = vcombine.low %v1672_v42, %v1679_v43 }
 0x1b5   : > { %v1682_v53 = vsel %vm311_vm2, %v1680_v44, 0.0 }
 0x1b6   : > { %v1683_v54 = vsub.f32 %v1599_v49, %v1682_v53 }
 0x1b8   : > { %v1684_v0 = vmul.f32 0.125, %v1683_v54 }
 0x1ba   : > { %1705 = vst [vmem:[#allocation2 + $0x81] ss:$8 sm:$0xf] %v1684_v0  ;;  %1706 = vst [vmem:[#allocation2 + $0x81] ss:$8 sm:$0xf0] %v1684_v0 }
 0x1c1   : > { %v1751_v2 = vld [vmem:[#allocation2 + $0x88] sm:$0xff]  ;;  %v1753_v4 = vld [vmem:[#allocation2 + $0x98] sm:$0xff]  ;;  %v1750_v5 = vld [vmem:[#allocation2 + $0x80] sm:$0xff] }
 0x1c2   : > { %1811 = vmatprep.subr.mxu0 %v1751_v2  ;;  %1972 = vmatprep.subr.mxu1 %v1753_v4  ;;  %v1752_v10 = vld [vmem:[#allocation2 + $0x90] sm:$0xff]  ;;  %v1755_v11 = vld [vmem:[#allocation2 + $0xa8] sm:$0xff]  ;;  %v1757_v14 = vld [vmem:[#allocation2 + $0xb8] sm:$0xff] }
 0x1c3   : > { %1812 = vmatpush1.msra.mxu0 %v1750_v5  ;;  %1973 = vmatpush1.msra.mxu1 %v1752_v10  ;;  %v1754_v16 = vld [vmem:[#allocation2 + $0xa0] sm:$0xff]  ;;  %v1756_v22 = vld [vmem:[#allocation2 + $0xb0] sm:$0xff] }
 0x1c4   : > { %3918 = vmatmul.mubr.msk.f32.vlgmr.msra.gmra.mrb[0].mxu0 %vm1758_vm8, %v4984_v1  ;;  %3934 = vmatmul.mubr.msk.f32.vlgmr.msra.gmra.mrb[0].mxu1 %vm1758_vm8, %v4984_v1 }
 0x1c5   : > { %4006 = vmatprep.subr.bf16.mxu0 %v4005_v6  ;;  %4010 = vmatprep.subr.bf16.mxu1 %v4009_v9 }
 0x1c6   : > { %4008 = vmatpush1.bf16.msra.mxu0 %v4007_v58  ;;  %4012 = vmatpush1.bf16.msra.mxu1 %v4011_v59 }
 0x1c7   : > { %2133 = vmatprep.subr.mxu0 %v1755_v11  ;;  %2294 = vmatprep.subr.mxu1 %v1757_v14 }
 0x1c8   : > { %1877 = vmatprep.mubr.f32.mxu0 %v6058_v55  ;;  %2038 = vmatprep.mubr.f32.mxu1 %v6058_v55 }
 0x1c9   : > { %3919 = vmatmul.mubr.msk.f32.gmra.mrb[2].mxu0 %vm1758_vm8, %v5001_v15  ;;  %3935 = vmatmul.mubr.msk.f32.gmra.mrb[2].mxu1 %vm1758_vm8, %v5001_v15 }
 0x1ca   : > { %2134 = vmatpush1.msra.mxu0 %v1754_v16  ;;  %2295 = vmatpush1.msra.mxu1 %v1756_v22  ;;  %v2837_v22 = vld [vmem:[%s6054_s5] sm:$0xff] }
 0x1cb   : > { %1883 = vmatprep.mubr.f32.mxu0 %v6058_v55  ;;  %2044 = vmatprep.mubr.f32.mxu1 %v6058_v55 }
 0x1cd   : > { %3920 = vmatmul.mubr.msk.f32.gmra.mrb[4].mxu0 %vm1758_vm8, %v5012_v23  ;;  %3936 = vmatmul.mubr.msk.f32.gmra.mrb[4].mxu1 %vm1758_vm8, %v5012_v23 }
 0x1ce   : > { %1889 = vmatprep.mubr.f32.mxu0 %v6058_v55  ;;  %2050 = vmatprep.mubr.f32.mxu1 %v6058_v55 }
 0x1d1   : > { %3921 = vmatmul.mubr.msk.f32.gmra.mrb[6].mxu0 %vm1758_vm8, %v5025_v24  ;;  %3937 = vmatmul.mubr.msk.f32.gmra.mrb[6].mxu1 %vm1758_vm8, %v5025_v24 }
 0x1d2   : > { %1895 = vmatprep.mubr.f32.mxu0 %v6058_v55  ;;  %2056 = vmatprep.mubr.f32.mxu1 %v6058_v55 }
 0x1d5   : > { %3922 = vmatmul.mubr.msk.f32.gmra.mrb[8].mxu0 %vm1758_vm8, %v5036_v28  ;;  %3938 = vmatmul.mubr.msk.f32.gmra.mrb[8].mxu1 %vm1758_vm8, %v5036_v28 }
 0x1d6   : > { %1901 = vmatprep.mubr.f32.mxu0 %v6058_v55  ;;  %2062 = vmatprep.mubr.f32.mxu1 %v6058_v55 }
 0x1d9   : > { %3923 = vmatmul.mubr.msk.f32.gmra.mrb[10].mxu0 %vm1758_vm8, %v5047_v33  ;;  %3939 = vmatmul.mubr.msk.f32.gmra.mrb[10].mxu1 %vm1758_vm8, %v5047_v33 }
 0x1da   : > { %1907 = vmatprep.mubr.f32.mxu0 %v6058_v55  ;;  %2068 = vmatprep.mubr.f32.mxu1 %v6058_v55 }
 0x1dd   : > { %3924 = vmatmul.mubr.msk.f32.gmra.mrb[12].mxu0 %vm1758_vm8, %v5058_v63  ;;  %3940 = vmatmul.mubr.msk.f32.gmra.mrb[12].mxu1 %vm1758_vm8, %v5058_v63 }
 0x1de   : > { %1913 = vmatprep.mubr.f32.mxu0 %v6058_v55  ;;  %2074 = vmatprep.mubr.f32.mxu1 %v6058_v55 }
 0x1e1   : > { %3925 = vmatmul.mubr.msk.f32.gmra.mrb[14].mxu0 %vm1758_vm8, %v5069_v60  ;;  %3941 = vmatmul.mubr.msk.f32.gmra.mrb[14].mxu1 %vm1758_vm8, %v5069_v60 }
 0x1e2   : > { %1919 = vmatprep.mubr.f32.mxu0 %v6058_v55  ;;  %2080 = vmatprep.mubr.f32.mxu1 %v6058_v55 }
 0x1e5   : > { %3926 = vmatmul.mubr.msk.f32.gmra.mrb[16].mxu0 %vm1758_vm8, %v5080_v61  ;;  %3942 = vmatmul.mubr.msk.f32.gmra.mrb[16].mxu1 %vm1758_vm8, %v5080_v61 }
 0x1e6   : > { %1925 = vmatprep.mubr.f32.mxu0 %v6058_v55  ;;  %2086 = vmatprep.mubr.f32.mxu1 %v6058_v55 }
 0x1e9   : > { %3927 = vmatmul.mubr.msk.f32.gmra.mrb[18].mxu0 %vm1758_vm8, %v5091_v18  ;;  %3943 = vmatmul.mubr.msk.f32.gmra.mrb[18].mxu1 %vm1758_vm8, %v5091_v18 }
 0x1ea   : > { %1931 = vmatprep.mubr.f32.mxu0 %v6058_v55  ;;  %2092 = vmatprep.mubr.f32.mxu1 %v6058_v55 }
 0x1ed   : > { %3928 = vmatmul.mubr.msk.f32.gmra.mrb[20].mxu0 %vm1758_vm8, %v5102_v19  ;;  %3944 = vmatmul.mubr.msk.f32.gmra.mrb[20].mxu1 %vm1758_vm8, %v5102_v19 }
 0x1ee   : > { %1937 = vmatprep.mubr.f32.mxu0 %v6058_v55  ;;  %2098 = vmatprep.mubr.f32.mxu1 %v6058_v55 }
 0x1f1   : > { %3929 = vmatmul.mubr.msk.f32.gmra.mrb[22].mxu0 %vm1758_vm8, %v5113_v62  ;;  %3945 = vmatmul.mubr.msk.f32.gmra.mrb[22].mxu1 %vm1758_vm8, %v5113_v62 }
 0x1f2   : > { %1943 = vmatprep.mubr.f32.mxu0 %v6058_v55  ;;  %2104 = vmatprep.mubr.f32.mxu1 %v6058_v55 }
 0x1f5   : > { %3930 = vmatmul.mubr.msk.f32.gmra.mrb[24].mxu0 %vm1758_vm8, %v5124_v17  ;;  %3946 = vmatmul.mubr.msk.f32.gmra.mrb[24].mxu1 %vm1758_vm8, %v5124_v17 }
 0x1f6   : > { %1949 = vmatprep.mubr.f32.mxu0 %v6058_v55  ;;  %2110 = vmatprep.mubr.f32.mxu1 %v6058_v55 }
 0x1f9   : > { %3931 = vmatmul.mubr.msk.f32.gmra.mrb[26].mxu0 %vm1758_vm8, %v5135_v12  ;;  %3947 = vmatmul.mubr.msk.f32.gmra.mrb[26].mxu1 %vm1758_vm8, %v5135_v12 }
 0x1fa   : > { %1955 = vmatprep.mubr.f32.mxu0 %v6058_v55  ;;  %2116 = vmatprep.mubr.f32.mxu1 %v6058_v55 }
 0x1fd   : > { %3932 = vmatmul.mubr.msk.f32.gmra.mrb[28].mxu0 %vm1758_vm8, %v5146_v7  ;;  %3948 = vmatmul.mubr.msk.f32.gmra.mrb[28].mxu1 %vm1758_vm8, %v5146_v7 }
 0x1fe   : > { %1961 = vmatprep.mubr.f32.mxu0 %v6058_v55  ;;  %2122 = vmatprep.mubr.f32.mxu1 %v6058_v55 }
 0x201   : > { %3933 = vmatmul.mubr.msk.f32.gmra.mrb[30].mxu0 %vm1758_vm8, %v5157_v21  ;;  %3949 = vmatmul.mubr.msk.f32.gmra.mrb[30].mxu1 %vm1758_vm8, %v5157_v21 }
 0x202   : > { %2193 = vmatprep.mubr.f32.mxu0 %v6058_v55  ;;  %2354 = vmatprep.mubr.f32.mxu1 %v6058_v55 }
 0x205   : > { %3950 = vmatmul.mubr.msk.f32.vlgmr.msra.gmra.mrb[32].mxu0 %vm1758_vm8, %v4984_v1  ;;  %3966 = vmatmul.mubr.msk.f32.vlgmr.msra.gmra.mrb[32].mxu1 %vm1758_vm8, %v4984_v1 }
 0x206   : > { %2199 = vmatprep.mubr.f32.mxu0 %v6058_v55  ;;  %2360 = vmatprep.mubr.f32.mxu1 %v6058_v55 }
 0x209   : > { %3951 = vmatmul.mubr.msk.f32.gmra.mrb[34].mxu0 %vm1758_vm8, %v5001_v15  ;;  %3967 = vmatmul.mubr.msk.f32.gmra.mrb[34].mxu1 %vm1758_vm8, %v5001_v15 }
 0x20a   : > { %2205 = vmatprep.mubr.f32.mxu0 %v6058_v55  ;;  %2366 = vmatprep.mubr.f32.mxu1 %v6058_v55 }
 0x20d   : > { %3952 = vmatmul.mubr.msk.f32.gmra.mrb[36].mxu0 %vm1758_vm8, %v5012_v23  ;;  %3968 = vmatmul.mubr.msk.f32.gmra.mrb[36].mxu1 %vm1758_vm8, %v5012_v23 }
 0x20e   : > { %2211 = vmatprep.mubr.f32.mxu0 %v6058_v55  ;;  %2372 = vmatprep.mubr.f32.mxu1 %v6058_v55 }
 0x211   : > { %3953 = vmatmul.mubr.msk.f32.gmra.mrb[38].mxu0 %vm1758_vm8, %v5025_v24  ;;  %3969 = vmatmul.mubr.msk.f32.gmra.mrb[38].mxu1 %vm1758_vm8, %v5025_v24 }
 0x212   : > { %2217 = vmatprep.mubr.f32.mxu0 %v6058_v55  ;;  %2378 = vmatprep.mubr.f32.mxu1 %v6058_v55 }
 0x215   : > { %3954 = vmatmul.mubr.msk.f32.gmra.mrb[40].mxu0 %vm1758_vm8, %v5036_v28  ;;  %3970 = vmatmul.mubr.msk.f32.gmra.mrb[40].mxu1 %vm1758_vm8, %v5036_v28 }
 0x216   : > { %2223 = vmatprep.mubr.f32.mxu0 %v6058_v55  ;;  %2384 = vmatprep.mubr.f32.mxu1 %v6058_v55 }
 0x219   : > { %3955 = vmatmul.mubr.msk.f32.gmra.mrb[42].mxu0 %vm1758_vm8, %v5047_v33  ;;  %3971 = vmatmul.mubr.msk.f32.gmra.mrb[42].mxu1 %vm1758_vm8, %v5047_v33 }
 0x21a   : > { %2229 = vmatprep.mubr.f32.mxu0 %v6058_v55  ;;  %2390 = vmatprep.mubr.f32.mxu1 %v6058_v55 }
 0x21d   : > { %3956 = vmatmul.mubr.msk.f32.gmra.mrb[44].mxu0 %vm1758_vm8, %v5058_v63  ;;  %3972 = vmatmul.mubr.msk.f32.gmra.mrb[44].mxu1 %vm1758_vm8, %v5058_v63 }
 0x21e   : > { %2235 = vmatprep.mubr.f32.mxu0 %v6058_v55  ;;  %2396 = vmatprep.mubr.f32.mxu1 %v6058_v55 }
 0x221   : > { %3957 = vmatmul.mubr.msk.f32.gmra.mrb[46].mxu0 %vm1758_vm8, %v5069_v60  ;;  %3973 = vmatmul.mubr.msk.f32.gmra.mrb[46].mxu1 %vm1758_vm8, %v5069_v60 }
 0x222   : > { %2241 = vmatprep.mubr.f32.mxu0 %v6058_v55  ;;  %2402 = vmatprep.mubr.f32.mxu1 %v6058_v55 }
 0x225   : > { %3958 = vmatmul.mubr.msk.f32.gmra.mrb[48].mxu0 %vm1758_vm8, %v5080_v61  ;;  %3974 = vmatmul.mubr.msk.f32.gmra.mrb[48].mxu1 %vm1758_vm8, %v5080_v61 }
 0x226   : > { %2247 = vmatprep.mubr.f32.mxu0 %v6058_v55  ;;  %2408 = vmatprep.mubr.f32.mxu1 %v6058_v55 }
 0x229   : > { %3959 = vmatmul.mubr.msk.f32.gmra.mrb[50].mxu0 %vm1758_vm8, %v5091_v18  ;;  %3975 = vmatmul.mubr.msk.f32.gmra.mrb[50].mxu1 %vm1758_vm8, %v5091_v18 }
 0x22a   : > { %2253 = vmatprep.mubr.f32.mxu0 %v6058_v55  ;;  %2414 = vmatprep.mubr.f32.mxu1 %v6058_v55 }
 0x22d   : > { %3960 = vmatmul.mubr.msk.f32.gmra.mrb[52].mxu0 %vm1758_vm8, %v5102_v19  ;;  %3976 = vmatmul.mubr.msk.f32.gmra.mrb[52].mxu1 %vm1758_vm8, %v5102_v19  ;;  %v4332_v19 = vmov 0  }
 0x22e   : > { %2259 = vmatprep.mubr.f32.mxu0 %v6058_v55  ;;  %2420 = vmatprep.mubr.f32.mxu1 %v6058_v55 }
 0x22f   : > { %4199 = vset.pattern.permute.xlu0 %v4332_v19 }
 0x230   : > { %2841 = vperm.xlu0 %4199, %v2837_v22  }
 0x231   : > { %3961 = vmatmul.mubr.msk.f32.gmra.mrb[54].mxu0 %vm1758_vm8, %v5113_v62  ;;  %3977 = vmatmul.mubr.msk.f32.gmra.mrb[54].mxu1 %vm1758_vm8, %v5113_v62 }
 0x232   : > { %2265 = vmatprep.mubr.f32.mxu0 %v6058_v55  ;;  %2426 = vmatprep.mubr.f32.mxu1 %v6058_v55 }
 0x235   : > { %3962 = vmatmul.mubr.msk.f32.gmra.mrb[56].mxu0 %vm1758_vm8, %v5124_v17  ;;  %3978 = vmatmul.mubr.msk.f32.gmra.mrb[56].mxu1 %vm1758_vm8, %v5124_v17 }
 0x236   : > { %2271 = vmatprep.mubr.f32.mxu0 %v6058_v55  ;;  %2432 = vmatprep.mubr.f32.mxu1 %v6058_v55 }
 0x239   : > { %3963 = vmatmul.mubr.msk.f32.gmra.mrb[58].mxu0 %vm1758_vm8, %v5135_v12  ;;  %3979 = vmatmul.mubr.msk.f32.gmra.mrb[58].mxu1 %vm1758_vm8, %v5135_v12 }
 0x23a   : > { %2277 = vmatprep.mubr.f32.mxu0 %v6058_v55  ;;  %2438 = vmatprep.mubr.f32.mxu1 %v6058_v55 }
 0x23d   : > { %3964 = vmatmul.mubr.msk.f32.gmra.mrb[60].mxu0 %vm1758_vm8, %v5146_v7  ;;  %3980 = vmatmul.mubr.msk.f32.gmra.mrb[60].mxu1 %vm1758_vm8, %v5146_v7 }
 0x23e   : > { %2283 = vmatprep.mubr.f32.mxu0 %v6058_v55  ;;  %2444 = vmatprep.mubr.f32.mxu1 %v6058_v55 }
 0x241   : > { %3965 = vmatmul.mubr.msk.f32.gmra.mrb[62].mxu0 %vm1758_vm8, %v5157_v21  ;;  %3981 = vmatmul.mubr.msk.f32.gmra.mrb[62].mxu1 %vm1758_vm8, %v5157_v21 }
 0x242   : > { %2913 = vmatprep.mubr.f32.mxu0 %v6058_v55  ;;  %2990 = vmatprep.mubr.f32.mxu1 %v6058_v55 }
 0x297   : > { %v1873_v25 = vpop.f32.mrb[0].mxu0  ;;  %v2034_v56 = vpop.f32.mrb[0].mxu1 }
 0x298   : > { %v1875_v27 = vpop.f32.mrb[1].mxu0  ;;  %v2036_v57 = vpop.f32.mrb[1].mxu1  ;;  %v2579_v8 = vmul.f32 0.01, %v1873_v25  ;;  %v2581_v29 = vmul.f32 0.01, %v2034_v56 }
 0x299   : > { %vm2451_vm9 = vcmp.gt.f32.partialorder %v1873_v25, 0.0  ;;  %vm2453_vm10 = vcmp.gt.f32.partialorder %v2034_v56, 0.0  ;;  %vm2452_vm11 = vcmp.gt.f32.partialorder %v1875_v27, 0.0  ;;  %v2580_v32 = vmul.f32 0.01, %v1875_v27 }
 0x29a   : > { %v2707_v38 = vsel %vm2451_vm9, %v1873_v25, %v2579_v8  ;;  %v2709_v39 = vsel %vm2453_vm10, %v2034_v56, %v2581_v29  ;;  %vm2454_vm14 = vcmp.gt.f32.partialorder %v2036_v57, 0.0  ;;  %v2582_v40 = vmul.f32 0.01, %v2036_v57  ;;  %v5267_v25 = vld [vmem:[#allocation2] sm:$0xff] }
 0x29b   : > { %v2708_v5 = vsel %vm2452_vm11, %v1875_v27, %v2580_v32  ;;  %v323_v56 = vrot.slane %v5267_v25, 3 }
 0x29c   : > { %v1879_v34 = vpop.f32.mrb[2].mxu0  ;;  %v2040_v36 = vpop.f32.mrb[2].mxu1  ;;  %v2710_v59 = vsel %vm2454_vm14, %v2036_v57, %v2582_v40 }
 0x29d   : > { %vm2459_vm12 = vcmp.gt.f32.partialorder %v1879_v34, 0.0  ;;  %v2587_v37 = vmul.f32 0.01, %v1879_v34  ;;  %vm2461_vm13 = vcmp.gt.f32.partialorder %v2040_v36, 0.0  ;;  %v2589_v51 = vmul.f32 0.01, %v2040_v36  ;;  %339 = vrot.lane.b32.xlu1 %v323_v56, %s4325_s8 }
 0x29e   : > { %v1881_v42 = vpop.f32.mrb[3].mxu0  ;;  %v2042_v43 = vpop.f32.mrb[3].mxu1 }
 0x29f   : > { %v2715_v44 = vsel %vm2459_vm12, %v1879_v34, %v2587_v37  ;;  %v2717_v49 = vsel %vm2461_vm13, %v2040_v36, %v2589_v51  ;;  %vm2460_vm15 = vcmp.gt.f32.partialorder %v1881_v42, 0.0  ;;  %v2588_v53 = vmul.f32 0.01, %v1881_v42  ;;  %v5271_v34 = vld [vmem:[#allocation2 + $0x10] sm:$0xff] }
 0x2a0   : > { %v4015_v54 = vpack.c.bf16 %v2715_v44, %v2707_v38  ;;  %v4047_v0 = vpack.c.bf16 %v2717_v49, %v2709_v39  ;;  %vm2462_vm8 = vcmp.gt.f32.partialorder %v2042_v43, 0.0  ;;  %v2590_v1 = vmul.f32 0.01, %v2042_v43  ;;  %v1885_v2 = vpop.f32.mrb[4].mxu0  ;;  %v2046_v4 = vpop.f32.mrb[4].mxu1 }
 0x2a1   : > { %v2716_v6 = vsel %vm2460_vm15, %v1881_v42, %v2588_v53  ;;  %v2595_v9 = vmul.f32 0.01, %v1885_v2  ;;  %v1887_v10 = vpop.f32.mrb[5].mxu0  ;;  %v2048_v58 = vpop.f32.mrb[5].mxu1  ;;  %vm2467_vm9 = vcmp.gt.f32.partialorder %v1885_v2, 0.0  ;;  %vm2469_vm10 = vcmp.gt.f32.partialorder %v2046_v4, 0.0 }
 0x2a2   : > { %v2718_v11 = vsel %vm2462_vm8, %v2042_v43, %v2590_v1  ;;  %vm2468_vm12 = vcmp.gt.f32.partialorder %v1887_v10, 0.0  ;;  %v2596_v14 = vmul.f32 0.01, %v1887_v10  ;;  %v2597_v15 = vmul.f32 0.01, %v2046_v4  ;;  %v5278_v42 = vld [vmem:[#allocation2 + $0x8] sm:$0xff] }
 0x2a3   : > { %v4013_v16 = vpack.c.bf16 %v2716_v6, %v2708_v5  ;;  %vm2470_vm13 = vcmp.gt.f32.partialorder %v2048_v58, 0.0  ;;  %v2598_v23 = vmul.f32 0.01, %v2048_v58  ;;  %v4045_v24 = vpack.c.bf16 %v2718_v11, %v2710_v59  ;;  %v5286_v6 = vld [vmem:[#allocation2 + $0x18] sm:$0xff] }
 0x2a4   : > { %v1891_v28 = vpop.f32.mrb[6].mxu0  ;;  %v2052_v33 = vpop.f32.mrb[6].mxu1  ;;  %v2723_v63 = vsel %vm2467_vm9, %v1885_v2, %v2595_v9  ;;  %v2725_v12 = vsel %vm2469_vm10, %v2046_v4, %v2597_v15  ;;  %v325_v36 = vrot.slane %v5271_v34, 3  ;;  %v324_v43 = vrot.slane %v5278_v42, 3 }
 0x2a5   : > { %4014 = vmatprep.subr.bf16.mxu0 %v4013_v16  ;;  %vm2475_vm11 = vcmp.gt.f32.partialorder %v1891_v28, 0.0  ;;  %v2603_v60 = vmul.f32 0.01, %v1891_v28  ;;  %vm2477_vm14 = vcmp.gt.f32.partialorder %v2052_v33, 0.0  ;;  %v1893_v61 = vpop.f32.mrb[7].mxu0  ;;  %v2054_v18 = vpop.f32.mrb[7].mxu1  ;;  %4046 = vmatprep.subr.bf16.mxu1 %v4045_v24  ;;  %v2724_v44 = vsel %vm2468_vm12, %v1887_v10, %v2596_v14 }
 0x2a6   : > { %v2605_v62 = vmul.f32 0.01, %v2052_v33  ;;  %4016 = vmatpush1.bf16.msra.mxu0 %v4015_v54  ;;  %vm2476_vm15 = vcmp.gt.f32.partialorder %v1893_v61, 0.0  ;;  %v2604_v17 = vmul.f32 0.01, %v1893_v61  ;;  %vm2478_vm8 = vcmp.gt.f32.partialorder %v2054_v18, 0.0  ;;  %4048 = vmatpush1.bf16.msra.mxu1 %v4047_v0 }
 0x2a7   : > { %v2731_v7 = vsel %vm2475_vm11, %v1891_v28, %v2603_v60  ;;  %v2606_v21 = vmul.f32 0.01, %v2054_v18  ;;  %v2726_v49 = vsel %vm2470_vm13, %v2048_v58, %v2598_v23  ;;  %343 = vrot.lane.b32.xlu0 %v325_v36, %s4325_s8  ;;  %v326_v9 = vrot.slane %v5286_v6, 3  ;;  %341 = vrot.lane.b32.xlu1 %v324_v43, %s4325_s8  ;;  %v5292_v23 = vld [vmem:[#allocation2 + $0x20] sm:$0xff] }
 0x2a8   : > { %v4019_v27 = vpack.c.bf16 %v2731_v7, %v2723_v63  ;;  %v2733_v57 = vsel %vm2477_vm14, %v2052_v33, %v2605_v62  ;;  %v2732_v8 = vsel %vm2476_vm15, %v1893_v61, %v2604_v17  ;;  %v1897_v29 = vpop.f32.mrb[8].mxu0  ;;  %v2058_v32 = vpop.f32.mrb[8].mxu1  ;;  %v327_v24 = vrot.slane %v5292_v23, 3 }
 0x2a9   : > { %v4051_v37 = vpack.c.bf16 %v2733_v57, %v2725_v12  ;;  %v2734_v51 = vsel %vm2478_vm8, %v2054_v18, %v2606_v21  ;;  %v2611_v38 = vmul.f32 0.01, %v1897_v29  ;;  %v1899_v39 = vpop.f32.mrb[9].mxu0  ;;  %v2060_v40 = vpop.f32.mrb[9].mxu1  ;;  %vm2483_vm9 = vcmp.gt.f32.partialorder %v1897_v29, 0.0  ;;  %v5304_v21 = vld [vmem:[#allocation2 + $0x28] sm:$0xff] }
 0x2aa   : > { %vm2484_vm10 = vcmp.gt.f32.partialorder %v1899_v39, 0.0  ;;  %v2612_v53 = vmul.f32 0.01, %v1899_v39  ;;  %v2613_v54 = vmul.f32 0.01, %v2058_v32  ;;  %v4017_v0 = vpack.c.bf16 %v2732_v8, %v2724_v44 }
 0x2ab   : > { %vm2485_vm11 = vcmp.gt.f32.partialorder %v2058_v32, 0.0  ;;  %v2614_v1 = vmul.f32 0.01, %v2060_v40  ;;  %v4049_v2 = vpack.c.bf16 %v2734_v51, %v2726_v49  ;;  %v2739_v10 = vsel %vm2483_vm9, %v1897_v29, %v2611_v38  ;;  %345 = vrot.lane.b32.xlu1 %v326_v9, %s4325_s8  ;;  %347 = vrot.lane.b32.xlu0 %v327_v24, %s4325_s8  ;;  %v5308_v29 = vld [vmem:[#allocation2 + $0x30] sm:$0xff] }
 0x2ac   : > { %v1903_v4 = vpop.f32.mrb[10].mxu0  ;;  %v2064_v5 = vpop.f32.mrb[10].mxu1  ;;  %4018 = vmatprep.subr.bf16.mxu0 %v4017_v0  ;;  %vm2486_vm8 = vcmp.gt.f32.partialorder %v2060_v40, 0.0  ;;  %v2741_v28 = vsel %vm2485_vm11, %v2058_v32, %v2613_v54  ;;  %v2740_v19 = vsel %vm2484_vm10, %v1899_v39, %v2612_v53  ;;  %v329_v32 = vrot.slane %v5308_v29, 3  ;;  %v5311_v54 = vld [vmem:[#allocation2 + $0x38] sm:$0xff] }
 0x2ad   : > { %vm2491_vm12 = vcmp.gt.f32.partialorder %v1903_v4, 0.0  ;;  %v2619_v58 = vmul.f32 0.01, %v1903_v4  ;;  %vm2493_vm13 = vcmp.gt.f32.partialorder %v2064_v5, 0.0  ;;  %v1905_v59 = vpop.f32.mrb[11].mxu0  ;;  %v2066_v11 = vpop.f32.mrb[11].mxu1  ;;  %4050 = vmatprep.subr.bf16.mxu1 %v4049_v2  ;;  %4020 = vmatpush1.bf16.msra.mxu0 %v4019_v27  ;;  %v2742_v57 = vsel %vm2486_vm8, %v2060_v40, %v2614_v1 }
 0x2ae   : > { %v2621_v14 = vmul.f32 0.01, %v2064_v5  ;;  %vm2492_vm14 = vcmp.gt.f32.partialorder %v1905_v59, 0.0  ;;  %v2620_v15 = vmul.f32 0.01, %v1905_v59  ;;  %vm2494_vm15 = vcmp.gt.f32.partialorder %v2066_v11, 0.0  ;;  %4052 = vmatpush1.bf16.msra.mxu1 %v4051_v37 }
 0x2af   : > { %v2747_v16 = vsel %vm2491_vm12, %v1903_v4, %v2619_v58  ;;  %v2622_v22 = vmul.f32 0.01, %v2066_v11  ;;  %v328_v27 = vrot.slane %v5304_v21, 3  ;;  %v330_v0 = vrot.slane %v5311_v54, 3  ;;  %351 = vrot.lane.b32.xlu0 %v329_v32, %s4325_s8 }
 0x2b0   : > { %v4023_v33 = vpack.c.bf16 %v2747_v16, %v2739_v10  ;;  %v2749_v63 = vsel %vm2493_vm13, %v2064_v5, %v2621_v14  ;;  %v2748_v60 = vsel %vm2492_vm14, %v1905_v59, %v2620_v15  ;;  %v1909_v61 = vpop.f32.mrb[12].mxu0  ;;  %v2070_v18 = vpop.f32.mrb[12].mxu1 }
 0x2b1   : > { %v4055_v62 = vpack.c.bf16 %v2749_v63, %v2741_v28  ;;  %v2750_v17 = vsel %vm2494_vm15, %v2066_v11, %v2622_v22  ;;  %v1911_v12 = vpop.f32.mrb[13].mxu0  ;;  %v2072_v7 = vpop.f32.mrb[13].mxu1  ;;  %vm2499_vm9 = vcmp.gt.f32.partialorder %v1909_v61, 0.0  ;;  %v2627_v8 = vmul.f32 0.01, %v1909_v61  ;;  %349 = vrot.lane.b32.xlu1 %v328_v27, %s4325_s8 }
 0x2b2   : > { %vm2500_vm10 = vcmp.gt.f32.partialorder %v1911_v12, 0.0  ;;  %v2628_v37 = vmul.f32 0.01, %v1911_v12  ;;  %v2629_v51 = vmul.f32 0.01, %v2070_v18  ;;  %v4021_v38 = vpack.c.bf16 %v2748_v60, %v2740_v19 }
 0x2b3   : > { %vm2501_vm11 = vcmp.gt.f32.partialorder %v2070_v18, 0.0  ;;  %v2630_v39 = vmul.f32 0.01, %v2072_v7  ;;  %v4053_v44 = vpack.c.bf16 %v2750_v17, %v2742_v57  ;;  %v2755_v10 = vsel %vm2499_vm9, %v1909_v61, %v2627_v8  ;;  %425 = vrot.lane.b32.xlu0 %v323_v56, %s4328_s18 }
 0x2b4   : > { %v1915_v49 = vpop.f32.mrb[14].mxu0  ;;  %v2076_v53 = vpop.f32.mrb[14].mxu1  ;;  %4022 = vmatprep.subr.bf16.mxu0 %v4021_v38  ;;  %vm2502_vm8 = vcmp.gt.f32.partialorder %v2072_v7, 0.0  ;;  %v2757_v11 = vsel %vm2501_vm11, %v2070_v18, %v2629_v51  ;;  %v2756_v19 = vsel %vm2500_vm10, %v1911_v12, %v2628_v37 }
 0x2b5   : > { %vm2507_vm12 = vcmp.gt.f32.partialorder %v1915_v49, 0.0  ;;  %v2635_v40 = vmul.f32 0.01, %v1915_v49  ;;  %vm2509_vm13 = vcmp.gt.f32.partialorder %v2076_v53, 0.0  ;;  %v1917_v1 = vpop.f32.mrb[15].mxu0  ;;  %v2078_v2 = vpop.f32.mrb[15].mxu1  ;;  %4054 = vmatprep.subr.bf16.mxu1 %v4053_v44  ;;  %4024 = vmatpush1.bf16.msra.mxu0 %v4023_v33 }
 0x2b6   : > { %v2637_v4 = vmul.f32 0.01, %v2076_v53  ;;  %vm2508_vm14 = vcmp.gt.f32.partialorder %v1917_v1, 0.0  ;;  %v2636_v5 = vmul.f32 0.01, %v1917_v1  ;;  %vm2510_vm15 = vcmp.gt.f32.partialorder %v2078_v2, 0.0  ;;  %4056 = vmatpush1.bf16.msra.mxu1 %v4055_v62  ;;  %353 = vrot.lane.b32.xlu1 %v330_v0, %s4325_s8 }
 0x2b7   : > { %v2763_v58 = vsel %vm2507_vm12, %v1915_v49, %v2635_v40  ;;  %v2638_v59 = vmul.f32 0.01, %v2078_v2  ;;  %v2758_v62 = vsel %vm2502_vm8, %v2072_v7, %v2630_v39  ;;  %429 = vrot.lane.b32.xlu0 %v325_v36, %s4328_s18 }
 0x2b8   : > { %v4027_v14 = vpack.c.bf16 %v2763_v58, %v2755_v10  ;;  %v2765_v15 = vsel %vm2509_vm13, %v2076_v53, %v2637_v4  ;;  %v2764_v16 = vsel %vm2508_vm14, %v1917_v1, %v2636_v5  ;;  %v1921_v22 = vpop.f32.mrb[16].mxu0  ;;  %v2082_v28 = vpop.f32.mrb[16].mxu1 }
 0x2b9   : > { %v4059_v33 = vpack.c.bf16 %v2765_v15, %v2757_v11  ;;  %v2766_v63 = vsel %vm2510_vm15, %v2078_v2, %v2638_v59  ;;  %v1923_v60 = vpop.f32.mrb[17].mxu0  ;;  %v2084_v61 = vpop.f32.mrb[17].mxu1  ;;  %vm2515_vm9 = vcmp.gt.f32.partialorder %v1921_v22, 0.0  ;;  %v2643_v18 = vmul.f32 0.01, %v1921_v22 }
 0x2ba   : > { %vm2516_vm11 = vcmp.gt.f32.partialorder %v1923_v60, 0.0  ;;  %v2644_v17 = vmul.f32 0.01, %v1923_v60  ;;  %vm2517_vm12 = vcmp.gt.f32.partialorder %v2082_v28, 0.0  ;;  %v4025_v57 = vpack.c.bf16 %v2764_v16, %v2756_v19  ;;  %427 = vrot.lane.b32.xlu1 %v324_v43, %s4328_s18 }
 0x2bb   : > { %v2645_v8 = vmul.f32 0.01, %v2082_v28  ;;  %v2646_v51 = vmul.f32 0.01, %v2084_v61  ;;  %v4057_v38 = vpack.c.bf16 %v2766_v63, %v2758_v62  ;;  %v2771_v56 = vsel %vm2515_vm9, %v1921_v22, %v2643_v18  ;;  %433 = vrot.lane.b32.xlu0 %v327_v24, %s4328_s18 }
 0x2bc   : > { %v1927_v44 = vpop.f32.mrb[18].mxu0  ;;  %v2088_v49 = vpop.f32.mrb[18].mxu1  ;;  %4026 = vmatprep.subr.bf16.mxu0 %v4025_v57  ;;  %vm2518_vm8 = vcmp.gt.f32.partialorder %v2084_v61, 0.0 }
 0x2bd   : > { %vm2523_vm13 = vcmp.gt.f32.partialorder %v1927_v44, 0.0  ;;  %v2651_v12 = vmul.f32 0.01, %v1927_v44  ;;  %vm2525_vm10 = vcmp.gt.f32.partialorder %v2088_v49, 0.0  ;;  %v1929_v7 = vpop.f32.mrb[19].mxu0  ;;  %v2090_v37 = vpop.f32.mrb[19].mxu1  ;;  %4058 = vmatprep.subr.bf16.mxu1 %v4057_v38  ;;  %4028 = vmatpush1.bf16.msra.mxu0 %v4027_v14  ;;  %v2773_v1 = vsel %vm2517_vm12, %v2082_v28, %v2645_v8 }
 0x2be   : > { %v2653_v39 = vmul.f32 0.01, %v2088_v49  ;;  %vm2524_vm14 = vcmp.gt.f32.partialorder %v1929_v7, 0.0  ;;  %v2652_v25 = vmul.f32 0.01, %v1929_v7  ;;  %vm2526_vm15 = vcmp.gt.f32.partialorder %v2090_v37, 0.0  ;;  %4060 = vmatpush1.bf16.msra.mxu1 %v4059_v33  ;;  %431 = vrot.lane.b32.xlu1 %v326_v9, %s4328_s18 }
 0x2bf   : > { %v2779_v53 = vsel %vm2523_vm13, %v1927_v44, %v2651_v12  ;;  %v2654_v40 = vmul.f32 0.01, %v2090_v37  ;;  %v2772_v14 = vsel %vm2516_vm11, %v1923_v60, %v2644_v17  ;;  %v2774_v34 = vsel %vm2518_vm8, %v2084_v61, %v2646_v51  ;;  %437 = vrot.lane.b32.xlu0 %v329_v32, %s4328_s18 }
 0x2c0   : > { %v4031_v42 = vpack.c.bf16 %v2779_v53, %v2771_v56  ;;  %v2781_v43 = vsel %vm2525_vm10, %v2088_v49, %v2653_v39  ;;  %v2780_v2 = vsel %vm2524_vm14, %v1929_v7, %v2652_v25  ;;  %v1933_v4 = vpop.f32.mrb[20].mxu0  ;;  %v2094_v5 = vpop.f32.mrb[20].mxu1 }
 0x2c1   : > { %v4063_v10 = vpack.c.bf16 %v2781_v43, %v2773_v1  ;;  %v2782_v58 = vsel %vm2526_vm15, %v2090_v37, %v2654_v40  ;;  %v1935_v59 = vpop.f32.mrb[21].mxu0  ;;  %v2096_v11 = vpop.f32.mrb[21].mxu1  ;;  %vm2531_vm9 = vcmp.gt.f32.partialorder %v1933_v4, 0.0  ;;  %v2659_v36 = vmul.f32 0.01, %v1933_v4 }
 0x2c2   : > { %vm2532_vm12 = vcmp.gt.f32.partialorder %v1935_v59, 0.0  ;;  %v2660_v15 = vmul.f32 0.01, %v1935_v59  ;;  %vm2533_vm13 = vcmp.gt.f32.partialorder %v2094_v5, 0.0  ;;  %v4029_v16 = vpack.c.bf16 %v2780_v2, %v2772_v14  ;;  %435 = vrot.lane.b32.xlu1 %v328_v27, %s4328_s18 }
 0x2c3   : > { %v2661_v22 = vmul.f32 0.01, %v2094_v5  ;;  %v2662_v28 = vmul.f32 0.01, %v2096_v11  ;;  %v4061_v33 = vpack.c.bf16 %v2782_v58, %v2774_v34  ;;  %v2787_v24 = vsel %vm2531_vm9, %v1933_v4, %v2659_v36 }
 0x2c4   : > { %v1939_v63 = vpop.f32.mrb[22].mxu0  ;;  %v2100_v6 = vpop.f32.mrb[22].mxu1  ;;  %4030 = vmatprep.subr.bf16.mxu0 %v4029_v16  ;;  %vm2534_vm8 = vcmp.gt.f32.partialorder %v2096_v11, 0.0  ;;  %v2788_v7 = vsel %vm2532_vm12, %v1935_v59, %v2660_v15 }
 0x2c5   : > { %vm2539_vm10 = vcmp.gt.f32.partialorder %v1939_v63, 0.0  ;;  %v2667_v9 = vmul.f32 0.01, %v1939_v63  ;;  %vm2541_vm11 = vcmp.gt.f32.partialorder %v2100_v6, 0.0  ;;  %v1941_v60 = vpop.f32.mrb[23].mxu0  ;;  %v2102_v61 = vpop.f32.mrb[23].mxu1  ;;  %4062 = vmatprep.subr.bf16.mxu1 %v4061_v33  ;;  %4032 = vmatpush1.bf16.msra.mxu0 %v4031_v42  ;;  %v2789_v17 = vsel %vm2533_vm13, %v2094_v5, %v2661_v22 }
 0x2c6   : > { %v2669_v19 = vmul.f32 0.01, %v2100_v6  ;;  %vm2540_vm14 = vcmp.gt.f32.partialorder %v1941_v60, 0.0  ;;  %v2668_v23 = vmul.f32 0.01, %v1941_v60  ;;  %vm2542_vm15 = vcmp.gt.f32.partialorder %v2102_v61, 0.0  ;;  %4064 = vmatpush1.bf16.msra.mxu1 %v4063_v10  ;;  %439 = vrot.lane.b32.xlu1 %v330_v0, %s4328_s18 }
 0x2c7   : > { %v2795_v62 = vsel %vm2539_vm10, %v1939_v63, %v2667_v9  ;;  %v2670_v18 = vmul.f32 0.01, %v2102_v61  ;;  %v2790_v29 = vsel %vm2534_vm8, %v2096_v11, %v2662_v28 }
 0x2c8   : > { %v4035_v21 = vpack.c.bf16 %v2795_v62, %v2787_v24  ;;  %v2797_v27 = vsel %vm2541_vm11, %v2100_v6, %v2669_v19  ;;  %v2796_v57 = vsel %vm2540_vm14, %v1941_v60, %v2668_v23  ;;  %v1945_v8 = vpop.f32.mrb[24].mxu0  ;;  %v2106_v51 = vpop.f32.mrb[24].mxu1 }
 0x2c9   : > { %v4067_v38 = vpack.c.bf16 %v2797_v27, %v2789_v17  ;;  %v2798_v44 = vsel %vm2542_vm15, %v2102_v61, %v2670_v18  ;;  %v1947_v49 = vpop.f32.mrb[25].mxu0  ;;  %v2108_v12 = vpop.f32.mrb[25].mxu1  ;;  %vm2547_vm9 = vcmp.gt.f32.partialorder %v1945_v8, 0.0  ;;  %v2675_v32 = vmul.f32 0.01, %v1945_v8 }
 0x2ca   : > { %vm2548_vm13 = vcmp.gt.f32.partialorder %v1947_v49, 0.0  ;;  %v2676_v37 = vmul.f32 0.01, %v1947_v49  ;;  %vm2549_vm10 = vcmp.gt.f32.partialorder %v2106_v51, 0.0  ;;  %v4033_v39 = vpack.c.bf16 %v2796_v57, %v2788_v7 }
 0x2cb   : > { %v2677_v25 = vmul.f32 0.01, %v2106_v51  ;;  %v2678_v56 = vmul.f32 0.01, %v2108_v12  ;;  %v4065_v53 = vpack.c.bf16 %v2798_v44, %v2790_v29  ;;  %v2803_v4 = vsel %vm2547_vm9, %v1945_v8, %v2675_v32 }
 0x2cc   : > { %v1951_v40 = vpop.f32.mrb[26].mxu0  ;;  %v2112_v1 = vpop.f32.mrb[26].mxu1  ;;  %4034 = vmatprep.subr.bf16.mxu0 %v4033_v39  ;;  %vm2550_vm8 = vcmp.gt.f32.partialorder %v2108_v12, 0.0  ;;  %v2804_v33 = vsel %vm2548_vm13, %v1947_v49, %v2676_v37 }
 0x2cd   : > { %vm2555_vm11 = vcmp.gt.f32.partialorder %v1951_v40, 0.0  ;;  %v2683_v42 = vmul.f32 0.01, %v1951_v40  ;;  %vm2557_vm14 = vcmp.gt.f32.partialorder %v2112_v1, 0.0  ;;  %v1953_v54 = vpop.f32.mrb[27].mxu0  ;;  %v2114_v0 = vpop.f32.mrb[27].mxu1  ;;  %4066 = vmatprep.subr.bf16.mxu1 %v4065_v53  ;;  %4036 = vmatpush1.bf16.msra.mxu0 %v4035_v21  ;;  %v2805_v58 = vsel %vm2549_vm10, %v2106_v51, %v2677_v25 }
 0x2ce   : > { %v2685_v43 = vmul.f32 0.01, %v2112_v1  ;;  %vm2556_vm12 = vcmp.gt.f32.partialorder %v1953_v54, 0.0  ;;  %v2684_v2 = vmul.f32 0.01, %v1953_v54  ;;  %vm2558_vm15 = vcmp.gt.f32.partialorder %v2114_v0, 0.0  ;;  %4068 = vmatpush1.bf16.msra.mxu1 %v4067_v38 }
 0x2cf   : > { %v2811_v5 = vsel %vm2555_vm11, %v1951_v40, %v2683_v42  ;;  %v2686_v10 = vmul.f32 0.01, %v2114_v0  ;;  %v2806_v63 = vsel %vm2550_vm8, %v2108_v12, %v2678_v56 }
 0x2d0   : > { %v4039_v59 = vpack.c.bf16 %v2811_v5, %v2803_v4  ;;  %v2813_v11 = vsel %vm2557_vm14, %v2112_v1, %v2685_v43  ;;  %v2812_v14 = vsel %vm2556_vm12, %v1953_v54, %v2684_v2  ;;  %v1957_v34 = vpop.f32.mrb[28].mxu0  ;;  %v2118_v36 = vpop.f32.mrb[28].mxu1 }
 0x2d1   : > { %v4071_v15 = vpack.c.bf16 %v2813_v11, %v2805_v58  ;;  %v2814_v16 = vsel %vm2558_vm15, %v2114_v0, %v2686_v10  ;;  %v1959_v22 = vpop.f32.mrb[29].mxu0  ;;  %v2120_v28 = vpop.f32.mrb[29].mxu1  ;;  %vm2563_vm9 = vcmp.gt.f32.partialorder %v1957_v34, 0.0  ;;  %v2691_v6 = vmul.f32 0.01, %v1957_v34  ;;  %v5373_v10 = vld [vmem:[%s6053_s4] sm:$0xff] }
 0x2d2   : > { %vm2564_vm11 = vcmp.gt.f32.partialorder %v1959_v22, 0.0  ;;  %v2692_v9 = vmul.f32 0.01, %v1959_v22  ;;  %vm2565_vm7 = vcmp.gt.f32.partialorder %v2118_v36, 0.0  ;;  %v4037_v60 = vpack.c.bf16 %v2812_v14, %v2804_v33 }
 0x2d3   : > { %v2693_v61 = vmul.f32 0.01, %v2118_v36  ;;  %v2694_v19 = vmul.f32 0.01, %v2120_v28  ;;  %v4069_v23 = vpack.c.bf16 %v2814_v16, %v2806_v63  ;;  %v2819_v8 = vsel %vm2563_vm9, %v1957_v34, %v2691_v6 }
 0x2d4   : > { %v1963_v24 = vpop.f32.mrb[30].mxu0  ;;  %v2124_v62 = vpop.f32.mrb[30].mxu1  ;;  %4038 = vmatprep.subr.bf16.mxu0 %v4037_v60  ;;  %vm2566_vm15 = vcmp.gt.f32.partialorder %v2120_v28, 0.0  ;;  %v2820_v53 = vsel %vm2564_vm11, %v1959_v22, %v2692_v9 }
 0x2d5   : > { %vm2571_vm10 = vcmp.gt.f32.partialorder %v1963_v24, 0.0  ;;  %v2699_v18 = vmul.f32 0.01, %v1963_v24  ;;  %vm2573_vm14 = vcmp.gt.f32.partialorder %v2124_v62, 0.0  ;;  %v1965_v17 = vpop.f32.mrb[31].mxu0  ;;  %v2126_v21 = vpop.f32.mrb[31].mxu1  ;;  %4070 = vmatprep.subr.bf16.mxu1 %v4069_v23  ;;  %4040 = vmatpush1.bf16.msra.mxu0 %v4039_v59  ;;  %v2821_v44 = vsel %vm2565_vm7, %v2118_v36, %v2693_v61 }
 0x2d6   : > { %v2701_v27 = vmul.f32 0.01, %v2124_v62  ;;  %vm2572_vm13 = vcmp.gt.f32.partialorder %v1965_v17, 0.0  ;;  %v2700_v57 = vmul.f32 0.01, %v1965_v17  ;;  %vm2574_vm12 = vcmp.gt.f32.partialorder %v2126_v21, 0.0  ;;  %4072 = vmatpush1.bf16.msra.mxu1 %v4071_v15 }
 0x2d7   : > { %v2827_v51 = vsel %vm2571_vm10, %v1963_v24, %v2699_v18  ;;  %v2702_v38 = vmul.f32 0.01, %v2126_v21  ;;  %v2822_v40 = vsel %vm2566_vm15, %v2120_v28, %v2694_v19 }
 0x2d8   : > { %v4043_v49 = vpack.c.bf16 %v2827_v51, %v2819_v8  ;;  %v2829_v12 = vsel %vm2573_vm14, %v2124_v62, %v2701_v27  ;;  %v2828_v7 = vsel %vm2572_vm13, %v1965_v17, %v2700_v57  ;;  %v2195_v29 = vpop.f32.mrb[32].mxu0  ;;  %v2356_v32 = vpop.f32.mrb[32].mxu1  ;;  %v5386_v17 = vld [vmem:[%s6053_s4 + $0x8] sm:$0xff] }
 0x2d9   : > { %v4075_v37 = vpack.c.bf16 %v2829_v12, %v2821_v44  ;;  %v2830_v39 = vsel %vm2574_vm12, %v2126_v21, %v2702_v38  ;;  %v2197_v25 = vpop.f32.mrb[33].mxu0  ;;  %v2358_v56 = vpop.f32.mrb[33].mxu1  ;;  %vm2455_vm8 = vcmp.gt.f32.partialorder %v2195_v29, 0.0  ;;  %v2583_v1 = vmul.f32 0.01, %v2195_v29 }
 0x2da   : > { %vm2456_vm9 = vcmp.gt.f32.partialorder %v2197_v25, 0.0  ;;  %v2584_v42 = vmul.f32 0.01, %v2197_v25  ;;  %vm2457_vm10 = vcmp.gt.f32.partialorder %v2356_v32, 0.0  ;;  %v4041_v54 = vpack.c.bf16 %v2828_v7, %v2820_v53 }
 0x2db   : > { %v2585_v0 = vmul.f32 0.01, %v2356_v32  ;;  %v2586_v43 = vmul.f32 0.01, %v2358_v56  ;;  %v4073_v2 = vpack.c.bf16 %v2830_v39, %v2822_v40  ;;  %v2711_v36 = vsel %vm2455_vm8, %v2195_v29, %v2583_v1 }
 0x2dc   : > { %v2201_v4 = vpop.f32.mrb[34].mxu0  ;;  %v2362_v5 = vpop.f32.mrb[34].mxu1  ;;  %4042 = vmatprep.subr.bf16.mxu0 %v4041_v54  ;;  %vm2458_vm12 = vcmp.gt.f32.partialorder %v2358_v56, 0.0  ;;  %v2712_v24 = vsel %vm2456_vm9, %v2197_v25, %v2584_v42 }
 0x2dd   : > { %vm2463_vm7 = vcmp.gt.f32.partialorder %v2201_v4, 0.0  ;;  %v2591_v58 = vmul.f32 0.01, %v2201_v4  ;;  %vm2465_vm11 = vcmp.gt.f32.partialorder %v2362_v5, 0.0  ;;  %v2203_v59 = vpop.f32.mrb[35].mxu0  ;;  %v2364_v11 = vpop.f32.mrb[35].mxu1  ;;  %4074 = vmatprep.subr.bf16.mxu1 %v4073_v2  ;;  %4044 = vmatpush1.bf16.msra.mxu0 %v4043_v49  ;;  %v2713_v22 = vsel %vm2457_vm10, %v2356_v32, %v2585_v0 }
 0x2de   : > { %v2593_v14 = vmul.f32 0.01, %v2362_v5  ;;  %vm2464_vm14 = vcmp.gt.f32.partialorder %v2203_v59, 0.0  ;;  %v2592_v34 = vmul.f32 0.01, %v2203_v59  ;;  %vm2466_vm13 = vcmp.gt.f32.partialorder %v2364_v11, 0.0  ;;  %4076 = vmatpush1.bf16.msra.mxu1 %v4075_v37 }
 0x2df   : > { %v2719_v15 = vsel %vm2463_vm7, %v2201_v4, %v2591_v58  ;;  %v2594_v16 = vmul.f32 0.01, %v2364_v11  ;;  %v2714_v62 = vsel %vm2458_vm12, %v2358_v56, %v2586_v43 }
 0x2e0   : > { %v4079_v28 = vpack.c.bf16 %v2719_v15, %v2711_v36  ;;  %v2721_v33 = vsel %vm2465_vm11, %v2362_v5, %v2593_v14  ;;  %v2720_v63 = vsel %vm2464_vm14, %v2203_v59, %v2592_v34  ;;  %v2207_v6 = vpop.f32.mrb[36].mxu0  ;;  %v2368_v9 = vpop.f32.mrb[36].mxu1  ;;  %2914 = vmatmul.mubr.f32.vlgmr.msra.gmra.mrb[64].mxu0 %v5373_v10 }
 0x2e1   : > { %v4111_v60 = vpack.c.bf16 %v2721_v33, %v2713_v22  ;;  %v2722_v61 = vsel %vm2466_vm13, %v2364_v11, %v2594_v16  ;;  %v2209_v19 = vpop.f32.mrb[37].mxu0  ;;  %v2370_v23 = vpop.f32.mrb[37].mxu1  ;;  %vm2471_vm15 = vcmp.gt.f32.partialorder %v2207_v6, 0.0  ;;  %v2599_v18 = vmul.f32 0.01, %v2207_v6  ;;  %2991 = vmatmul.mubr.f32.vlgmr.msra.gmra.mrb[64].mxu1 %v5373_v10  ;;  %2919 = vmatprep.mubr.f32.mxu0 %v6058_v55 }
 0x2e2   : > { %vm2472_vm8 = vcmp.gt.f32.partialorder %v2209_v19, 0.0  ;;  %v2600_v21 = vmul.f32 0.01, %v2209_v19  ;;  %vm2473_vm10 = vcmp.gt.f32.partialorder %v2368_v9, 0.0  ;;  %v4077_v27 = vpack.c.bf16 %v2720_v63, %v2712_v24  ;;  %2996 = vmatprep.mubr.f32.mxu1 %v6058_v55 }
 0x2e3   : > { %v2601_v57 = vmul.f32 0.01, %v2368_v9  ;;  %v2602_v8 = vmul.f32 0.01, %v2370_v23  ;;  %v4109_v51 = vpack.c.bf16 %v2722_v61, %v2714_v62  ;;  %v2727_v37 = vsel %vm2471_vm15, %v2207_v6, %v2599_v18 }
 0x2e4   : > { %v2213_v38 = vpop.f32.mrb[38].mxu0  ;;  %v2374_v44 = vpop.f32.mrb[38].mxu1  ;;  %4078 = vmatprep.subr.bf16.mxu0 %v4077_v27  ;;  %2920 = vmatmul.mubr.f32.gmra.mrb[66].mxu0 %v5386_v17  ;;  %vm2474_vm13 = vcmp.gt.f32.partialorder %v2370_v23, 0.0  ;;  %v2728_v5 = vsel %vm2472_vm8, %v2209_v19, %v2600_v21 }
 0x2e5   : > { %vm2479_vm9 = vcmp.gt.f32.partialorder %v2213_v38, 0.0  ;;  %v2607_v49 = vmul.f32 0.01, %v2213_v38  ;;  %vm2481_vm7 = vcmp.gt.f32.partialorder %v2374_v44, 0.0  ;;  %v2215_v12 = vpop.f32.mrb[39].mxu0  ;;  %v2376_v7 = vpop.f32.mrb[39].mxu1  ;;  %4110 = vmatprep.subr.bf16.mxu1 %v4109_v51  ;;  %4080 = vmatpush1.bf16.msra.mxu0 %v4079_v28  ;;  %v2729_v56 = vsel %vm2473_vm10, %v2368_v9, %v2601_v57 }
 0x2e6   : > { %v2609_v29 = vmul.f32 0.01, %v2374_v44  ;;  %vm2480_vm11 = vcmp.gt.f32.partialorder %v2215_v12, 0.0  ;;  %v2608_v32 = vmul.f32 0.01, %v2215_v12  ;;  %vm2482_vm14 = vcmp.gt.f32.partialorder %v2376_v7, 0.0  ;;  %4112 = vmatpush1.bf16.msra.mxu1 %v4111_v60  ;;  %3067 = vmatprep.mubr.f32.mxu0 %v6058_v55 }
 0x2e7   : > { %v2735_v39 = vsel %vm2479_vm9, %v2213_v38, %v2607_v49  ;;  %v2610_v25 = vmul.f32 0.01, %v2376_v7  ;;  %2997 = vmatmul.mubr.f32.gmra.mrb[66].mxu1 %v5386_v17  ;;  %v2730_v58 = vsel %vm2474_vm13, %v2370_v23, %v2602_v8 }
 0x2e8   : > { %v4083_v53 = vpack.c.bf16 %v2735_v39, %v2727_v37  ;;  %v2737_v40 = vsel %vm2481_vm7, %v2374_v44, %v2609_v29  ;;  %v2736_v1 = vsel %vm2480_vm11, %v2215_v12, %v2608_v32  ;;  %v2219_v42 = vpop.f32.mrb[40].mxu0  ;;  %v2380_v54 = vpop.f32.mrb[40].mxu1  ;;  %3144 = vmatprep.mubr.f32.mxu1 %v6058_v55 }
 0x2e9   : > { %v4115_v0 = vpack.c.bf16 %v2737_v40, %v2729_v56  ;;  %v2738_v43 = vsel %vm2482_vm14, %v2376_v7, %v2610_v25  ;;  %v2221_v2 = vpop.f32.mrb[41].mxu0  ;;  %v2382_v4 = vpop.f32.mrb[41].mxu1  ;;  %vm2487_vm12 = vcmp.gt.f32.partialorder %v2219_v42, 0.0  ;;  %v2615_v59 = vmul.f32 0.01, %v2219_v42 }
 0x2ea   : > { %vm2488_vm15 = vcmp.gt.f32.partialorder %v2221_v2, 0.0  ;;  %v2616_v11 = vmul.f32 0.01, %v2221_v2  ;;  %vm2489_vm10 = vcmp.gt.f32.partialorder %v2380_v54, 0.0  ;;  %v4081_v14 = vpack.c.bf16 %v2736_v1, %v2728_v5 }
 0x2eb   : > { %v2617_v34 = vmul.f32 0.01, %v2380_v54  ;;  %v2618_v36 = vmul.f32 0.01, %v2382_v4  ;;  %v4113_v15 = vpack.c.bf16 %v2738_v43, %v2730_v58  ;;  %v2743_v60 = vsel %vm2487_vm12, %v2219_v42, %v2615_v59 }
 0x2ec   : > { %v2225_v16 = vpop.f32.mrb[42].mxu0  ;;  %v2386_v22 = vpop.f32.mrb[42].mxu1  ;;  %4082 = vmatprep.subr.bf16.mxu0 %v4081_v14  ;;  %vm2490_vm14 = vcmp.gt.f32.partialorder %v2382_v4, 0.0  ;;  %v2744_v44 = vsel %vm2488_vm15, %v2221_v2, %v2616_v11 }
 0x2ed   : > { %vm2495_vm9 = vcmp.gt.f32.partialorder %v2225_v16, 0.0  ;;  %v2623_v28 = vmul.f32 0.01, %v2225_v16  ;;  %vm2497_vm7 = vcmp.gt.f32.partialorder %v2386_v22, 0.0  ;;  %v2227_v33 = vpop.f32.mrb[43].mxu0  ;;  %v2388_v63 = vpop.f32.mrb[43].mxu1  ;;  %4114 = vmatprep.subr.bf16.mxu1 %v4113_v15  ;;  %4084 = vmatpush1.bf16.msra.mxu0 %v4083_v53  ;;  %v2745_v23 = vsel %vm2489_vm10, %v2380_v54, %v2617_v34 }
 0x2ee   : > { %v2625_v6 = vmul.f32 0.01, %v2386_v22  ;;  %vm2496_vm8 = vcmp.gt.f32.partialorder %v2227_v33, 0.0  ;;  %v2624_v9 = vmul.f32 0.01, %v2227_v33  ;;  %vm2498_vm11 = vcmp.gt.f32.partialorder %v2388_v63, 0.0  ;;  %4116 = vmatpush1.bf16.msra.mxu1 %v4115_v0 }
 0x2ef   : > { %v2751_v61 = vsel %vm2495_vm9, %v2225_v16, %v2623_v28  ;;  %v2626_v19 = vmul.f32 0.01, %v2388_v63  ;;  %v2746_v49 = vsel %vm2490_vm14, %v2382_v4, %v2618_v36 }
 0x2f0   : > { %v4087_v24 = vpack.c.bf16 %v2751_v61, %v2743_v60  ;;  %v2753_v62 = vsel %vm2497_vm7, %v2386_v22, %v2625_v6  ;;  %v2752_v18 = vsel %vm2496_vm8, %v2227_v33, %v2624_v9  ;;  %v2231_v21 = vpop.f32.mrb[44].mxu0  ;;  %v2392_v27 = vpop.f32.mrb[44].mxu1 }
 0x2f1   : > { %v4119_v57 = vpack.c.bf16 %v2753_v62, %v2745_v23  ;;  %v2754_v8 = vsel %vm2498_vm11, %v2388_v63, %v2626_v19  ;;  %v2233_v51 = vpop.f32.mrb[45].mxu0  ;;  %v2394_v38 = vpop.f32.mrb[45].mxu1  ;;  %vm2503_vm13 = vcmp.gt.f32.partialorder %v2231_v21, 0.0  ;;  %v2631_v12 = vmul.f32 0.01, %v2231_v21 }
 0x2f2   : > { %vm2504_vm12 = vcmp.gt.f32.partialorder %v2233_v51, 0.0  ;;  %v2632_v7 = vmul.f32 0.01, %v2233_v51  ;;  %vm2505_vm9 = vcmp.gt.f32.partialorder %v2392_v27, 0.0  ;;  %v4085_v29 = vpack.c.bf16 %v2752_v18, %v2744_v44 }
 0x2f3   : > { %v2633_v32 = vmul.f32 0.01, %v2392_v27  ;;  %v2634_v37 = vmul.f32 0.01, %v2394_v38  ;;  %v4117_v39 = vpack.c.bf16 %v2754_v8, %v2746_v49  ;;  %v2759_v0 = vsel %vm2503_vm13, %v2231_v21, %v2631_v12 }
 0x2f4   : > { %v2237_v25 = vpop.f32.mrb[46].mxu0  ;;  %v2398_v56 = vpop.f32.mrb[46].mxu1  ;;  %4086 = vmatprep.subr.bf16.mxu0 %v4085_v29  ;;  %vm2506_vm11 = vcmp.gt.f32.partialorder %v2394_v38, 0.0  ;;  %v2760_v22 = vsel %vm2504_vm12, %v2233_v51, %v2632_v7 }
 0x2f5   : > { %vm2511_vm10 = vcmp.gt.f32.partialorder %v2237_v25, 0.0  ;;  %v2639_v53 = vmul.f32 0.01, %v2237_v25  ;;  %vm2513_vm7 = vcmp.gt.f32.partialorder %v2398_v56, 0.0  ;;  %v2239_v40 = vpop.f32.mrb[47].mxu0  ;;  %v2400_v1 = vpop.f32.mrb[47].mxu1  ;;  %4118 = vmatprep.subr.bf16.mxu1 %v4117_v39  ;;  %4088 = vmatpush1.bf16.msra.mxu0 %v4087_v24  ;;  %v2761_v4 = vsel %vm2505_vm9, %v2392_v27, %v2633_v32 }
 0x2f6   : > { %v2641_v42 = vmul.f32 0.01, %v2398_v56  ;;  %vm2512_vm15 = vcmp.gt.f32.partialorder %v2239_v40, 0.0  ;;  %v2640_v54 = vmul.f32 0.01, %v2239_v40  ;;  %vm2514_vm8 = vcmp.gt.f32.partialorder %v2400_v1, 0.0  ;;  %4120 = vmatpush1.bf16.msra.mxu1 %v4119_v57 }
 0x2f7   : > { %v2767_v43 = vsel %vm2511_vm10, %v2237_v25, %v2639_v53  ;;  %v2642_v2 = vmul.f32 0.01, %v2400_v1  ;;  %v2762_v28 = vsel %vm2506_vm11, %v2394_v38, %v2634_v37 }
 0x2f8   : > { %v4091_v5 = vpack.c.bf16 %v2767_v43, %v2759_v0  ;;  %v2769_v58 = vsel %vm2513_vm7, %v2398_v56, %v2641_v42  ;;  %v2768_v59 = vsel %vm2512_vm15, %v2239_v40, %v2640_v54  ;;  %v2243_v11 = vpop.f32.mrb[48].mxu0  ;;  %v2404_v14 = vpop.f32.mrb[48].mxu1 }
 0x2f9   : > { %v4123_v34 = vpack.c.bf16 %v2769_v58, %v2761_v4  ;;  %v2770_v36 = vsel %vm2514_vm8, %v2400_v1, %v2642_v2  ;;  %v2245_v15 = vpop.f32.mrb[49].mxu0  ;;  %v2406_v16 = vpop.f32.mrb[49].mxu1  ;;  %vm2519_vm14 = vcmp.gt.f32.partialorder %v2243_v11, 0.0  ;;  %v2647_v33 = vmul.f32 0.01, %v2243_v11 }
 0x2fa   : > { %vm2520_vm13 = vcmp.gt.f32.partialorder %v2245_v15, 0.0  ;;  %v2648_v63 = vmul.f32 0.01, %v2245_v15  ;;  %vm2521_vm10 = vcmp.gt.f32.partialorder %v2404_v14, 0.0  ;;  %v4089_v6 = vpack.c.bf16 %v2768_v59, %v2760_v22 }
 0x2fb   : > { %v2649_v9 = vmul.f32 0.01, %v2404_v14  ;;  %v2650_v60 = vmul.f32 0.01, %v2406_v16  ;;  %v4121_v61 = vpack.c.bf16 %v2770_v36, %v2762_v28  ;;  %v2775_v57 = vsel %vm2519_vm14, %v2243_v11, %v2647_v33 }
 0x2fc   : > { %v2249_v19 = vpop.f32.mrb[50].mxu0  ;;  %v2410_v23 = vpop.f32.mrb[50].mxu1  ;;  %4090 = vmatprep.subr.bf16.mxu0 %v4089_v6  ;;  %vm2522_vm8 = vcmp.gt.f32.partialorder %v2406_v16, 0.0  ;;  %v2776_v56 = vsel %vm2520_vm13, %v2245_v15, %v2648_v63 }
 0x2fd   : > { %vm2527_vm9 = vcmp.gt.f32.partialorder %v2249_v19, 0.0  ;;  %v2655_v24 = vmul.f32 0.01, %v2249_v19  ;;  %vm2529_vm7 = vcmp.gt.f32.partialorder %v2410_v23, 0.0  ;;  %v2251_v62 = vpop.f32.mrb[51].mxu0  ;;  %v2412_v18 = vpop.f32.mrb[51].mxu1  ;;  %4122 = vmatprep.subr.bf16.mxu1 %v4121_v61  ;;  %4092 = vmatpush1.bf16.msra.mxu0 %v4091_v5  ;;  %v2777_v38 = vsel %vm2521_vm10, %v2404_v14, %v2649_v9 }
 0x2fe   : > { %v2657_v21 = vmul.f32 0.01, %v2410_v23  ;;  %vm2528_vm12 = vcmp.gt.f32.partialorder %v2251_v62, 0.0  ;;  %v2656_v27 = vmul.f32 0.01, %v2251_v62  ;;  %vm2530_vm15 = vcmp.gt.f32.partialorder %v2412_v18, 0.0  ;;  %4124 = vmatpush1.bf16.msra.mxu1 %v4123_v34 }
 0x2ff   : > { %v2783_v8 = vsel %vm2527_vm9, %v2249_v19, %v2655_v24  ;;  %v2658_v51 = vmul.f32 0.01, %v2412_v18  ;;  %v2778_v53 = vsel %vm2522_vm8, %v2406_v16, %v2650_v60 }
 0x300   : > { %v4095_v44 = vpack.c.bf16 %v2783_v8, %v2775_v57  ;;  %v2785_v49 = vsel %vm2529_vm7, %v2410_v23, %v2657_v21  ;;  %v2784_v12 = vsel %vm2528_vm12, %v2251_v62, %v2656_v27  ;;  %v2255_v7 = vpop.f32.mrb[52].mxu0  ;;  %v2416_v29 = vpop.f32.mrb[52].mxu1 }
 0x301   : > { %v4127_v32 = vpack.c.bf16 %v2785_v49, %v2777_v38  ;;  %v2786_v37 = vsel %vm2530_vm15, %v2412_v18, %v2658_v51  ;;  %v2257_v39 = vpop.f32.mrb[53].mxu0  ;;  %v2418_v25 = vpop.f32.mrb[53].mxu1  ;;  %vm2535_vm11 = vcmp.gt.f32.partialorder %v2255_v7, 0.0  ;;  %v2663_v40 = vmul.f32 0.01, %v2255_v7 }
 0x302   : > { %vm2536_vm14 = vcmp.gt.f32.partialorder %v2257_v39, 0.0  ;;  %v2664_v1 = vmul.f32 0.01, %v2257_v39  ;;  %vm2537_vm9 = vcmp.gt.f32.partialorder %v2416_v29, 0.0  ;;  %v4093_v42 = vpack.c.bf16 %v2784_v12, %v2776_v56 }
 0x303   : > { %v2665_v54 = vmul.f32 0.01, %v2416_v29  ;;  %v2666_v0 = vmul.f32 0.01, %v2418_v25  ;;  %v4125_v43 = vpack.c.bf16 %v2786_v37, %v2778_v53  ;;  %v2791_v34 = vsel %vm2535_vm11, %v2255_v7, %v2663_v40 }
 0x304   : > { %v2261_v2 = vpop.f32.mrb[54].mxu0  ;;  %v2422_v4 = vpop.f32.mrb[54].mxu1  ;;  %4094 = vmatprep.subr.bf16.mxu0 %v4093_v42  ;;  %vm2538_vm15 = vcmp.gt.f32.partialorder %v2418_v25, 0.0  ;;  %v2792_v23 = vsel %vm2536_vm14, %v2257_v39, %v2664_v1 }
 0x305   : > { %vm2543_vm10 = vcmp.gt.f32.partialorder %v2261_v2, 0.0  ;;  %v2671_v5 = vmul.f32 0.01, %v2261_v2  ;;  %vm2545_vm7 = vcmp.gt.f32.partialorder %v2422_v4, 0.0  ;;  %v2263_v58 = vpop.f32.mrb[55].mxu0  ;;  %v2424_v59 = vpop.f32.mrb[55].mxu1  ;;  %4126 = vmatprep.subr.bf16.mxu1 %v4125_v43  ;;  %4096 = vmatpush1.bf16.msra.mxu0 %v4095_v44  ;;  %v2793_v16 = vsel %vm2537_vm9, %v2416_v29, %v2665_v54 }
 0x306   : > { %v2673_v11 = vmul.f32 0.01, %v2422_v4  ;;  %vm2544_vm13 = vcmp.gt.f32.partialorder %v2263_v58, 0.0  ;;  %v2672_v14 = vmul.f32 0.01, %v2263_v58  ;;  %vm2546_vm12 = vcmp.gt.f32.partialorder %v2424_v59, 0.0  ;;  %4128 = vmatpush1.bf16.msra.mxu1 %v4127_v32 }
 0x307   : > { %v2799_v36 = vsel %vm2543_vm10, %v2261_v2, %v2671_v5  ;;  %v2674_v15 = vmul.f32 0.01, %v2424_v59  ;;  %v2794_v24 = vsel %vm2538_vm15, %v2418_v25, %v2666_v0 }
 0x308   : > { %v4099_v22 = vpack.c.bf16 %v2799_v36, %v2791_v34  ;;  %v2801_v28 = vsel %vm2545_vm7, %v2422_v4, %v2673_v11  ;;  %v2800_v33 = vsel %vm2544_vm13, %v2263_v58, %v2672_v14  ;;  %v2267_v63 = vpop.f32.mrb[56].mxu0  ;;  %v2428_v6 = vpop.f32.mrb[56].mxu1 }
 0x309   : > { %v4131_v9 = vpack.c.bf16 %v2801_v28, %v2793_v16  ;;  %v2802_v60 = vsel %vm2546_vm12, %v2424_v59, %v2674_v15  ;;  %v2269_v61 = vpop.f32.mrb[57].mxu0  ;;  %v2430_v19 = vpop.f32.mrb[57].mxu1  ;;  %vm2551_vm8 = vcmp.gt.f32.partialorder %v2267_v63, 0.0  ;;  %v2679_v62 = vmul.f32 0.01, %v2267_v63 }
 0x30a   : > { %vm2552_vm11 = vcmp.gt.f32.partialorder %v2269_v61, 0.0  ;;  %v2680_v18 = vmul.f32 0.01, %v2269_v61  ;;  %vm2553_vm10 = vcmp.gt.f32.partialorder %v2428_v6, 0.0  ;;  %v4097_v21 = vpack.c.bf16 %v2800_v33, %v2792_v23 }
 0x30b   : > { %v2681_v27 = vmul.f32 0.01, %v2428_v6  ;;  %v2682_v57 = vmul.f32 0.01, %v2430_v19  ;;  %v4129_v8 = vpack.c.bf16 %v2802_v60, %v2794_v24  ;;  %v2807_v32 = vsel %vm2551_vm8, %v2267_v63, %v2679_v62 }
 0x30c   : > { %v2273_v51 = vpop.f32.mrb[58].mxu0  ;;  %v2434_v38 = vpop.f32.mrb[58].mxu1  ;;  %4098 = vmatprep.subr.bf16.mxu0 %v4097_v21  ;;  %vm2554_vm12 = vcmp.gt.f32.partialorder %v2430_v19, 0.0  ;;  %v2808_v4 = vsel %vm2552_vm11, %v2269_v61, %v2680_v18 }
 0x30d   : > { %vm2559_vm9 = vcmp.gt.f32.partialorder %v2273_v51, 0.0  ;;  %v2687_v44 = vmul.f32 0.01, %v2273_v51  ;;  %vm2561_vm7 = vcmp.gt.f32.partialorder %v2434_v38, 0.0  ;;  %v2275_v49 = vpop.f32.mrb[59].mxu0  ;;  %v2436_v12 = vpop.f32.mrb[59].mxu1  ;;  %4130 = vmatprep.subr.bf16.mxu1 %v4129_v8  ;;  %4100 = vmatpush1.bf16.msra.mxu0 %v4099_v22  ;;  %v2809_v25 = vsel %vm2553_vm10, %v2428_v6, %v2681_v27 }
 0x30e   : > { %v2689_v7 = vmul.f32 0.01, %v2434_v38  ;;  %vm2560_vm14 = vcmp.gt.f32.partialorder %v2275_v49, 0.0  ;;  %v2688_v29 = vmul.f32 0.01, %v2275_v49  ;;  %vm2562_vm13 = vcmp.gt.f32.partialorder %v2436_v12, 0.0  ;;  %4132 = vmatpush1.bf16.msra.mxu1 %v4131_v9 }
 0x30f   : > { %v2815_v37 = vsel %vm2559_vm9, %v2273_v51, %v2687_v44  ;;  %v2690_v39 = vmul.f32 0.01, %v2436_v12  ;;  %v2810_v5 = vsel %vm2554_vm12, %v2430_v19, %v2682_v57  ;;  %v5436_v44 = vld [vmem:[%s286_s26] sm:$0xff] }
 0x310   : > { %v4103_v56 = vpack.c.bf16 %v2815_v37, %v2807_v32  ;;  %v2817_v53 = vsel %vm2561_vm7, %v2434_v38, %v2689_v7  ;;  %v2816_v40 = vsel %vm2560_vm14, %v2275_v49, %v2688_v29  ;;  %v2279_v1 = vpop.f32.mrb[60].mxu0  ;;  %v2440_v42 = vpop.f32.mrb[60].mxu1  ;;  %v5442_v49 = vrot.slane %v5436_v44, %v4719_v47 }
 0x311   : > { %v4135_v54 = vpack.c.bf16 %v2817_v53, %v2809_v25  ;;  %v2818_v0 = vsel %vm2562_vm13, %v2436_v12, %v2690_v39  ;;  %v2281_v43 = vpop.f32.mrb[61].mxu0  ;;  %v2442_v2 = vpop.f32.mrb[61].mxu1  ;;  %vm2567_vm15 = vcmp.gt.f32.partialorder %v2279_v1, 0.0  ;;  %v2695_v58 = vmul.f32 0.01, %v2279_v1 }
 0x312   : > { %vm2568_vm8 = vcmp.gt.f32.partialorder %v2281_v43, 0.0  ;;  %v2696_v59 = vmul.f32 0.01, %v2281_v43  ;;  %v2697_v11 = vmul.f32 0.01, %v2440_v42  ;;  %v4101_v14 = vpack.c.bf16 %v2816_v40, %v2808_v4  ;;  %v5434_v38 = vpop.permute.xlu1 %339  ;;  %6089 = vst [vmem:[#allocation9_spill] sm:$0xff] %v5442_v49 }
 0x313   : > { %vm2569_vm10 = vcmp.gt.f32.partialorder %v2440_v42, 0.0  ;;  %vm2570_vm9 = vcmp.gt.f32.partialorder %v2442_v2, 0.0  ;;  %v2698_v34 = vmul.f32 0.01, %v2442_v2  ;;  %v4133_v36 = vpack.c.bf16 %v2818_v0, %v2810_v5  ;;  %v5466_v4 = vld [vmem:[#allocation2] sm:$0xff] }
 0x314   : > { %v2285_v15 = vpop.f32.mrb[62].mxu0  ;;  %v2446_v16 = vpop.f32.mrb[62].mxu1  ;;  %4102 = vmatprep.subr.bf16.mxu0 %v4101_v14  ;;  %v2823_v9 = vsel %vm2567_vm15, %v2279_v1, %v2695_v58  ;;  %v2824_v60 = vsel %vm2568_vm8, %v2281_v43, %v2696_v59  ;;  %v2825_v23 = vsel %vm2569_vm10, %v2440_v42, %v2697_v11  ;;  %v5450_v7 = vrot.slane %v5436_v44, %v4728_v52  ;;  %v5473_v59 = vld [vmem:[#allocation2 + $0x8] sm:$0xff]  ;;  %v5478_v14 = vld [vmem:[#allocation2 + $0x10] sm:$0xff] }
 0x315   : > { %vm2575_vm7 = vcmp.gt.f32.partialorder %v2285_v15, 0.0  ;;  %v2703_v22 = vmul.f32 0.01, %v2285_v15  ;;  %vm2577_vm14 = vcmp.gt.f32.partialorder %v2446_v16, 0.0  ;;  %v2287_v28 = vpop.f32.mrb[63].mxu0  ;;  %v2448_v33 = vpop.f32.mrb[63].mxu1  ;;  %4134 = vmatprep.subr.bf16.mxu1 %v4133_v36  ;;  %4104 = vmatpush1.bf16.msra.mxu0 %v4103_v56  ;;  %v2826_v21 = vsel %vm2570_vm9, %v2442_v2, %v2698_v34 }
 0x316   : > { %v2705_v63 = vmul.f32 0.01, %v2446_v16  ;;  %vm2576_vm11 = vcmp.gt.f32.partialorder %v2287_v28, 0.0  ;;  %v2704_v6 = vmul.f32 0.01, %v2287_v28  ;;  %vm2578_vm13 = vcmp.gt.f32.partialorder %v2448_v33, 0.0  ;;  %4136 = vmatpush1.bf16.msra.mxu1 %v4135_v54 }
 0x317   : > { %v2831_v61 = vsel %vm2575_vm7, %v2285_v15, %v2703_v22  ;;  %v2706_v19 = vmul.f32 0.01, %v2448_v33  ;;  %6091 = vst [vmem:[#allocation11_spill] sm:$0xff] %v5450_v7  ;;  %v5454_v39 = vrot.slane %v5436_v44, %v4725_v50 }
 0x318   : > { %v4107_v24 = vpack.c.bf16 %v2831_v61, %v2823_v9  ;;  %v2833_v62 = vsel %vm2577_vm14, %v2446_v16, %v2705_v63  ;;  %v2832_v18 = vsel %vm2576_vm11, %v2287_v28, %v2704_v6  ;;  %v5483_v16 = vld [vmem:[#allocation2 + $0x18] sm:$0xff] }
 0x319   : > { %v4139_v27 = vpack.c.bf16 %v2833_v62, %v2825_v23  ;;  %v2834_v57 = vsel %vm2578_vm13, %v2448_v33, %v2706_v19  ;;  %v4105_v8 = vpack.c.bf16 %v2832_v18, %v2824_v60  ;;  %v342_v29 = vpop.permute.xlu1 %341  ;;  %6092 = vst [vmem:[#allocation12_spill] sm:$0xff] %v5454_v39 }
 0x31a   : > { %v4137_v51 = vpack.c.bf16 %v2834_v57, %v2826_v21 }
 0x31b   : > { %4106 = vmatprep.subr.bf16.mxu0 %v4105_v8 }
 0x31c   : > { %4138 = vmatprep.subr.bf16.mxu1 %v4137_v51  ;;  %4108 = vmatpush1.bf16.msra.mxu0 %v4107_v24  ;;  %v364_v51 = vsel %vm357_vm0, %v5434_v38, %v342_v29 }
 0x31d   : > { %4140 = vmatpush1.bf16.msra.mxu1 %v4139_v27  ;;  %v346_v15 = vpop.permute.xlu1 %345 }
 0x31f   : > { %3068 = vmatmul.mubr.f32.vlgmr.msra.gmra.mrb[68].mxu0 %v5373_v10 }
 0x320   : > { %3145 = vmatmul.mubr.f32.vlgmr.msra.gmra.mrb[68].mxu1 %v5373_v10  ;;  %3073 = vmatprep.mubr.f32.mxu0 %v6058_v55  ;;  %v5438_v10 = vpop.permute.xlu0 %2841 }
 0x321   : > { %3150 = vmatprep.mubr.f32.mxu1 %v6058_v55 }
 0x323   : > { %3074 = vmatmul.mubr.f32.gmra.mrb[70].mxu0 %v5386_v17  ;;  %v350_v19 = vpop.permute.xlu1 %349 }
 0x324   : > { %3151 = vmatmul.mubr.f32.gmra.mrb[70].mxu1 %v5386_v17  ;;  %v5446_v17 = vrot.slane %v5436_v44, %v4716_v46  ;;  %v344_v36 = vpop.permute.xlu0 %343 }
 0x326   : > { %6090 = vst [vmem:[#allocation10_spill] sm:$0xff] %v5446_v17 }
 0x328   : > { %v348_v61 = vpop.permute.xlu0 %347  ;;  %v354_v24 = vpop.permute.xlu1 %353 }
 0x32c   : > { %v352_v23 = vpop.permute.xlu0 %351  ;;  %v428_v18 = vpop.permute.xlu1 %427 }
 0x330   : > { %v426_v62 = vpop.permute.xlu0 %425  ;;  %v432_v27 = vpop.permute.xlu1 %431 }
 0x334   : > { %v430_v21 = vpop.permute.xlu0 %429  ;;  %v436_v8 = vpop.permute.xlu1 %435 }
 0x338   : > { %v434_v57 = vpop.permute.xlu0 %433 }
 0x3b3   : > { %v2915_v12 = vpop.f32.mrb[64].mxu0 }
 0x3b4   : > { %v2917_v32 = vpop.f32.mrb[65].mxu0  ;;  %v2992_v37 = vpop.f32.mrb[64].mxu1  ;;  %v2916_v25 = vadd.f32 %v2915_v12, %v5438_v10  ;;  %v363_v12 = vsel %vm357_vm0, %v342_v29, %v344_v36  ;;  %v365_v29 = vsel %vm357_vm0, %v354_v24, %v5434_v38 }
 0x3b5   : > { %v2918_v56 = vadd.f32 %v2917_v32, %v5438_v10  ;;  %v2993_v53 = vadd.f32 %v2992_v37, %v5438_v10  ;;  %v2994_v40 = vpop.f32.mrb[65].mxu1  ;;  %v362_v32 = vsel %vm357_vm0, %v344_v36, %v346_v15  ;;  %v361_v37 = vsel %vm357_vm0, %v346_v15, %v348_v61 }
 0x3b6   : > { %v2995_v1 = vadd.f32 %v2994_v40, %v5438_v10  ;;  %v3198_v42 = vmul.f32 %v5442_v49, %v2916_v25  ;;  %v438_v25 = vpop.permute.xlu0 %437  ;;  %v359_v40 = vsel %vm357_vm0, %v350_v19, %v352_v23  ;;  %v444_v36 = vsel %vm441_vm1, %v434_v57, %v436_v8 }
 0x3b7   : > { %v3199_v54 = vmul.f32 %v5446_v17, %v2918_v56  ;;  %v3200_v0 = vmul.f32 %v5450_v7, %v2993_v53  ;;  %v5463_v43 = vpop.f32.mrb[66].mxu0  ;;  %v440_v56 = vpop.permute.xlu1 %439  ;;  %v360_v53 = vsel %vm357_vm0, %v348_v61, %v350_v19  ;;  %v443_v15 = vsel %vm441_vm1, %v436_v8, %v438_v25 }
 0x3b8   : > { %v3201_v2 = vmul.f32 %v5454_v39, %v2995_v1  ;;  %v5469_v5 = vadd.f32 %v5466_v4, %v3198_v42  ;;  %v5471_v58 = vpop.f32.mrb[67].mxu0  ;;  %v358_v1 = vsel %vm357_vm0, %v352_v23, %v354_v24  ;;  %v448_v42 = vsel %vm441_vm1, %v426_v62, %v428_v18 }
 0x3b9   : > { %v5476_v11 = vadd.f32 %v5473_v59, %v3199_v54  ;;  %v5481_v34 = vadd.f32 %v5478_v14, %v3200_v0  ;;  %v447_v54 = vsel %vm441_vm1, %v428_v18, %v430_v21  ;;  %v446_v0 = vsel %vm441_vm1, %v430_v21, %v432_v27 }
 0x3ba   : > { %6093 = vst [vmem:[#allocation13_spill] sm:$0xff] %v5469_v5  ;;  %v5486_v22 = vadd.f32 %v5483_v16, %v3201_v2  ;;  %v3238_v28 = vrot.slane %v5469_v5, 3  ;;  %v5489_v33 = vpop.f32.mrb[66].mxu1  ;;  %v445_v2 = vsel %vm441_vm1, %v432_v27, %v434_v57  ;;  %v442_v38 = vsel %vm441_vm1, %v438_v25, %v440_v56 }
 0x3bb   : > { %6094 = vst [vmem:[#allocation14_spill] sm:$0xff] %v5476_v11  ;;  %6095 = vst [vmem:[#allocation15_spill] sm:$0xff] %v5481_v34  ;;  %v3239_v63 = vrot.slane %v5476_v11, 3  ;;  %v5492_v6 = vpop.f32.mrb[67].mxu1  ;;  %v3240_v9 = vrot.slane %v5481_v34, 3  ;;  %v377_v61 = vcombine.low %v359_v40, %v358_v1  ;;  %v458_v19 = vcombine.low %v448_v42, %v447_v54 }
 0x3bc   : > { %6096 = vst [vmem:[#allocation16_spill] sm:$0xff] %v5486_v22  ;;  %3254 = vrot.lane.b32.xlu0 %v3238_v28, %s4325_s8  ;;  %v3241_v60 = vrot.slane %v5486_v22, 3  ;;  %v459_v23 = vcombine.low %v446_v0, %v445_v2  ;;  %v460_v24 = vcombine.low %v444_v36, %v443_v15  ;;  %v5552_v54 = vrot.slane %v5436_v44, %v4786_v31 }
 0x3bd   : > { %3256 = vrot.lane.b32.xlu1 %v3239_v63, %s4325_s8  ;;  %v405_v8 = vrot.slane %v377_v61, %v4587_v41  ;;  %v468_v25 = vrot.slane %v458_v19, %v4587_v41  ;;  %v5556_v2 = vrot.slane %v5436_v44, %v4798_v48  ;;  %v5560_v36 = vrot.slane %v5436_v44, %v4783_v30 }
 0x3be   : > { %6097 = vst [vmem:[#allocation17_spill] sm:$0xff] %v5552_v54 }
 0x3bf   : > { %6098 = vst [vmem:[#allocation18_spill] sm:$0xff] %v5556_v2  ;;  %6099 = vst [vmem:[#allocation19_spill] sm:$0xff] %v5560_v36 }
 0x3c0   : > { %3258 = vrot.lane.b32.xlu0 %v3240_v9, %s4325_s8 }
 0x3c1   : > { %3260 = vrot.lane.b32.xlu1 %v3241_v60, %s4325_s8 }
 0x3c4   : > { %3337 = vrot.lane.b32.xlu0 %v3238_v28, %s4328_s18  ;;  %v449_v28 = vsel %vm441_vm1, %v440_v56, %v426_v62  ;;  %v475_v62 = vrot.slane %v459_v23, %v4587_v41 }
 0x3c5   : > { %3339 = vrot.lane.b32.xlu1 %v3239_v63, %s4328_s18  ;;  %v375_v63 = vcombine.low %v363_v12, %v362_v32  ;;  %v461_v18 = vcombine.low %v442_v38, %v449_v28  ;;  %v482_v12 = vrot.slane %v460_v24, %v4587_v41 }
 0x3c6   : > { %v490_v56 = vcombine.low %v468_v25, %v475_v62  ;;  %v4213_v62 = vld [vmem:[#allocation2 + $0x28] sm:$0xff] }
 0x3c7   : > { %v391_v21 = vrot.slane %v375_v63, %v4587_v41  ;;  %v5565_v63 = vrot.slane %v5436_v44, %v4795_v45 }
 0x3c8   : > { %3341 = vrot.lane.b32.xlu0 %v3240_v9, %s4328_s18  ;;  %v376_v9 = vcombine.low %v361_v37, %v360_v53 }
 0x3c9   : > { %3343 = vrot.lane.b32.xlu1 %v3241_v60, %s4328_s18  ;;  %v374_v60 = vcombine.low %v365_v29, %v364_v51  ;;  %v489_v51 = vrot.slane %v461_v18, %v4587_v41  ;;  %v498_v29 = vrot.slane %v490_v56, %v4587_v41  ;;  %6100 = vst [vmem:[#allocation20_spill] sm:$0xff] %v5565_v63  ;;  %v4215_v56 = vld [vmem:[#allocation2 + $0x38] sm:$0xff] }
 0x3ca   : > { %v398_v27 = vrot.slane %v376_v9, %v4587_v41 }
 0x3cb   : > { %v384_v57 = vrot.slane %v374_v60, %v4587_v41  ;;  %v491_v53 = vcombine.low %v482_v12, %v489_v51 }
 0x3cc   : > { %v407_v37 = vcombine.low %v398_v27, %v405_v8 }
 0x3cd   : > { %v406_v32 = vcombine.low %v384_v57, %v391_v21  ;;  %v505_v42 = vrot.slane %v491_v53, %v4587_v41  ;;  %v4212_v57 = vld [vmem:[#allocation2 + $0x20] sm:$0xff] }
 0x3ce   : > { %v421_v1 = vrot.slane %v407_v37, %v4587_v41 }
 0x3cf   : > { %v414_v40 = vrot.slane %v406_v32, %v4587_v41  ;;  %v506_v23 = vcombine.low %v498_v29, %v505_v42  ;;  %v4214_v32 = vld [vmem:[#allocation2 + $0x30] sm:$0xff] }
 0x3d1   : > { %v422_v9 = vcombine.low %v414_v40, %v421_v1  ;;  %v508_v51 = vsel %vm314_vm3, %v506_v23, -inf }
 0x3d3   : > { %v424_v25 = vsel %vm311_vm2, %v422_v9, -inf }
 0x3d4   : > { %v509_v1 = vmax.f32 %v424_v25, %v508_v51 }
 0x3d6   : > { %v530_v23 = vrot.slane %v509_v1, %v4786_v31  ;;  %v542_v25 = vrot.slane %v509_v1, %v4795_v45 }
 0x3f2   : > { %v3069_v0 = vpop.f32.mrb[68].mxu0 }
 0x3f3   : > { %v3070_v15 = vadd.f32 %v3069_v0, %v5438_v10  ;;  %v3146_v38 = vpop.f32.mrb[68].mxu1  ;;  %v3071_v28 = vpop.f32.mrb[69].mxu0  ;;  %v514_v0 = vrot.slane %v509_v1, %v4719_v47 }
 0x3f4   : > { %v3147_v60 = vadd.f32 %v3146_v38, %v5438_v10  ;;  %v3072_v61 = vadd.f32 %v3071_v28, %v5438_v10  ;;  %v3148_v19 = vpop.f32.mrb[69].mxu1  ;;  %v522_v28 = vrot.slane %v509_v1, %v4728_v52 }
 0x3f5   : > { %v3202_v24 = vmul.f32 %v5552_v54, %v3070_v15  ;;  %v3149_v18 = vadd.f32 %v3148_v19, %v5438_v10  ;;  %v518_v15 = vrot.slane %v509_v1, %v4716_v46  ;;  %v5598_v38 = vmax.f32 %v5466_v4, %v514_v0 }
 0x3f6   : > { %v3204_v21 = vmul.f32 %v5556_v2, %v3147_v60  ;;  %v3203_v27 = vmul.f32 %v5560_v36, %v3072_v61  ;;  %v526_v60 = vrot.slane %v509_v1, %v4725_v50  ;;  %v5609_v19 = vmax.f32 %v5478_v14, %v522_v28 }
 0x3f7   : > { %v5573_v8 = vadd.f32 %v4212_v57, %v3202_v24  ;;  %v3205_v44 = vmul.f32 %v5565_v63, %v3149_v18  ;;  %v5603_v9 = vmax.f32 %v5473_v59, %v518_v15  ;;  %v567_v61 = vrot.slane %v5598_v38, 3 }
 0x3f8   : > { %v5578_v12 = vadd.f32 %v4213_v62, %v3203_v27  ;;  %v5582_v10 = vadd.f32 %v4214_v32, %v3204_v21  ;;  %v5615_v24 = vmax.f32 %v5483_v16, %v526_v60  ;;  %v534_v59 = vrot.slane %v509_v1, %v4783_v30 }
 0x3f9   : > { %6101 = vst [vmem:[#allocation21_spill] sm:$0xff] %v5573_v8  ;;  %v3242_v37 = vrot.slane %v5573_v8, 3  ;;  %v5585_v53 = vadd.f32 %v4215_v56, %v3205_v44  ;;  %v568_v4 = vrot.slane %v5603_v9, 3  ;;  %v569_v18 = vrot.slane %v5609_v19, 3 }
 0x3fa   : > { %6102 = vst [vmem:[#allocation22_spill] sm:$0xff] %v5578_v12  ;;  %6103 = vst [vmem:[#allocation23_spill] sm:$0xff] %v5582_v10  ;;  %v3243_v40 = vrot.slane %v5578_v12, 3  ;;  %v3244_v29 = vrot.slane %v5582_v10, 3  ;;  %v5620_v21 = vmax.f32 %v4212_v57, %v530_v23  ;;  %v538_v14 = vrot.slane %v509_v1, %v4798_v48 }
 0x3fb   : > { %6104 = vst [vmem:[#allocation24_spill] sm:$0xff] %v5585_v53  ;;  %3262 = vrot.lane.b32.xlu0 %v3242_v37, %s4325_s8  ;;  %v3245_v42 = vrot.slane %v5585_v53, 3  ;;  %v570_v27 = vrot.slane %v5615_v24, 3  ;;  %v5625_v44 = vmax.f32 %v4213_v62, %v534_v59 }
 0x3fc   : > { %3264 = vrot.lane.b32.xlu1 %v3243_v40, %s4325_s8  ;;  %v571_v16 = vrot.slane %v5620_v21, 3  ;;  %v5630_v51 = vmax.f32 %v4214_v32, %v538_v14 }
 0x3fd   : > { %v572_v57 = vrot.slane %v5625_v44, 3 }
 0x3ff   : > { %3266 = vrot.lane.b32.xlu0 %v3244_v29, %s4325_s8 }
 0x400   : > { %3268 = vrot.lane.b32.xlu1 %v3245_v42, %s4325_s8 }
 0x403   : > { %3345 = vrot.lane.b32.xlu0 %v3242_v37, %s4328_s18  ;;  %v5634_v37 = vmax.f32 %v4215_v56, %v542_v25 }
 0x404   : > { %3347 = vrot.lane.b32.xlu1 %v3243_v40, %s4328_s18  ;;  %v573_v40 = vrot.slane %v5630_v51, 3 }
 0x405   : > { %v574_v62 = vrot.slane %v5634_v37, 3 }
 0x407   : > { %3349 = vrot.lane.b32.xlu0 %v3244_v29, %s4328_s18 }
 0x408   : > { %3351 = vrot.lane.b32.xlu1 %v3245_v42, %s4328_s18  ;;  %s5967_s18 = scalar_lea.vmem [#allocation6], %s3912_s7  ;;  %s3996_s7 = sshll.u32 %s4392_s25, 11 }
 0x409   : > { %s5996_s12 = scalar_lea.hbm %s6055_s6, %s3996_s7 }
 0x40b   : > { %583 = vrot.lane.b32.xlu0 %v567_v61, %s4327_s16 }
 0x40c   : > { %585 = vrot.lane.b32.xlu1 %v568_v4, %s4327_s16 }
 0x40f   : > { %587 = vrot.lane.b32.xlu0 %v569_v18, %s4327_s16 }
 0x410   : > { %589 = vrot.lane.b32.xlu1 %v570_v27, %s4327_s16 }
 0x413   : > { %591 = vrot.lane.b32.xlu0 %v571_v16, %s4327_s16 }
 0x414   : > { %593 = vrot.lane.b32.xlu1 %v572_v57, %s4327_s16 }
 0x417   : > { %595 = vrot.lane.b32.xlu0 %v573_v40, %s4327_s16 }
 0x418   : > { %597 = vrot.lane.b32.xlu1 %v574_v62, %s4327_s16 }
 0x41b   : > { %667 = vrot.lane.b32.xlu0 %v567_v61, %s4329_s19 }
 0x41c   : > { %669 = vrot.lane.b32.xlu1 %v568_v4, %s4329_s19 }
 0x41f   : > { %671 = vrot.lane.b32.xlu0 %v569_v18, %s4329_s19 }
 0x420   : > { %673 = vrot.lane.b32.xlu1 %v570_v27, %s4329_s19 }
 0x423   : > { %675 = vrot.lane.b32.xlu0 %v571_v16, %s4329_s19 }
 0x424   : > { %677 = vrot.lane.b32.xlu1 %v572_v57, %s4329_s19 }
 0x427   : > { %679 = vrot.lane.b32.xlu0 %v573_v40, %s4329_s19 }
 0x428   : > { %681 = vrot.lane.b32.xlu1 %v574_v62, %s4329_s19 }
 0x42e   : > { %v3255_v32 = vpop.permute.xlu0 %3254 }
 0x42f   : > { %v3257_v56 = vpop.permute.xlu1 %3256 }
 0x430   : > { %v3276_v16 = vsel %vm357_vm0, %v3255_v32, %v3257_v56 }
 0x432   : > { %v3259_v1 = vpop.permute.xlu0 %3258 }
 0x433   : > { %v3261_v29 = vpop.permute.xlu1 %3260  ;;  %v3275_v23 = vsel %vm357_vm0, %v3257_v56, %v3259_v1 }
 0x434   : > { %v3274_v4 = vsel %vm357_vm0, %v3259_v1, %v3261_v29 }
 0x435   : > { %v3287_v62 = vcombine.low %v3275_v23, %v3274_v4 }
 0x436   : > { %v3338_v42 = vpop.permute.xlu0 %3337 }
 0x437   : > { %v3340_v0 = vpop.permute.xlu1 %3339 }
 0x43a   : > { %v3342_v15 = vpop.permute.xlu0 %3341 }
 0x43b   : > { %v3344_v28 = vpop.permute.xlu1 %3343 }
 0x43c   : > { %v3357_v56 = vsel %vm441_vm1, %v3342_v15, %v3344_v28 }
 0x46d   : > { %v3263_v60 = vpop.permute.xlu0 %3262 }
 0x46e   : > { %v3265_v61 = vpop.permute.xlu1 %3264  ;;  %v3273_v59 = vsel %vm357_vm0, %v3261_v29, %v3263_v60 }
 0x46f   : > { %v3272_v18 = vsel %vm357_vm0, %v3263_v60, %v3265_v61  ;;  %v3358_v60 = vsel %vm441_vm1, %v3340_v0, %v3342_v15 }
 0x470   : > { %v3288_v1 = vcombine.low %v3273_v59, %v3272_v18  ;;  %v3303_v59 = vrot.slane %v3287_v62, %v4587_v41 }
 0x471   : > { %v3267_v14 = vpop.permute.xlu0 %3266 }
 0x472   : > { %v3271_v27 = vsel %vm357_vm0, %v3265_v61, %v3267_v14  ;;  %v3269_v25 = vpop.permute.xlu1 %3268  ;;  %v3359_v61 = vsel %vm441_vm1, %v3338_v42, %v3340_v0 }
 0x473   : > { %v3270_v57 = vsel %vm357_vm0, %v3267_v14, %v3269_v25  ;;  %v3277_v40 = vsel %vm357_vm0, %v3269_v25, %v3255_v32  ;;  %v3369_v18 = vcombine.low %v3359_v61, %v3358_v60  ;;  %vm6114_vm0 = vcmp.gt.f32.partialorder %v4828_v26, 0.5 }
 0x474   : > { %v3286_v29 = vcombine.low %v3277_v40, %v3276_v16  ;;  %v3289_v55 = vcombine.low %v3271_v27, %v3270_v57  ;;  %v3310_v27 = vrot.slane %v3288_v1, %v4587_v41 }
 0x475   : > { %v3346_v63 = vpop.permute.xlu0 %3345  ;;  %v3379_v1 = vrot.slane %v3369_v18, %v4587_v41 }
 0x476   : > { %v3296_v2 = vrot.slane %v3286_v29, %v4587_v41  ;;  %v3317_v14 = vrot.slane %v3289_v55, %v4587_v41  ;;  %v3356_v32 = vsel %vm441_vm1, %v3344_v28, %v3346_v63  ;;  %v3348_v23 = vpop.permute.xlu1 %3347 }
 0x477   : > { %v3370_v4 = vcombine.low %v3357_v56, %v3356_v32  ;;  %v3355_v0 = vsel %vm441_vm1, %v3346_v63, %v3348_v23 }
 0x478   : > { %v3318_v16 = vcombine.low %v3296_v2, %v3303_v59  ;;  %v3319_v15 = vcombine.low %v3310_v27, %v3317_v14 }
 0x479   : > { %v3350_v25 = vpop.permute.xlu0 %3349  ;;  %v3386_v57 = vrot.slane %v3370_v4, %v4587_v41 }
 0x47a   : > { %v3354_v55 = vsel %vm441_vm1, %v3348_v23, %v3350_v25  ;;  %v3352_v40 = vpop.permute.xlu1 %3351  ;;  %v3326_v2 = vrot.slane %v3318_v16, %v4587_v41  ;;  %v3333_v61 = vrot.slane %v3319_v15, %v4587_v41 }
 0x47b   : > { %v3371_v28 = vcombine.low %v3355_v0, %v3354_v55  ;;  %v3353_v29 = vsel %vm441_vm1, %v3350_v25, %v3352_v40  ;;  %v3360_v62 = vsel %vm441_vm1, %v3352_v40, %v3338_v42  ;;  %v3401_v56 = vcombine.low %v3379_v1, %v3386_v57  ;;  %vm6115_vm1 = vmmov %vm6114_vm0 }
 0x47c   : > { %v3372_v60 = vcombine.low %v3353_v29, %v3360_v62  ;;  %v3334_v23 = vcombine.low %v3326_v2, %v3333_v61 }
 0x47d   : > { %v3393_v63 = vrot.slane %v3371_v28, %v4587_v41  ;;  %v3409_v4 = vrot.slane %v3401_v56, %v4587_v41 }
 0x47e   : > { %v3400_v14 = vrot.slane %v3372_v60, %v4587_v41  ;;  %v3336_v42 = vsel %vm311_vm2, %v3334_v23, -inf }
 0x480   : > { %v3402_v32 = vcombine.low %v3393_v63, %v3400_v14 }
 0x482   : > { %v3416_v59 = vrot.slane %v3402_v32, %v4587_v41 }
 0x484   : > { %v3417_v27 = vcombine.low %v3409_v4, %v3416_v59 }
 0x486   : > { %v3419_v18 = vsel %vm314_vm3, %v3417_v27, -inf }
 0x487   : > { %v3420_v0 = vmax.f32 %v3336_v42, %v3419_v18  ;;  %v5753_v18 = vpop.f32.mrb[70].mxu0 }
 0x489   : > { %v3429_v25 = vrot.slane %v3420_v0, %v4716_v46  ;;  %v3425_v16 = vrot.slane %v3420_v0, %v4719_v47  ;;  %v3437_v15 = vrot.slane %v3420_v0, %v4725_v50  ;;  %v3433_v57 = vrot.slane %v3420_v0, %v4728_v52 }
 0x48a   : > { %v3445_v20 = vrot.slane %v3420_v0, %v4783_v30  ;;  %v3441_v35 = vrot.slane %v3420_v0, %v4786_v31  ;;  %v3453_v56 = vrot.slane %v3420_v0, %v4795_v45  ;;  %v3449_v14 = vrot.slane %v3420_v0, %v4798_v48  ;;  %v5755_v0 = vpop.f32.mrb[70].mxu1 }
 0x48b   : > { %v5703_v55 = vmax.f32 %v5476_v11, %v3429_v25  ;;  %v5706_v40 = vmax.f32 %v5469_v5, %v3425_v16  ;;  %v5713_v62 = vmax.f32 %v5486_v22, %v3437_v15  ;;  %v5716_v1 = vmax.f32 %v5481_v34, %v3433_v57  ;;  %v5758_v25 = vpop.f32.mrb[71].mxu0  ;;  %v5760_v16 = vpop.f32.mrb[71].mxu1  ;;  %v2838_v15 = vld [vmem:[%s6054_s5 + $0x8] sm:$0xff] }
 0x48c   : > { %v5721_v60 = vmax.f32 %v5578_v12, %v3445_v20  ;;  %v5726_v61 = vmax.f32 %v5573_v8, %v3441_v35  ;;  %v5735_v4 = vmax.f32 %v5585_v53, %v3453_v56  ;;  %v5738_v59 = vmax.f32 %v5582_v10, %v3449_v14  ;;  %6113 = vst [vmem:[#allocation33_spill] sm:$0xff] %v5760_v16  ;;  %v584_v57 = vpop.permute.xlu0 %583  ;;  %v586_v20 = vpop.permute.xlu1 %585 }
 0x48d   : > { %6105 = vst [vmem:[#allocation25_spill] sm:$0xff] %v5703_v55  ;;  %6106 = vst [vmem:[#allocation26_spill] sm:$0xff] %v5706_v40  ;;  %v3479_v28 = vrot.slane %v5703_v55, 3  ;;  %v3478_v29 = vrot.slane %v5706_v40, 3  ;;  %v3481_v63 = vrot.slane %v5713_v62, 3  ;;  %v3480_v2 = vrot.slane %v5716_v1, 3 }
 0x48e   : > { %6107 = vst [vmem:[#allocation27_spill] sm:$0xff] %v5713_v62  ;;  %6108 = vst [vmem:[#allocation28_spill] sm:$0xff] %v5716_v1  ;;  %v3483_v32 = vrot.slane %v5721_v60, 3  ;;  %v3482_v23 = vrot.slane %v5726_v61, 3  ;;  %v3485_v27 = vrot.slane %v5735_v4, 3  ;;  %v3484_v42 = vrot.slane %v5738_v59, 3 }
 0x48f   : > { %3496 = vrot.lane.b32.xlu1 %v3479_v28, %s4327_s16  ;;  %3494 = vrot.lane.b32.xlu0 %v3478_v29, %s4327_s16  ;;  %6109 = vst [vmem:[#allocation29_spill] sm:$0xff] %v5721_v60  ;;  %6110 = vst [vmem:[#allocation30_spill] sm:$0xff] %v5726_v61  ;;  %v606_v11 = vsel %vm599_vm4, %v584_v57, %v586_v20 }
 0x490   : > { %6111 = vst [vmem:[#allocation31_spill] sm:$0xff] %v5735_v4  ;;  %6112 = vst [vmem:[#allocation32_spill] sm:$0xff] %v5738_v59  ;;  %v588_v35 = vpop.permute.xlu0 %587 }
 0x491   : > { %v605_v5 = vsel %vm599_vm4, %v586_v20, %v588_v35 }
 0x493   : > { %3500 = vrot.lane.b32.xlu1 %v3481_v63, %s4327_s16  ;;  %3498 = vrot.lane.b32.xlu0 %v3480_v2, %s4327_s16 }
 0x497   : > { %3504 = vrot.lane.b32.xlu1 %v3483_v32, %s4327_s16  ;;  %3502 = vrot.lane.b32.xlu0 %v3482_v23, %s4327_s16 }
 0x49b   : > { %3508 = vrot.lane.b32.xlu1 %v3485_v27, %s4327_s16  ;;  %3506 = vrot.lane.b32.xlu0 %v3484_v42, %s4327_s16 }
 0x49f   : > { %3579 = vrot.lane.b32.xlu1 %v3479_v28, %s4329_s19  ;;  %3577 = vrot.lane.b32.xlu0 %v3478_v29, %s4329_s19  ;;  %v590_v28 = vpop.permute.xlu1 %589  ;;  %v592_v29 = vpop.permute.xlu0 %591 }
 0x4a0   : > { %v604_v4 = vsel %vm599_vm4, %v588_v35, %v590_v28  ;;  %v603_v59 = vsel %vm599_vm4, %v590_v28, %v592_v29 }
 0x4a1   : > { %v617_v39 = vcombine.low %v605_v5, %v604_v4 }
 0x4a3   : > { %3583 = vrot.lane.b32.xlu1 %v3481_v63, %s4329_s19  ;;  %3581 = vrot.lane.b32.xlu0 %v3480_v2, %s4329_s19  ;;  %v594_v63 = vpop.permute.xlu1 %593  ;;  %v596_v2 = vpop.permute.xlu0 %595  ;;  %v633_v49 = vrot.slane %v617_v39, %v4587_v41 }
 0x4a4   : > { %v602_v60 = vsel %vm599_vm4, %v592_v29, %v594_v63  ;;  %v601_v61 = vsel %vm599_vm4, %v594_v63, %v596_v2 }
 0x4a5   : > { %v618_v7 = vcombine.low %v603_v59, %v602_v60 }
 0x4a7   : > { %3587 = vrot.lane.b32.xlu1 %v3483_v32, %s4329_s19  ;;  %3585 = vrot.lane.b32.xlu0 %v3482_v23, %s4329_s19  ;;  %v598_v56 = vpop.permute.xlu1 %597  ;;  %v668_v14 = vpop.permute.xlu0 %667 }
 0x4a8   : > { %v600_v36 = vsel %vm599_vm4, %v596_v2, %v598_v56  ;;  %v607_v62 = vsel %vm599_vm4, %v598_v56, %v584_v57 }
 0x4a9   : > { %v619_v1 = vcombine.low %v601_v61, %v600_v36 }
 0x4ab   : > { %3591 = vrot.lane.b32.xlu1 %v3485_v27, %s4329_s19  ;;  %3589 = vrot.lane.b32.xlu0 %v3484_v42, %s4329_s19  ;;  %v670_v32 = vpop.permute.xlu1 %669  ;;  %v672_v23 = vpop.permute.xlu0 %671  ;;  %v647_v16 = vrot.slane %v619_v1, %v4587_v41  ;;  %s3820_s19 = sshll.u32 %s5967_s18, 4  ;;  %s5998_s19 = int_to_ptr.vmem [resolvable:$true] %s3820_s19 }
 0x4ac   : > { %v690_v20 = vsel %vm683_vm5, %v668_v14, %v670_v32  ;;  %v689_v35 = vsel %vm683_vm5, %v670_v32, %v672_v23  ;;  %s4254_s20 = scalar_lea.vmem %s5998_s19, 2048  ;;  %p4261_p10 = scmp.lt.s32.totalorder %s5998_s19, %s4259_s14 }
 0x4ad   : > { %v700_v55 = vcombine.low %v690_v20, %v689_v35  ;;  %p4255_p11 = scmp.ne.s32.totalorder %s5998_s19, %s4254_s20  ;;  %p4262_p0 = scmp.lt.s32.totalorder %s4260_s15, %s4254_s20 }
 0x4af   : > { %2846 = vperm.xlu0 %4199, %v2838_v15   ;;  %v674_v27 = vpop.permute.xlu1 %673  ;;  %v676_v42 = vpop.permute.xlu0 %675  ;;  %p4256_p13 = pnand %p4255_p11, %p6144_p12  ;;  %p4263_p2 = por %p4262_p0, %p4261_p10 }
 0x4b0   : > { %v688_v28 = vsel %vm683_vm5, %v672_v23, %v674_v27  ;;  %v687_v29 = vsel %vm683_vm5, %v674_v27, %v676_v42  ;;  %v616_v23 = vcombine.low %v607_v62, %v606_v11 }
 0x4b1   : > { %v701_v27 = vcombine.low %v688_v28, %v687_v29  ;;  %p4257_p8 = pneg %p4256_p13 }
 0x4b3   : > { %v678_v53 = vpop.permute.xlu1 %677  ;;  %v680_v10 = vpop.permute.xlu0 %679  ;;  %v717_v5 = vrot.slane %v701_v27, %v4587_v41  ;;  %p4264_p4 = pnand %p4263_p2, %p4257_p8 }
 0x4b4   : > { %v686_v63 = vsel %vm683_vm5, %v676_v42, %v678_v53  ;;  %v685_v2 = vsel %vm683_vm5, %v678_v53, %v680_v10  ;;  %v640_v53 = vrot.slane %v618_v7, %v4587_v41 }
 0x4b5   : > { %v702_v40 = vcombine.low %v686_v63, %v685_v2 }
 0x4b6   : > { %v649_v61 = vcombine.low %v640_v53, %v647_v16 }
 0x4b7   : > { %v682_v12 = vpop.permute.xlu1 %681  ;;  %v724_v11 = vrot.slane %v702_v40, %v4587_v41 }
 0x4b8   : > { %v684_v57 = vsel %vm683_vm5, %v680_v10, %v682_v12  ;;  %v691_v56 = vsel %vm683_vm5, %v682_v12, %v668_v14  ;;  %v626_v10 = vrot.slane %v616_v23, %v4587_v41  ;;  %v710_v14 = vrot.slane %v700_v55, %v4587_v41 }
 0x4b9   : > { %v703_v17 = vcombine.low %v684_v57, %v691_v56  ;;  %v663_v63 = vrot.slane %v649_v61, %v4587_v41 }
 0x4ba   : > { %v648_v60 = vcombine.low %v626_v10, %v633_v49  ;;  %v732_v4 = vcombine.low %v710_v14, %v717_v5 }
 0x4bb   : > { %v731_v36 = vrot.slane %v703_v17, %v4587_v41 }
 0x4bc   : > { %v656_v29 = vrot.slane %v648_v60, %v4587_v41 }
 0x4bd   : > { %v733_v59 = vcombine.low %v724_v11, %v731_v36 }
 0x4bf   : > { %v747_v56 = vrot.slane %v733_v59, %v4587_v41 }
 0x501   : > { %v3495_v8 = vpop.permute.xlu0 %3494  ;;  %v3497_v22 = vpop.permute.xlu1 %3496 }
 0x502   : > { %v3516_v40 = vsel %vm599_vm4, %v3495_v8, %v3497_v22 }
 0x505   : > { %v3499_v34 = vpop.permute.xlu0 %3498  ;;  %v3501_v15 = vpop.permute.xlu1 %3500 }
 0x506   : > { %v3515_v17 = vsel %vm599_vm4, %v3497_v22, %v3499_v34  ;;  %v3514_v49 = vsel %vm599_vm4, %v3499_v34, %v3501_v15  ;;  %v740_v22 = vrot.slane %v732_v4, %v4587_v41 }
 0x507   : > { %v3527_v57 = vcombine.low %v3515_v17, %v3514_v49 }
 0x508   : > { %v748_v5 = vcombine.low %v740_v22, %v747_v56 }
 0x509   : > { %v3503_v54 = vpop.permute.xlu0 %3502  ;;  %v3505_v32 = vpop.permute.xlu1 %3504  ;;  %v3543_v53 = vrot.slane %v3527_v57, %v4587_v41 }
 0x50a   : > { %v3513_v16 = vsel %vm599_vm4, %v3501_v15, %v3503_v54  ;;  %v3512_v20 = vsel %vm599_vm4, %v3503_v54, %v3505_v32 }
 0x50b   : > { %v3528_v34 = vcombine.low %v3513_v16, %v3512_v20  ;;  %v750_v16 = vsel %vm6114_vm0, %v748_v5, -inf }
 0x50d   : > { %v3509_v42 = vpop.permute.xlu1 %3508  ;;  %v3507_v12 = vpop.permute.xlu0 %3506  ;;  %v3550_v11 = vrot.slane %v3528_v34, %v4587_v41 }
 0x50e   : > { %v3517_v39 = vsel %vm599_vm4, %v3509_v42, %v3495_v8  ;;  %v3511_v1 = vsel %vm599_vm4, %v3505_v32, %v3507_v12  ;;  %v3510_v55 = vsel %vm599_vm4, %v3507_v12, %v3509_v42  ;;  %v664_v32 = vcombine.low %v656_v29, %v663_v63 }
 0x50f   : > { %v3526_v35 = vcombine.low %v3517_v39, %v3516_v40  ;;  %v3529_v2 = vcombine.low %v3511_v1, %v3510_v55 }
 0x510   : > { %v666_v59 = vsel %vm305_vm6, %v664_v32, -inf }
 0x511   : > { %v3580_v62 = vpop.permute.xlu1 %3579  ;;  %v3578_v7 = vpop.permute.xlu0 %3577  ;;  %v3536_v23 = vrot.slane %v3526_v35, %v4587_v41  ;;  %v3557_v27 = vrot.slane %v3529_v2, %v4587_v41  ;;  %v751_v57 = vmax.f32 %v666_v59, %v750_v16  ;;  %v6117_v59 = vld [vmem:[#allocation9_spill] sm:$0xff]  ;;  %v6121_v16 = vld [vmem:[#allocation28_spill] sm:$0xff] }
 0x512   : > { %v3599_v10 = vsel %vm683_vm5, %v3578_v7, %v3580_v62 }
 0x513   : > { %v3558_v61 = vcombine.low %v3536_v23, %v3543_v53  ;;  %v3559_v4 = vcombine.low %v3550_v11, %v3557_v27  ;;  %v756_v23 = vrot.slane %v751_v57, %v4719_v47  ;;  %v764_v32 = vrot.slane %v751_v57, %v4728_v52 }
 0x514   : > { %v768_v27 = vrot.slane %v751_v57, %v4725_v50  ;;  %v776_v53 = vrot.slane %v751_v57, %v4783_v30 }
 0x515   : > { %v3584_v28 = vpop.permute.xlu1 %3583  ;;  %v3582_v8 = vpop.permute.xlu0 %3581  ;;  %v3573_v29 = vrot.slane %v3559_v4, %v4587_v41  ;;  %v5870_v11 = vmax.f32 %v5598_v38, %v756_v23 }
 0x516   : > { %v3598_v15 = vsel %vm683_vm5, %v3580_v62, %v3582_v8  ;;  %v3597_v12 = vsel %vm683_vm5, %v3582_v8, %v3584_v28  ;;  %v5879_v13 = vmax.f32 %v5615_v24, %v768_v27 }
 0x517   : > { %v3609_v36 = vcombine.low %v3599_v10, %v3598_v15  ;;  %vm801_vm2 = vcmp.gt.f32.partialorder %v5870_v11, 0.1 }
 0x519   : > { %v3588_v54 = vpop.permute.xlu1 %3587  ;;  %v3586_v42 = vpop.permute.xlu0 %3585  ;;  %v3619_v20 = vrot.slane %v3609_v36, %v4587_v41 }
 0x51a   : > { %v3596_v14 = vsel %vm683_vm5, %v3584_v28, %v3586_v42  ;;  %v3595_v40 = vsel %vm683_vm5, %v3586_v42, %v3588_v54  ;;  %v772_v42 = vrot.slane %v751_v57, %v4786_v31 }
 0x51b   : > { %v3610_v60 = vcombine.low %v3597_v12, %v3596_v14  ;;  %v784_v14 = vrot.slane %v751_v57, %v4795_v45 }
 0x51c   : > { %v5882_v26 = vmax.f32 %v5620_v21, %v772_v42  ;;  %v6130_v42 = vld [vmem:[#allocation29_spill] sm:$0xff] }
 0x51d   : > { %v3592_v39 = vpop.permute.xlu1 %3591  ;;  %v3626_v1 = vrot.slane %v3610_v60, %v4587_v41  ;;  %v3590_v55 = vpop.permute.xlu0 %3589  ;;  %v5876_v60 = vmax.f32 %v5609_v19, %v764_v32  ;;  %v5891_v38 = vmax.f32 %v5634_v37, %v784_v14  ;;  %v6129_v32 = vld [vmem:[#allocation30_spill] sm:$0xff] }
 0x51e   : > { %v3600_v62 = vsel %vm683_vm5, %v3592_v39, %v3578_v7  ;;  %v3594_v17 = vsel %vm683_vm5, %v3588_v54, %v3590_v55  ;;  %v3593_v49 = vsel %vm683_vm5, %v3590_v55, %v3592_v39  ;;  %v3566_v7 = vrot.slane %v3558_v61, %v4587_v41 }
 0x51f   : > { %v3611_v35 = vcombine.low %v3595_v40, %v3594_v17  ;;  %v3612_v28 = vcombine.low %v3593_v49, %v3600_v62  ;;  %v3641_v63 = vcombine.low %v3619_v20, %v3626_v1  ;;  %v760_v54 = vrot.slane %v751_v57, %v4716_v46  ;;  %v6116_v62 = vld [vmem:[#allocation33_spill] sm:$0xff]  ;;  %v6118_v40 = vld [vmem:[#allocation10_spill] sm:$0xff] }
 0x520   : > { %v3574_v3 = vcombine.low %v3566_v7, %v3573_v29  ;;  %v5885_v61 = vmax.f32 %v5625_v44, %v776_v53  ;;  %vm803_vm4 = vcmp.gt.f32.partialorder %v5876_v60, 0.1  ;;  %vm804_vm5 = vcmp.gt.f32.partialorder %v5879_v13, 0.1  ;;  %v6119_v17 = vld [vmem:[#allocation26_spill] sm:$0xff]  ;;  %v6120_v49 = vld [vmem:[#allocation25_spill] sm:$0xff] }
 0x521   : > { %v3633_v2 = vrot.slane %v3611_v35, %v4587_v41  ;;  %v3640_v8 = vrot.slane %v3612_v28, %v4587_v41  ;;  %v3649_v56 = vrot.slane %v3641_v63, %v4587_v41  ;;  %v5873_v36 = vmax.f32 %v5603_v9, %v760_v54  ;;  %v6122_v35 = vld [vmem:[#allocation11_spill] sm:$0xff]  ;;  %v6123_v7 = vld [vmem:[#allocation12_spill] sm:$0xff]  ;;  %v6124_v63 = vld [vmem:[#allocation17_spill] sm:$0xff] }
 0x522   : > { %v3576_v10 = vsel %vm305_vm6, %v3574_v3, -inf  ;;  %vm805_vm6 = vcmp.gt.f32.partialorder %v5882_v26, 0.1  ;;  %vm806_vm12 = vcmp.gt.f32.partialorder %v5885_v61, 0.1  ;;  %v6128_v3 = vld [vmem:[#allocation20_spill] sm:$0xff] }
 0x523   : > { %v3642_v22 = vcombine.low %v3633_v2, %v3640_v8  ;;  %vm802_vm3 = vcmp.gt.f32.partialorder %v5873_v36, 0.1  ;;  %v6125_v2 = vld [vmem:[#allocation27_spill] sm:$0xff] }
 0x524   : > { %v6126_v8 = vld [vmem:[#allocation19_spill] sm:$0xff] }
 0x525   : > { %v3656_v34 = vrot.slane %v3642_v22, %v4587_v41  ;;  %v780_v41 = vrot.slane %v751_v57, %v4798_v48  ;;  %v6127_v57 = vld [vmem:[#allocation18_spill] sm:$0xff] }
 0x527   : > { %v3657_v15 = vcombine.low %v3649_v56, %v3656_v34  ;;  %v5888_v39 = vmax.f32 %v5630_v51, %v780_v41  ;;  %v4216_v34 = vld [vmem:[#allocation2 + $0x40] sm:$0xff]  ;;  %v6132_v41 = vld [vmem:[#allocation31_spill] sm:$0xff] }
 0x529   : > { %v3659_v12 = vsel %vm6115_vm1, %v3657_v15, -inf  ;;  %v4217_v15 = vld [vmem:[#allocation2 + $0x48] sm:$0xff] }
 0x52a   : > { %v3660_v5 = vmax.f32 %v3576_v10, %v3659_v12  ;;  %v6131_v10 = vld [vmem:[#allocation32_spill] sm:$0xff] }
 0x52c   : > { %v3665_v9 = vrot.slane %v3660_v5, %v4719_v47  ;;  %v3669_v19 = vrot.slane %v3660_v5, %v4716_v46  ;;  %v3673_v24 = vrot.slane %v3660_v5, %v4728_v52  ;;  %v3677_v21 = vrot.slane %v3660_v5, %v4725_v50 }
 0x52d   : > { %v3681_v44 = vrot.slane %v3660_v5, %v4786_v31 }
 0x52e   : > { %v2847_v4 = vpop.permute.xlu0 %2846  ;;  %v3704_v20 = vmax.f32 %v6121_v16, %v3673_v24  ;;  %v4220_v24 = vld [vmem:[#allocation2 + $0x60] sm:$0xff] }
 0x52f   : > { %v2922_v51 = vadd.f32 %v5463_v43, %v2847_v4  ;;  %v2924_v37 = vadd.f32 %v5471_v58, %v2847_v4  ;;  %v2999_v1 = vadd.f32 %v5489_v33, %v2847_v4  ;;  %v3001_v47 = vadd.f32 %v5492_v6, %v2847_v4 }
 0x530   : > { %v3076_v46 = vadd.f32 %v5753_v18, %v2847_v4  ;;  %v3078_v52 = vadd.f32 %v5758_v25, %v2847_v4  ;;  %v3153_v55 = vadd.f32 %v5755_v0, %v2847_v4  ;;  %v3155_v31 = vadd.f32 %v6116_v62, %v2847_v4  ;;  %v4219_v4 = vld [vmem:[#allocation2 + $0x58] sm:$0xff] }
 0x531   : > { %v3206_v43 = vmul.f32 %v6117_v59, %v2922_v51  ;;  %v3207_v58 = vmul.f32 %v6118_v40, %v2924_v37  ;;  %v3685_v33 = vrot.slane %v3660_v5, %v4783_v30  ;;  %v3689_v6 = vrot.slane %v3660_v5, %v4798_v48  ;;  %v4222_v37 = vld [vmem:[#allocation2 + $0x70] sm:$0xff] }
 0x532   : > { %v3693_v18 = vrot.slane %v3660_v5, %v4795_v45  ;;  %v3702_v25 = vmax.f32 %v6119_v17, %v3665_v9  ;;  %v3703_v0 = vmax.f32 %v6120_v49, %v3669_v19  ;;  %v3208_v28 = vmul.f32 %v6122_v35, %v2999_v1  ;;  %v4218_v5 = vld [vmem:[#allocation2 + $0x50] sm:$0xff] }
 0x533   : > { %v3209_v29 = vmul.f32 %v6123_v7, %v3001_v47  ;;  %v3210_v30 = vmul.f32 %v6124_v63, %v3076_v46  ;;  %v3705_v48 = vmax.f32 %v6125_v2, %v3677_v21  ;;  %v3211_v45 = vmul.f32 %v6126_v8, %v3078_v52  ;;  %v4223_v52 = vld [vmem:[#allocation2 + $0x78] sm:$0xff]  ;;  %v6137_v49 = vld [vmem:[#allocation15_spill] sm:$0xff] }
 0x534   : > { %v3212_v22 = vmul.f32 %v6127_v57, %v3153_v55  ;;  %v3213_v56 = vmul.f32 %v6128_v3, %v3155_v31  ;;  %v3222_v23 = vadd.f32 %v4216_v34, %v3206_v43  ;;  %v3223_v54 = vadd.f32 %v4217_v15, %v3207_v58  ;;  %v6134_v43 = vld [vmem:[#allocation13_spill] sm:$0xff]  ;;  %v6142_v57 = vld [vmem:[#allocation23_spill] sm:$0xff] }
 0x535   : > { %v3706_v27 = vmax.f32 %v6129_v32, %v3681_v44  ;;  %v3707_v53 = vmax.f32 %v6130_v42, %v3685_v33  ;;  %v3708_v12 = vmax.f32 %v6131_v10, %v3689_v6  ;;  %v3709_v14 = vmax.f32 %v6132_v41, %v3693_v18  ;;  %v4221_v44 = vld [vmem:[#allocation2 + $0x68] sm:$0xff] }
 0x536   : > { %vm3710_vm10 = vcmp.gt.f32.partialorder %v3702_v25, 0.1  ;;  %vm3711_vm9 = vcmp.gt.f32.partialorder %v3703_v0, 0.1  ;;  %vm3712_vm7 = vcmp.gt.f32.partialorder %v3704_v20, 0.1  ;;  %v3224_v9 = vadd.f32 %v4218_v5, %v3208_v28 }
 0x537   : > { %v3225_v19 = vadd.f32 %v4219_v4, %v3209_v29  ;;  %v3226_v21 = vadd.f32 %v4220_v24, %v3210_v30  ;;  %vm3713_vm14 = vcmp.gt.f32.partialorder %v3705_v48, 0.1  ;;  %vm3718_vm11 = vmand %vm801_vm2, %vm3710_vm10  ;;  %v3227_v51 = vadd.f32 %v4221_v44, %v3211_v45  ;;  %v6135_v6 = vld [vmem:[#allocation14_spill] sm:$0xff]  ;;  %v6139_v20 = vld [vmem:[#allocation16_spill] sm:$0xff] }
 0x538   : > { %v3228_v1 = vadd.f32 %v4222_v37, %v3212_v22  ;;  %vm3714_vm13 = vcmp.gt.f32.partialorder %v3706_v27, 0.1  ;;  %vm3719_vm0 = vmand %vm802_vm3, %vm3711_vm9  ;;  %v6133_v47 = vmov 0.0   ;;  %v3229_v55 = vadd.f32 %v4223_v52, %v3213_v56  ;;  %v6140_v29 = vld [vmem:[#allocation21_spill] sm:$0xff]  ;;  %v6141_v48 = vld [vmem:[#allocation22_spill] sm:$0xff] }
 0x539   : > { %v3982_v46 = vsel %vm3718_vm11, 1.0, %v6133_v47  ;;  %vm3715_vm1 = vcmp.gt.f32.partialorder %v3707_v53, 0.1  ;;  %vm3720_vm8 = vmand %vm803_vm4, %vm3712_vm7  ;;  %v3983_v11 = vsel %vm3719_vm0, 1.0, %v6133_v47  ;;  %vm3716_vm2 = vcmp.gt.f32.partialorder %v3708_v12, 0.1 }
 0x53a   : > { %v3745_v62 = vrot.slane %v3982_v46, %v4725_v50  ;;  %vm3717_vm10 = vcmp.gt.f32.partialorder %v3709_v14, 0.1  ;;  %vm3721_vm15 = vmand %vm804_vm5, %vm3713_vm14  ;;  %v3984_v36 = vsel %vm3720_vm8, 1.0, %v6133_v47  ;;  %v3749_v31 = vrot.slane %v3983_v11, %v4725_v50 }
 0x53b   : > { %vm3722_vm3 = vmand %vm805_vm6, %vm3714_vm13  ;;  %v3985_v60 = vsel %vm3721_vm15, 1.0, %v6133_v47  ;;  %v3753_v59 = vrot.slane %v3984_v36, %v4725_v50  ;;  %vm6136_vm5 = vcmp.gt.f32.partialorder %v5888_v39, 0.1 }
 0x53c   : > { %v3774_v40 = vmul.f32 %v3745_v62, %v6134_v43  ;;  %v3782_v58 = vmul.f32 %v3745_v62, %v3222_v23  ;;  %vm3723_vm4 = vmand %vm806_vm12, %vm3715_vm1  ;;  %v3986_v13 = vsel %vm3722_vm3, 1.0, %v6133_v47  ;;  %v3757_v33 = vrot.slane %v3985_v60, %v4725_v50 }
 0x53d   : > { %v3775_v18 = vmul.f32 %v3749_v31, %v6135_v6  ;;  %v3783_v17 = vmul.f32 %v3749_v31, %v3223_v54  ;;  %vm3724_vm6 = vmand %vm6136_vm5, %vm3716_vm2  ;;  %v3987_v26 = vsel %vm3723_vm4, 1.0, %v6133_v47  ;;  %v3761_v25 = vrot.slane %v3986_v13, %v4725_v50 }
 0x53e   : > { %v3776_v0 = vmul.f32 %v3753_v59, %v6137_v49  ;;  %v3784_v61 = vmul.f32 %v3753_v59, %v3224_v9  ;;  %3790 = vst [vmem:[%s5967_s18] sm:$0xff] %v3774_v40  ;;  %3798 = vst [vmem:[%s5967_s18 + $0x40] sm:$0xff] %v3782_v58  ;;  %vm6138_vm12 = vcmp.gt.f32.partialorder %v5891_v38, 0.1  ;;  %v3988_v39 = vsel %vm3724_vm6, 1.0, %v6133_v47 }
 0x53f   : > { %vm3725_vm15 = vmand %vm6138_vm12, %vm3717_vm10  ;;  %v3765_v16 = vrot.slane %v3987_v26, %v4725_v50  ;;  %v3777_v35 = vmul.f32 %v3757_v33, %v6139_v20  ;;  %v3785_v28 = vmul.f32 %v3757_v33, %v3225_v19  ;;  %3791 = vst [vmem:[%s5967_s18 + $0x8] sm:$0xff] %v3775_v18  ;;  %v3769_v38 = vrot.slane %v3988_v39, %v4725_v50 }
 0x540   : > { %3799 = vst [vmem:[%s5967_s18 + $0x48] sm:$0xff] %v3783_v17  ;;  %v3989_v7 = vsel %vm3725_vm15, 1.0, %v6133_v47  ;;  %v3778_v63 = vmul.f32 %v3761_v25, %v6140_v29  ;;  %v3786_v30 = vmul.f32 %v3761_v25, %v3226_v21  ;;  %3792 = vst [vmem:[%s5967_s18 + $0x10] sm:$0xff] %v3776_v0 }
 0x541   : > { %3800 = vst [vmem:[%s5967_s18 + $0x50] sm:$0xff] %v3784_v61  ;;  %v3773_v2 = vrot.slane %v3989_v7, %v4725_v50  ;;  %v3779_v8 = vmul.f32 %v3765_v16, %v6141_v48  ;;  %v3787_v45 = vmul.f32 %v3765_v16, %v3227_v51  ;;  %3793 = vst [vmem:[%s5967_s18 + $0x18] sm:$0xff] %v3777_v35  ;;  %v6143_v50 = vld [vmem:[#allocation24_spill] sm:$0xff] }
 0x542   : > { %3801 = vst [vmem:[%s5967_s18 + $0x58] sm:$0xff] %v3785_v28  ;;  %v3780_v22 = vmul.f32 %v3769_v38, %v6142_v57  ;;  %v3788_v3 = vmul.f32 %v3769_v38, %v3228_v1  ;;  %3794 = vst [vmem:[%s5967_s18 + $0x20] sm:$0xff] %v3778_v63 }
 0x543   : > { %3802 = vst [vmem:[%s5967_s18 + $0x60] sm:$0xff] %v3786_v30  ;;  %v3781_v56 = vmul.f32 %v3773_v2, %v6143_v50  ;;  %v3789_v34 = vmul.f32 %v3773_v2, %v3229_v55  ;;  %3795 = vst [vmem:[%s5967_s18 + $0x28] sm:$0xff] %v3779_v8 }
 0x544   : > { %3803 = vst [vmem:[%s5967_s18 + $0x68] sm:$0xff] %v3787_v45  ;;  %3796 = vst [vmem:[%s5967_s18 + $0x30] sm:$0xff] %v3780_v22 }
 0x545   : > { %3804 = vst [vmem:[%s5967_s18 + $0x70] sm:$0xff] %v3788_v3  ;;  %3797 = vst [vmem:[%s5967_s18 + $0x38] sm:$0xff] %v3781_v56 }
 0x546   : > { %3805 = vst [vmem:[%s5967_s18 + $0x78] sm:$0xff] %v3789_v34 }
 0x547   : > { %4267 = shalt.err (!%p4264_p4)
}
 0x548   : > { %s4268_s17 = scalar_lea.hbm %s5996_s12, 2048  ;;  %s4272_s16 = scalar_lea.hbm %s6055_s6, 4096 }
 0x549   : > { %p4269_p5 = scmp.ne.s32.totalorder %s5996_s12, %s4268_s17  ;;  %p4273_p1 = scmp.lt.u32.totalorder %s5996_s12, %s6055_s6 }
 0x54a   : > { %p4274_p3 = scmp.lt.u32.totalorder %s4272_s16, %s4268_s17  ;;  %p4276_p11 = scmp.lt.u32.totalorder %s4268_s17, %s5996_s12 }
 0x54b   : > { %p4270_p7 = pnand %p4269_p5, %p6144_p12 }
 0x54c   : > { %p4275_p6 = por %p4274_p3, %p4273_p1 }
 0x54d   : > { %p4271_p9 = pneg %p4270_p7 }
 0x54e   : > { %p4277_p13 = por %p4276_p11, %p4275_p6 }
 0x550   : > { %p4278_p8 = pnand %p4277_p13, %p4271_p9 }
 0x552   : > { %4281 = shalt.err (!%p4278_p8)
}
 0x553   : > { %s4334_s25 = smov 1024   ;;  %s4335_s28 = smov 64  }
 0x554   : > { %4143 = dma.vmem_to_hbm [thread:$0]  (%p6144_p12), %s5998_s19, 2048, %s5996_s12, %s3807_s13, %s4334_s25, %s4334_s25, %s4335_s28  }
 0x555 PF: > { %s3835_s20 = sand.u32 1, %s4308_s21   ;;  %p6145_p10 = scmp.ne.s32.totalorder %s6087_s10, 0 }
 0x556   : > { %p6146_p0 = scmp.ge.s32.totalorder %s4320_s24, 2  ;;  %s3836_s11 = scalar_lea.sflag [#allocation5], %s3835_s20 }
 0x558   : > { %p4150_p2 = pnand %p6146_p0, %p6145_p10 }
 0x55a   : > { %4303 = dma.done.wait (!%p4150_p2), %s3836_s11, 2048  }
 0x55b   : > { %4305 = vsyncadd (!%p4150_p2), %s3836_s11, 4294965248  ;;  %p19_p4 = scmp.ge.s32.totalorder %s4396_s27, 4   ;;  %s6147_s21 = smov %s4312_s22 }
 0x55c   : > { %s6148_s22 = smov %s4316_s23  ;;  %s6149_s23 = smov %s4408_s30 }
 0x55d   : > { %s6150_s24 = smov %s4396_s27  ;;  %21 = sbr.rel (!%p19_p4) target bundleno = 5 (0x5), region = 98 }
 0x564   :  { %3841 = vsyncpa [#allocation4], 1 }
 0x565   :  { %3843 = vsyncpa [#allocation4 + $0x1], 1 }
 0x566   :  { %3844 = vsyncpa [#allocation5], 1 }
 0x567   :  { %3846 = vsyncpa [#allocation5 + $0x1], 1 }

</bundles_post_ra>
